<compile_context>
chip_gen: v6e
topology: v6e:2x2x1
jax: 0.10.0
libtpu: 0.0.40
codegen_flags: <defaults>
</compile_context>

<pallas_src>
from functools import partial

import jax
import jax.numpy as jnp
import numpy as np
from jax.experimental import pallas as pl
from jax.experimental.pallas import tpu as pltpu

# ---- small synthetic configuration consistent with the module ----
MAX_LENGTH = 16          # sequence length
HIDDEN_DIM = 32          # BERT hidden size (shrunk)
NUM_DOMAINS = 3
DESCRIPTOR_DIM = 32      # descriptor_dimension
HIDDEN_SIZE = 32         # hidden_size of the small MLP heads
TEMPERATURE = 0.5        # gumbel-softmax temperature
MASKING = 0.1
ALPHA = 1.0              # RevGrad alpha (backward-only; unused in forward math)

_PREC = jax.lax.Precision.HIGHEST   # exact-f32 matmuls (tiny heads; drop at BERT scale)


def _sigmoid(x):
    return 1.0 / (1.0 + jnp.exp(-x))


def _gumbel_noise(key, shape, eps=1e-20):
    u = jax.random.uniform(key, shape, jnp.float32)
    return -jnp.log(-jnp.log(u + eps) + eps)


def _vmem_capacity_bytes():
    try:
        return int(pltpu.get_tpu_info().vmem_capacity_bytes)
    except Exception:
        return 64 << 20        # conservative fallback (v7x per-TC VMEM)


def _pick_block_b(B, M, d, H, itemsize=4):
    """Largest batch block that fits VMEM double-buffered, with >= 2 grid steps."""
    budget = _vmem_capacity_bytes() // 4                      # headroom: consts + scratch
    per_sample = 2 * itemsize * (M * (2 * d + 4) + H          # blocked inputs
                                 + M * 2 * d + d + 8)         # blocked outputs
    bt = max(1, min(B, budget // max(per_sample, 1)))
    if B >= 2:
        bt = min(bt, max(1, B // 2))   # >= 2 steps on the "parallel" axis (v7x: 2 TCs)
    while B % bt:
        bt -= 1
    return int(bt)


# =====================================================================================
# Fused kernel: z construction + token-mask gate + masked input embeddings + private
# representation branch, fully vectorized over a (Bt, M, .) batch block.
# =====================================================================================
def _shared_part_fused_kernel(hid_ref, inp_ref, aux_ref, dh0_ref,
                              memb_ref, dh1_ref, w1r_ref, b1_ref, w2_ref, b2_ref,
                              wd1_ref, bd1_ref, wd2_ref, bd2_ref,
                              ie_ref, pr_ref, pr2_ref, y2_ref, mp_ref,
                              *, temp, masking):
    f32 = jnp.float32
    bt, m, d = hid_ref.shape
    hdim = w1r_ref.shape[1]
    nd_out = wd2_ref.shape[1]
    inv_temp = 1.0 / temp

    hid = hid_ref[...]                     # (Bt, M, d) hidden embeddings
    inp = inp_ref[...]                     # (Bt, M, d) input embeddings
    aux = aux_ref[...]                     # (Bt, M, 4) packed [seg, zeros, g0, g1]
    seg = aux[:, :, 0:1]                   # attention / PAD mask
    zeros = aux[:, :, 1:2]                 # CLS / SEP mask
    g0 = aux[:, :, 2:3]                    # gumbel noise, channel 0
    g1 = aux[:, :, 3:4]                    # gumbel noise, channel 1

    memb = memb_ref[...]                   # (1, d)  mask embedding
    b1 = b1_ref[...]                       # (1, H)
    w2 = w2_ref[...]                       # (1, H)  mlps second Linear as a row
    b2 = b2_ref[...]                       # (1, 1)
    dh0 = dh0_ref[...]                     # (Bt, 1, H) descriptors[dom[b]] @ W1[d:]
    dh1 = dh1_ref[...]                     # (1, H)     mean(descriptors) @ W1[d:]

    # --- token-mask gate: mlps over both z slabs, z rebuilt on the fly -------------
    # z[...,k,:] = [rep*m | descr_k*m]  =>  z_k @ W1 = (rep*m)@W1[:d] + m*(descr_k@W1[d:])
    rep_m = hid * seg
    base = jnp.dot(rep_m.reshape(bt * m, d), w1r_ref[...],
                   precision=_PREC, preferred_element_type=f32).reshape(bt, m, hdim)
    h0 = jnp.tanh(base + seg * dh0 + b1)                      # (Bt, M, H)
    h1 = jnp.tanh(base + seg * dh1 + b1)
    logit0 = jnp.sum(h0 * w2, axis=-1, keepdims=True) + b2    # (Bt, M, 1)
    logit1 = jnp.sum(h1 * w2, axis=-1, keepdims=True) + b2

    def log_sigmoid(x):   # log(sigmoid(x)) without the log(0) = -inf hazard
        return jnp.minimum(x, 0.0) - jnp.log(1.0 + jnp.exp(-jnp.abs(x)))

    # gumbel-softmax over the 2 channels; only channel 0 is consumed downstream
    x0 = (log_sigmoid(logit0) + g0) * inv_temp
    x1 = (log_sigmoid(logit1) + g1) * inv_temp
    mx = jnp.maximum(x0, x1)
    e0 = jnp.exp(x0 - mx)
    e1 = jnp.exp(x1 - mx)
    ps0 = e0 / (e0 + e1) - masking                            # (Bt, M, 1), lane-width 1
    # straight-through round (forward value).  TODO(synk): torch.round is half-to-even.
    p0 = jnp.where(ps0 >= 0.5, 1.0, 0.0)

    keep = seg * (1.0 - zeros)                                # non-PAD, non-special

    # --- masked input embeddings handed to BERT (input_e) --------------------------
    emb = (1.0 - p0) * inp + p0 * memb
    ie_ref[...] = emb * (1.0 - zeros) + inp * zeros

    # --- private-representation branch ----------------------------------------------
    pk = p0 * keep                                            # (Bt, M, 1)
    num = jnp.sum(pk, axis=1, keepdims=True)                  # (Bt, 1, 1)
    denom = num + (num == 0.0).astype(f32)
    pr2 = jnp.sum(hid * pk, axis=1, keepdims=True) / denom    # (Bt, 1, d)
    pr2_ref[...] = pr2

    h_priv = hid * keep * pr2
    a_num = jnp.exp(1.0 / (1.0 + jnp.exp(-h_priv))) * keep    # softmask numerator
    inv_sum = 1.0 / (jnp.sum(a_num, axis=1, keepdims=True) + 1e-9)   # reduced divide
    pr_ref[...] = hid * (a_num * inv_sum) * keep

    # --- dcp head + mask percentage (tiny) -------------------------------------------
    pr2f = pr2.reshape(bt, d)
    hdc = jnp.tanh(jnp.dot(pr2f, wd1_ref[...], precision=_PREC,
                           preferred_element_type=f32) + bd1_ref[...])
    y2 = jnp.dot(hdc, wd2_ref[...], precision=_PREC,
                 preferred_element_type=f32) + bd2_ref[...]
    y2_ref[...] = y2.reshape(bt, 1, nd_out)
    # NB: divides by zero if a sample has no non-special tokens (same as the reference).
    mp_ref[...] = num / jnp.sum(keep, axis=1, keepdims=True)


def shared_part_pallas(params, hidden_embeddings, input_embedding, mask_embedding,
                       segments_tensor, domain_list, descriptors, gumbel,
                       *, temp, masking, block_b=None):
    f32 = jnp.float32
    B, M, d = hidden_embeddings.shape
    H = params["w1"].shape[1]
    ND = params["wd2"].shape[1]

    hid = hidden_embeddings.astype(f32)
    inp = input_embedding.astype(f32)
    memb = mask_embedding.astype(f32).reshape(1, d)

    # ---- tiny wrapper-side precompute hoisted out of the kernel --------------------
    seg = segments_tensor.astype(f32)                               # (B, M)
    sep = jnp.sum(seg, axis=1).astype(jnp.int32) - 1                # SEP position
    cols = jnp.arange(M, dtype=jnp.int32)[None, :]
    zeros = jnp.logical_or(cols == sep[:, None], cols == 0).astype(f32)
    aux = jnp.stack([seg, zeros, gumbel[..., 0].astype(f32), gumbel[..., 1].astype(f32)],
                    axis=-1)                                        # (B, M, 4)

    # Descriptor halves of z only enter through mlps' first Linear; precompute the rows.
    w1 = params["w1"].astype(f32)
    w1r = w1[:d, :]                                                 # rep part of W1
    dh_all = jnp.dot(descriptors.astype(f32), w1[d:, :], precision=_PREC)   # (nd, H)
    dh0 = dh_all[domain_list].reshape(B, 1, H)                      # per-sample gather
    dh1 = jnp.dot(jnp.mean(descriptors.astype(f32), axis=0, keepdims=True),
                  w1[d:, :], precision=_PREC)                       # (1, H)

    Bt = int(block_b) if block_b is not None else _pick_block_b(B, M, d, H)
    grid = (B // Bt,)

    kernel = partial(_shared_part_fused_kernel, temp=float(temp), masking=float(masking))
    blk3 = lambda shp: pl.BlockSpec(shp, lambda b: (b, 0, 0))
    cst2 = lambda shp: pl.BlockSpec(shp, lambda b: (0, 0))

    outs = pl.pallas_call(
        kernel,
        out_shape=(
            jax.ShapeDtypeStruct((B, M, d), f32),    # input_e
            jax.ShapeDtypeStruct((B, M, d), f32),    # private_rep
            jax.ShapeDtypeStruct((B, 1, d), f32),    # private_rep2
            jax.ShapeDtypeStruct((B, 1, ND), f32),   # y_pred2
            jax.ShapeDtypeStruct((B, 1, 1), f32),    # mask_perc
        ),
        grid_spec=pltpu.PrefetchScalarGridSpec(
            num_scalar_prefetch=0,
            grid=grid,
            in_specs=[
                blk3((Bt, M, d)),        # hidden_embeddings
                blk3((Bt, M, d)),        # input_embedding
                blk3((Bt, M, 4)),        # packed [seg, zeros, g0, g1]
                blk3((Bt, 1, H)),        # per-sample descriptor row @ W1[d:]
                cst2((1, d)),            # mask embedding
                cst2((1, H)),            # mean-descriptor row @ W1[d:]
                cst2((d, H)), cst2((1, H)), cst2((1, H)), cst2((1, 1)),    # mlps
                cst2((d, H)), cst2((1, H)), cst2((H, ND)), cst2((1, ND)),  # dcp
            ],
            out_specs=[
                blk3((Bt, M, d)), blk3((Bt, M, d)),
                blk3((Bt, 1, d)), blk3((Bt, 1, ND)), blk3((Bt, 1, 1)),
            ],
        ),
        compiler_params=pltpu.CompilerParams(
            dimension_semantics=("parallel",),
            vmem_limit_bytes=int(min(_vmem_capacity_bytes() // 2, 64 << 20)),
        ),
    )(hid, inp, aux, dh0, memb, dh1,
      w1r, params["b1"].astype(f32), params["w2"].astype(f32), params["b2"].astype(f32),
      params["wd1"].astype(f32), params["bd1"].astype(f32),
      params["wd2"].astype(f32), params["bd2"].astype(f32))

    input_e, private_rep, pr2, y2, mp = outs
    return (y2.reshape(B, ND), private_rep, pr2.reshape(B, d), mp.reshape(B), input_e)


class SharedPartPallas:
    """JAX/Pallas counterpart of SharedPart (the self-contained forward path).

    The original torch forward receives z = concatenate_tensors(hidden_embeddings,
    descriptors, domain_list, attention_mask) precomputed by the parent BERTMasker.
    Here that producer is fused into the kernel (z never hits HBM), so forward takes
    (domain_list, descriptors) instead of z — same math, validated against a pure-JAX
    reference that materializes z explicitly.
    """

    def __init__(self, key, hidden_size=HIDDEN_SIZE, temp=TEMPERATURE, alpha=ALPHA,
                 masking=MASKING):
        C = HIDDEN_DIM + DESCRIPTOR_DIM
        ks = jax.random.split(key, 4)
        u = lambda k, s: jax.random.uniform(k, s, jnp.float32, minval=-0.1, maxval=0.1)
        self.params = dict(
            # mlps: Linear(C,H) -> Tanh -> Linear(H,1) -> Sigmoid (weights U(-0.1,0.1), bias 0)
            w1=u(ks[0], (C, hidden_size)), b1=jnp.zeros((1, hidden_size), jnp.float32),
            w2=u(ks[1], (1, hidden_size)), b2=jnp.zeros((1, 1), jnp.float32),
            # dcp: Linear(d,H) -> Tanh -> Linear(H, num_domains)
            wd1=u(ks[2], (HIDDEN_DIM, hidden_size)), bd1=jnp.zeros((1, hidden_size), jnp.float32),
            wd2=u(ks[3], (hidden_size, NUM_DOMAINS)), bd2=jnp.zeros((1, NUM_DOMAINS), jnp.float32),
        )
        self.temp = float(temp)
        self.masking = float(masking)
        self.alpha = float(alpha)   # RevGrad alpha: backward-only, identity in forward

    def forward(self, hidden_embeddings, input_embedding, mask_embedding,
                segments_tensor, domain_list, descriptors, rng_key):
        B, M, _ = hidden_embeddings.shape
        gumbel = _gumbel_noise(rng_key, (B, M, 2))   # torch draws this inside gumbel_softmax
        y_pred2, private_rep, private_rep2, mask_perc, input_e = shared_part_pallas(
            self.params, hidden_embeddings, input_embedding, mask_embedding,
            segments_tensor, domain_list, descriptors, gumbel,
            temp=self.temp, masking=self.masking)
        y_pred = None      # TODO(synk): requires the external BERT encoder + dcs head
        summed_hs = None   # TODO(synk): requires the external BERT hidden states
        return y_pred, summed_hs, y_pred2, private_rep, mask_perc, input_e


# =====================================================================================
# Pure-JAX references (materialize z explicitly; used to validate the fusion)
# =====================================================================================
def concatenate_tensors_ref(representation, descriptors, domain_list, att_masks):
    B, M, _ = representation.shape
    L = descriptors.shape[1]
    ave = jnp.mean(descriptors, axis=0)
    ave2 = jnp.broadcast_to(ave[None, None, :], (B, M, L))
    dom = descriptors[domain_list]
    dom2 = jnp.broadcast_to(dom[:, None, :], (B, M, L))
    m = att_masks.astype(representation.dtype)[..., None]
    c1 = jnp.concatenate([representation, dom2], axis=-1) * m
    c2 = jnp.concatenate([representation, ave2], axis=-1) * m
    return jnp.stack([c1, c2], axis=-2)


def shared_part_ref(params, hidden_embeddings, input_embedding, mask_embedding,
                    segments_tensor, z, gumbel, temp, masking):
    B, M, d = hidden_embeddings.shape
    h = jnp.tanh(jnp.einsum('bmkc,ch->bmkh', z, params['w1'], precision=_PREC)
                 + params['b1'][0])
    pi = _sigmoid(jnp.sum(h * params['w2'][0], axis=-1) + params['b2'][0, 0])   # (B, M, 2)
    x = (jnp.log(pi) + gumbel) / temp
    x = x - jnp.max(x, axis=-1, keepdims=True)
    e = jnp.exp(x)
    ps = e / jnp.sum(e, axis=-1, keepdims=True) - masking
    p0 = jnp.where(ps[..., 0] >= 0.5, 1.0, 0.0)
    s = jnp.sum(segments_tensor, axis=1).astype(jnp.int32) - 1
    cols = jnp.arange(M)[None, :]
    zeros = jnp.logical_or(cols == s[:, None], cols == 0).astype(jnp.float32)
    keep = segments_tensor * (1.0 - zeros)
    emb = (1.0 - p0)[..., None] * input_embedding + p0[..., None] * mask_embedding[None, None, :]
    input_e = emb * (1.0 - zeros)[..., None] + input_embedding * zeros[..., None]
    num = jnp.sum(p0 * keep, axis=1, keepdims=True)
    denom = num + (num == 0.0).astype(jnp.float32)
    private_rep2 = jnp.sum(hidden_embeddings * (p0 * keep)[..., None], axis=1) / denom
    h_priv = hidden_embeddings * keep[..., None] * private_rep2[:, None, :]
    a_num = jnp.exp(_sigmoid(h_priv)) * keep[..., None]
    a = a_num / (jnp.sum(a_num, axis=1, keepdims=True) + 1e-9)
    private_rep = hidden_embeddings * a * keep[..., None]
    hdc = jnp.tanh(jnp.dot(private_rep2, params['wd1'], precision=_PREC) + params['bd1'][0])
    y_pred2 = jnp.dot(hdc, params['wd2'], precision=_PREC) + params['bd2'][0]
    mask_perc = num[:, 0] / jnp.sum(keep, axis=1)
    return y_pred2, private_rep, private_rep2, mask_perc, input_e


if __name__ == "__main__":
    key = jax.random.PRNGKey(0)
    k_desc, k_hid, k_inp, k_mask, k_len, k_dom, k_params, k_gumbel = jax.random.split(key, 8)

    B = 8   # small, but enough for 2 grid steps on the parallel batch axis
    descriptors = jax.random.uniform(k_desc, (NUM_DOMAINS, DESCRIPTOR_DIM), jnp.float32,
                                     minval=-0.1, maxval=0.1)
    hidden_embeddings = jax.random.normal(k_hid, (B, MAX_LENGTH, HIDDEN_DIM), jnp.float32)
    input_embedding = jax.random.normal(k_inp, (B, MAX_LENGTH, HIDDEN_DIM), jnp.float32)
    mask_embedding = jax.random.normal(k_mask, (HIDDEN_DIM,), jnp.float32)
    # per-sample real lengths (CLS + content + SEP, tail is PAD)
    lens = jax.random.randint(k_len, (B,), 5, MAX_LENGTH + 1)
    segments_tensor = (jnp.arange(MAX_LENGTH)[None, :] < lens[:, None]).astype(jnp.float32)
    domain_list = jax.random.randint(k_dom, (B,), 0, NUM_DOMAINS, jnp.int32)

    model = SharedPartPallas(k_params)
    y_pred, summed_hs, y_pred2, private_rep, mask_perc, input_e = model.forward(
        hidden_embeddings, input_embedding, mask_embedding, segments_tensor,
        domain_list, descriptors, k_gumbel)
    y_pred2, private_rep, mask_perc, input_e = jax.block_until_ready(
        (y_pred2, private_rep, mask_perc, input_e))

    # Pure-JAX reference that materializes z explicitly (validates the fusion).
    z = concatenate_tensors_ref(hidden_embeddings, descriptors, domain_list, segments_tensor)
    gumbel = _gumbel_noise(k_gumbel, (B, MAX_LENGTH, 2))
    y2_r, pr_r, pr2_r, mp_r, ie_r = shared_part_ref(
        model.params, hidden_embeddings, input_embedding, mask_embedding,
        segments_tensor, z, gumbel, TEMPERATURE, MASKING)

    assert input_e.shape == (B, MAX_LENGTH, HIDDEN_DIM)
    assert private_rep.shape == (B, MAX_LENGTH, HIDDEN_DIM)
    assert y_pred2.shape == (B, NUM_DOMAINS)
    assert mask_perc.shape == (B,)
    np.testing.assert_allclose(np.asarray(input_e), np.asarray(ie_r), rtol=2e-4, atol=2e-4)
    np.testing.assert_allclose(np.asarray(private_rep), np.asarray(pr_r), rtol=2e-4, atol=2e-4)
    np.testing.assert_allclose(np.asarray(y_pred2), np.asarray(y2_r), rtol=2e-4, atol=2e-4)
    np.testing.assert_allclose(np.asarray(mask_perc), np.asarray(mp_r), rtol=2e-4, atol=2e-4)

    print("KERNEL_OK")
</pallas_src>

<mosaic_0001>
module attributes {stable_mosaic.version = 11 : i64} {
  func.func @_shared_part_fused_kernel(%arg0: i32, %arg1: memref<4x16x32xf32, #tpu.memory_space<vmem>>, %arg2: memref<4x16x32xf32, #tpu.memory_space<vmem>>, %arg3: memref<4x16x4xf32, #tpu.memory_space<vmem>>, %arg4: memref<4x1x32xf32, #tpu.memory_space<vmem>>, %arg5: memref<1x32xf32, #tpu.memory_space<vmem>>, %arg6: memref<1x32xf32, #tpu.memory_space<vmem>>, %arg7: memref<32x32xf32, #tpu.memory_space<vmem>>, %arg8: memref<1x32xf32, #tpu.memory_space<vmem>>, %arg9: memref<1x32xf32, #tpu.memory_space<vmem>>, %arg10: memref<1x1xf32, #tpu.memory_space<vmem>>, %arg11: memref<32x32xf32, #tpu.memory_space<vmem>>, %arg12: memref<1x32xf32, #tpu.memory_space<vmem>>, %arg13: memref<32x3xf32, #tpu.memory_space<vmem>>, %arg14: memref<1x3xf32, #tpu.memory_space<vmem>>, %arg15: memref<4x16x32xf32, #tpu.memory_space<vmem>>, %arg16: memref<4x16x32xf32, #tpu.memory_space<vmem>>, %arg17: memref<4x1x32xf32, #tpu.memory_space<vmem>>, %arg18: memref<4x1x3xf32, #tpu.memory_space<vmem>>, %arg19: memref<4x1x1xf32, #tpu.memory_space<vmem>>) attributes {dimension_semantics = [#tpu.dimension_semantics<parallel>], iteration_bounds = array<i64: 2>, scalar_prefetch = 0 : i64, scratch_operands = 0 : i64, tpu.core_type = #tpu.core_type<tc>, window_params = [{transform_indices = @transform_0, window_bounds = array<i64: 4, 16, 32>}, {transform_indices = @transform_1, window_bounds = array<i64: 4, 16, 32>}, {transform_indices = @transform_2, window_bounds = array<i64: 4, 16, 4>}, {transform_indices = @transform_3, window_bounds = array<i64: 4, 1, 32>}, {pipeline_mode = #tpu.pipeline_mode<synchronous>, transform_indices = @transform_4, window_bounds = array<i64: 1, 32>}, {pipeline_mode = #tpu.pipeline_mode<synchronous>, transform_indices = @transform_5, window_bounds = array<i64: 1, 32>}, {pipeline_mode = #tpu.pipeline_mode<synchronous>, transform_indices = @transform_6, window_bounds = array<i64: 32, 32>}, {pipeline_mode = #tpu.pipeline_mode<synchronous>, transform_indices = @transform_7, window_bounds = array<i64: 1, 32>}, {pipeline_mode = #tpu.pipeline_mode<synchronous>, transform_indices = @transform_8, window_bounds = array<i64: 1, 32>}, {pipeline_mode = #tpu.pipeline_mode<synchronous>, transform_indices = @transform_9, window_bounds = array<i64: 1, 1>}, {pipeline_mode = #tpu.pipeline_mode<synchronous>, transform_indices = @transform_10, window_bounds = array<i64: 32, 32>}, {pipeline_mode = #tpu.pipeline_mode<synchronous>, transform_indices = @transform_11, window_bounds = array<i64: 1, 32>}, {pipeline_mode = #tpu.pipeline_mode<synchronous>, transform_indices = @transform_12, window_bounds = array<i64: 32, 3>}, {pipeline_mode = #tpu.pipeline_mode<synchronous>, transform_indices = @transform_13, window_bounds = array<i64: 1, 3>}, {transform_indices = @transform_14, window_bounds = array<i64: 4, 16, 32>}, {transform_indices = @transform_15, window_bounds = array<i64: 4, 16, 32>}, {transform_indices = @transform_16, window_bounds = array<i64: 4, 1, 32>}, {transform_indices = @transform_17, window_bounds = array<i64: 4, 1, 3>}, {transform_indices = @transform_18, window_bounds = array<i64: 4, 1, 1>}]} {
    %c0 = arith.constant 0 : index
    %c0_0 = arith.constant 0 : index
    %c0_1 = arith.constant 0 : index
    %0 = vector.load %arg1[%c0, %c0_0, %c0_1] : memref<4x16x32xf32, #tpu.memory_space<vmem>>, vector<4x16x32xf32>
    %c0_2 = arith.constant 0 : index
    %c0_3 = arith.constant 0 : index
    %c0_4 = arith.constant 0 : index
    %1 = vector.load %arg2[%c0_2, %c0_3, %c0_4] : memref<4x16x32xf32, #tpu.memory_space<vmem>>, vector<4x16x32xf32>
    %c0_5 = arith.constant 0 : index
    %c0_6 = arith.constant 0 : index
    %c0_7 = arith.constant 0 : index
    %2 = vector.load %arg3[%c0_5, %c0_6, %c0_7] : memref<4x16x4xf32, #tpu.memory_space<vmem>>, vector<4x16x4xf32>
    %3 = vector.extract_strided_slice %2 {offsets = [0, 0, 0], sizes = [4, 16, 1], strides = [1, 1, 1]} : vector<4x16x4xf32> to vector<4x16x1xf32>
    %4 = vector.extract_strided_slice %2 {offsets = [0, 0, 1], sizes = [4, 16, 1], strides = [1, 1, 1]} : vector<4x16x4xf32> to vector<4x16x1xf32>
    %5 = vector.extract_strided_slice %2 {offsets = [0, 0, 2], sizes = [4, 16, 1], strides = [1, 1, 1]} : vector<4x16x4xf32> to vector<4x16x1xf32>
    %6 = vector.extract_strided_slice %2 {offsets = [0, 0, 3], sizes = [4, 16, 1], strides = [1, 1, 1]} : vector<4x16x4xf32> to vector<4x16x1xf32>
    %c0_8 = arith.constant 0 : index
    %c0_9 = arith.constant 0 : index
    %7 = vector.load %arg5[%c0_8, %c0_9] : memref<1x32xf32, #tpu.memory_space<vmem>>, vector<1x32xf32>
    %c0_10 = arith.constant 0 : index
    %c0_11 = arith.constant 0 : index
    %8 = vector.load %arg8[%c0_10, %c0_11] : memref<1x32xf32, #tpu.memory_space<vmem>>, vector<1x32xf32>
    %c0_12 = arith.constant 0 : index
    %c0_13 = arith.constant 0 : index
    %9 = vector.load %arg9[%c0_12, %c0_13] : memref<1x32xf32, #tpu.memory_space<vmem>>, vector<1x32xf32>
    %c0_14 = arith.constant 0 : index
    %c0_15 = arith.constant 0 : index
    %10 = vector.load %arg10[%c0_14, %c0_15] : memref<1x1xf32, #tpu.memory_space<vmem>>, vector<1x1xf32>
    %c0_16 = arith.constant 0 : index
    %c0_17 = arith.constant 0 : index
    %c0_18 = arith.constant 0 : index
    %11 = vector.load %arg4[%c0_16, %c0_17, %c0_18] : memref<4x1x32xf32, #tpu.memory_space<vmem>>, vector<4x1x32xf32>
    %c0_19 = arith.constant 0 : index
    %c0_20 = arith.constant 0 : index
    %12 = vector.load %arg6[%c0_19, %c0_20] : memref<1x32xf32, #tpu.memory_space<vmem>>, vector<1x32xf32>
    %13 = vector.broadcast %3 : vector<4x16x1xf32> to vector<4x16x32xf32>
    %14 = arith.mulf %0, %13 : vector<4x16x32xf32>
    %15 = vector.shape_cast %14 : vector<4x16x32xf32> to vector<64x32xf32>
    %c0_21 = arith.constant 0 : index
    %c0_22 = arith.constant 0 : index
    %16 = vector.load %arg7[%c0_21, %c0_22] : memref<32x32xf32, #tpu.memory_space<vmem>>, vector<32x32xf32>
    %cst = arith.constant dense<0.000000e+00> : vector<64x32xf32>
    %17 = tpu.matmul %15, %16, %cst {dimension_numbers = #tpu.dot_dimension_numbers<[1], [0], [0], [1], [0, 0, 1, 1], [], []>, precision = #tpu.contract_precision<fp32>} : vector<64x32xf32>, vector<32x32xf32>, vector<64x32xf32> -> vector<64x32xf32>
    %18 = vector.shape_cast %17 : vector<64x32xf32> to vector<4x16x32xf32>
    %19 = vector.broadcast %3 : vector<4x16x1xf32> to vector<4x16x32xf32>
    %20 = vector.broadcast %11 : vector<4x1x32xf32> to vector<4x16x32xf32>
    %21 = arith.mulf %19, %20 : vector<4x16x32xf32>
    %22 = arith.addf %18, %21 : vector<4x16x32xf32>
    %23 = vector.shape_cast %8 : vector<1x32xf32> to vector<1x1x32xf32>
    %24 = vector.broadcast %23 : vector<1x1x32xf32> to vector<4x16x32xf32>
    %25 = arith.addf %22, %24 : vector<4x16x32xf32>
    %26 = math.tanh %25 : vector<4x16x32xf32>
    %27 = vector.shape_cast %12 : vector<1x32xf32> to vector<1x1x32xf32>
    %28 = vector.broadcast %3 : vector<4x16x1xf32> to vector<4x16x32xf32>
    %29 = vector.broadcast %27 : vector<1x1x32xf32> to vector<4x16x32xf32>
    %30 = arith.mulf %28, %29 : vector<4x16x32xf32>
    %31 = arith.addf %18, %30 : vector<4x16x32xf32>
    %32 = vector.shape_cast %8 : vector<1x32xf32> to vector<1x1x32xf32>
    %33 = vector.broadcast %32 : vector<1x1x32xf32> to vector<4x16x32xf32>
    %34 = arith.addf %31, %33 : vector<4x16x32xf32>
    %35 = math.tanh %34 : vector<4x16x32xf32>
    %36 = vector.shape_cast %9 : vector<1x32xf32> to vector<1x1x32xf32>
    %37 = vector.broadcast %36 : vector<1x1x32xf32> to vector<4x16x32xf32>
    %38 = arith.mulf %26, %37 : vector<4x16x32xf32>
    %cst_23 = arith.constant dense<0.000000e+00> : vector<4x16xf32>
    %39 = vector.multi_reduction <add>, %38, %cst_23 [2] : vector<4x16x32xf32> to vector<4x16xf32>
    %40 = vector.shape_cast %39 : vector<4x16xf32> to vector<4x16x1xf32>
    %41 = vector.shape_cast %10 : vector<1x1xf32> to vector<1x1x1xf32>
    %42 = vector.broadcast %41 : vector<1x1x1xf32> to vector<4x16x1xf32>
    %43 = arith.addf %40, %42 : vector<4x16x1xf32>
    %44 = vector.shape_cast %9 : vector<1x32xf32> to vector<1x1x32xf32>
    %45 = vector.broadcast %44 : vector<1x1x32xf32> to vector<4x16x32xf32>
    %46 = arith.mulf %35, %45 : vector<4x16x32xf32>
    %cst_24 = arith.constant dense<0.000000e+00> : vector<4x16xf32>
    %47 = vector.multi_reduction <add>, %46, %cst_24 [2] : vector<4x16x32xf32> to vector<4x16xf32>
    %48 = vector.shape_cast %47 : vector<4x16xf32> to vector<4x16x1xf32>
    %49 = vector.shape_cast %10 : vector<1x1xf32> to vector<1x1x1xf32>
    %50 = vector.broadcast %49 : vector<1x1x1xf32> to vector<4x16x1xf32>
    %51 = arith.addf %48, %50 : vector<4x16x1xf32>
    %cst_25 = arith.constant 0.000000e+00 : f32
    %52 = vector.broadcast %cst_25 : f32 to vector<4x16x1xf32>
    %53 = arith.minimumf %43, %52 : vector<4x16x1xf32>
    %54 = math.absf %43 : vector<4x16x1xf32>
    %cst_26 = arith.constant 0.000000e+00 : f32
    %55 = vector.broadcast %cst_26 : f32 to vector<4x16x1xf32>
    %56 = arith.subf %55, %54 : vector<4x16x1xf32>
    %57 = math.exp %56 : vector<4x16x1xf32>
    %cst_27 = arith.constant 1.000000e+00 : f32
    %58 = vector.broadcast %cst_27 : f32 to vector<4x16x1xf32>
    %59 = arith.addf %58, %57 : vector<4x16x1xf32>
    %60 = math.log %59 : vector<4x16x1xf32>
    %61 = arith.subf %53, %60 : vector<4x16x1xf32>
    %62 = arith.addf %61, %5 : vector<4x16x1xf32>
    %cst_28 = arith.constant 2.000000e+00 : f32
    %63 = vector.broadcast %cst_28 : f32 to vector<4x16x1xf32>
    %64 = arith.mulf %62, %63 : vector<4x16x1xf32>
    %cst_29 = arith.constant 0.000000e+00 : f32
    %65 = vector.broadcast %cst_29 : f32 to vector<4x16x1xf32>
    %66 = arith.minimumf %51, %65 : vector<4x16x1xf32>
    %67 = math.absf %51 : vector<4x16x1xf32>
    %cst_30 = arith.constant 0.000000e+00 : f32
    %68 = vector.broadcast %cst_30 : f32 to vector<4x16x1xf32>
    %69 = arith.subf %68, %67 : vector<4x16x1xf32>
    %70 = math.exp %69 : vector<4x16x1xf32>
    %cst_31 = arith.constant 1.000000e+00 : f32
    %71 = vector.broadcast %cst_31 : f32 to vector<4x16x1xf32>
    %72 = arith.addf %71, %70 : vector<4x16x1xf32>
    %73 = math.log %72 : vector<4x16x1xf32>
    %74 = arith.subf %66, %73 : vector<4x16x1xf32>
    %75 = arith.addf %74, %6 : vector<4x16x1xf32>
    %cst_32 = arith.constant 2.000000e+00 : f32
    %76 = vector.broadcast %cst_32 : f32 to vector<4x16x1xf32>
    %77 = arith.mulf %75, %76 : vector<4x16x1xf32>
    %78 = arith.maximumf %64, %77 : vector<4x16x1xf32>
    %79 = arith.subf %64, %78 : vector<4x16x1xf32>
    %80 = math.exp %79 : vector<4x16x1xf32>
    %81 = arith.subf %77, %78 : vector<4x16x1xf32>
    %82 = math.exp %81 : vector<4x16x1xf32>
    %83 = arith.addf %80, %82 : vector<4x16x1xf32>
    %84 = arith.divf %80, %83 : vector<4x16x1xf32>
    %cst_33 = arith.constant 1.000000e-01 : f32
    %85 = vector.broadcast %cst_33 : f32 to vector<4x16x1xf32>
    %86 = arith.subf %84, %85 : vector<4x16x1xf32>
    %cst_34 = arith.constant 5.000000e-01 : f32
    %87 = vector.broadcast %cst_34 : f32 to vector<4x16x1xf32>
    %88 = arith.cmpf oge, %86, %87 : vector<4x16x1xf32>
    %cst_35 = arith.constant 1.000000e+00 : f32
    %cst_36 = arith.constant 0.000000e+00 : f32
    %89 = vector.broadcast %cst_35 : f32 to vector<4x16x1xf32>
    %90 = vector.broadcast %cst_36 : f32 to vector<4x16x1xf32>
    %91 = arith.select %88, %89, %90 : vector<4x16x1xi1>, vector<4x16x1xf32>
    %cst_37 = arith.constant 1.000000e+00 : f32
    %92 = vector.broadcast %cst_37 : f32 to vector<4x16x1xf32>
    %93 = arith.subf %92, %4 : vector<4x16x1xf32>
    %94 = arith.mulf %3, %93 : vector<4x16x1xf32>
    %cst_38 = arith.constant 1.000000e+00 : f32
    %95 = vector.broadcast %cst_38 : f32 to vector<4x16x1xf32>
    %96 = arith.subf %95, %91 : vector<4x16x1xf32>
    %97 = vector.broadcast %96 : vector<4x16x1xf32> to vector<4x16x32xf32>
    %98 = arith.mulf %97, %1 : vector<4x16x32xf32>
    %99 = vector.shape_cast %7 : vector<1x32xf32> to vector<1x1x32xf32>
    %100 = vector.broadcast %91 : vector<4x16x1xf32> to vector<4x16x32xf32>
    %101 = vector.broadcast %99 : vector<1x1x32xf32> to vector<4x16x32xf32>
    %102 = arith.mulf %100, %101 : vector<4x16x32xf32>
    %103 = arith.addf %98, %102 : vector<4x16x32xf32>
    %cst_39 = arith.constant 1.000000e+00 : f32
    %104 = vector.broadcast %cst_39 : f32 to vector<4x16x1xf32>
    %105 = arith.subf %104, %4 : vector<4x16x1xf32>
    %106 = vector.broadcast %105 : vector<4x16x1xf32> to vector<4x16x32xf32>
    %107 = arith.mulf %103, %106 : vector<4x16x32xf32>
    %108 = vector.broadcast %4 : vector<4x16x1xf32> to vector<4x16x32xf32>
    %109 = arith.mulf %1, %108 : vector<4x16x32xf32>
    %110 = arith.addf %107, %109 : vector<4x16x32xf32>
    %c0_40 = arith.constant 0 : index
    %c0_41 = arith.constant 0 : index
    %c0_42 = arith.constant 0 : index
    %111 = vector.load %arg15[%c0_40, %c0_41, %c0_42] : memref<4x16x32xf32, #tpu.memory_space<vmem>>, vector<4x16x32xf32>
    tpu.vector_store %arg15[%c0_40, %c0_41, %c0_42], %110 {strides = array<i32>} : memref<4x16x32xf32, #tpu.memory_space<vmem>>, vector<4x16x32xf32>,
    %112 = arith.mulf %91, %94 : vector<4x16x1xf32>
    %cst_43 = arith.constant dense<0.000000e+00> : vector<4x1xf32>
    %113 = vector.multi_reduction <add>, %112, %cst_43 [1] : vector<4x16x1xf32> to vector<4x1xf32>
    %114 = vector.shape_cast %113 : vector<4x1xf32> to vector<4x1x1xf32>
    %cst_44 = arith.constant 0.000000e+00 : f32
    %115 = vector.broadcast %cst_44 : f32 to vector<4x1x1xf32>
    %116 = arith.cmpf oeq, %114, %115 : vector<4x1x1xf32>
    %117 = arith.extui %116 : vector<4x1x1xi1> to vector<4x1x1xi32>
    %118 = arith.sitofp %117 : vector<4x1x1xi32> to vector<4x1x1xf32>
    %119 = arith.addf %114, %118 : vector<4x1x1xf32>
    %120 = vector.broadcast %112 : vector<4x16x1xf32> to vector<4x16x32xf32>
    %121 = arith.mulf %0, %120 : vector<4x16x32xf32>
    %cst_45 = arith.constant dense<0.000000e+00> : vector<4x32xf32>
    %122 = vector.multi_reduction <add>, %121, %cst_45 [1] : vector<4x16x32xf32> to vector<4x32xf32>
    %123 = vector.shape_cast %122 : vector<4x32xf32> to vector<4x1x32xf32>
    %124 = vector.broadcast %119 : vector<4x1x1xf32> to vector<4x1x32xf32>
    %125 = arith.divf %123, %124 : vector<4x1x32xf32>
    %c0_46 = arith.constant 0 : index
    %c0_47 = arith.constant 0 : index
    %c0_48 = arith.constant 0 : index
    %126 = vector.load %arg17[%c0_46, %c0_47, %c0_48] : memref<4x1x32xf32, #tpu.memory_space<vmem>>, vector<4x1x32xf32>
    tpu.vector_store %arg17[%c0_46, %c0_47, %c0_48], %125 {strides = array<i32>} : memref<4x1x32xf32, #tpu.memory_space<vmem>>, vector<4x1x32xf32>,
    %127 = vector.broadcast %94 : vector<4x16x1xf32> to vector<4x16x32xf32>
    %128 = arith.mulf %0, %127 : vector<4x16x32xf32>
    %129 = vector.broadcast %125 : vector<4x1x32xf32> to vector<4x16x32xf32>
    %130 = arith.mulf %128, %129 : vector<4x16x32xf32>
    %cst_49 = arith.constant 0.000000e+00 : f32
    %131 = vector.broadcast %cst_49 : f32 to vector<4x16x32xf32>
    %132 = arith.subf %131, %130 : vector<4x16x32xf32>
    %133 = math.exp %132 : vector<4x16x32xf32>
    %cst_50 = arith.constant 1.000000e+00 : f32
    %134 = vector.broadcast %cst_50 : f32 to vector<4x16x32xf32>
    %135 = arith.addf %134, %133 : vector<4x16x32xf32>
    %cst_51 = arith.constant 1.000000e+00 : f32
    %136 = vector.broadcast %cst_51 : f32 to vector<4x16x32xf32>
    %137 = arith.divf %136, %135 : vector<4x16x32xf32>
    %138 = math.exp %137 : vector<4x16x32xf32>
    %139 = vector.broadcast %94 : vector<4x16x1xf32> to vector<4x16x32xf32>
    %140 = arith.mulf %138, %139 : vector<4x16x32xf32>
    %cst_52 = arith.constant dense<0.000000e+00> : vector<4x32xf32>
    %141 = vector.multi_reduction <add>, %140, %cst_52 [1] : vector<4x16x32xf32> to vector<4x32xf32>
    %142 = vector.shape_cast %141 : vector<4x32xf32> to vector<4x1x32xf32>
    %cst_53 = arith.constant 9.99999971E-10 : f32
    %143 = vector.broadcast %cst_53 : f32 to vector<4x1x32xf32>
    %144 = arith.addf %142, %143 : vector<4x1x32xf32>
    %cst_54 = arith.constant 1.000000e+00 : f32
    %145 = vector.broadcast %cst_54 : f32 to vector<4x1x32xf32>
    %146 = arith.divf %145, %144 : vector<4x1x32xf32>
    %147 = vector.broadcast %146 : vector<4x1x32xf32> to vector<4x16x32xf32>
    %148 = arith.mulf %140, %147 : vector<4x16x32xf32>
    %149 = arith.mulf %0, %148 : vector<4x16x32xf32>
    %150 = vector.broadcast %94 : vector<4x16x1xf32> to vector<4x16x32xf32>
    %151 = arith.mulf %149, %150 : vector<4x16x32xf32>
    %c0_55 = arith.constant 0 : index
    %c0_56 = arith.constant 0 : index
    %c0_57 = arith.constant 0 : index
    %152 = vector.load %arg16[%c0_55, %c0_56, %c0_57] : memref<4x16x32xf32, #tpu.memory_space<vmem>>, vector<4x16x32xf32>
    tpu.vector_store %arg16[%c0_55, %c0_56, %c0_57], %151 {strides = array<i32>} : memref<4x16x32xf32, #tpu.memory_space<vmem>>, vector<4x16x32xf32>,
    %153 = vector.shape_cast %125 : vector<4x1x32xf32> to vector<4x32xf32>
    %c0_58 = arith.constant 0 : index
    %c0_59 = arith.constant 0 : index
    %154 = vector.load %arg11[%c0_58, %c0_59] : memref<32x32xf32, #tpu.memory_space<vmem>>, vector<32x32xf32>
    %cst_60 = arith.constant dense<0.000000e+00> : vector<4x32xf32>
    %155 = tpu.matmul %153, %154, %cst_60 {dimension_numbers = #tpu.dot_dimension_numbers<[1], [0], [0], [1], [0, 0, 1, 1], [], []>, precision = #tpu.contract_precision<fp32>} : vector<4x32xf32>, vector<32x32xf32>, vector<4x32xf32> -> vector<4x32xf32>
    %c0_61 = arith.constant 0 : index
    %c0_62 = arith.constant 0 : index
    %156 = vector.load %arg12[%c0_61, %c0_62] : memref<1x32xf32, #tpu.memory_space<vmem>>, vector<1x32xf32>
    %157 = vector.broadcast %156 : vector<1x32xf32> to vector<4x32xf32>
    %158 = arith.addf %155, %157 : vector<4x32xf32>
    %159 = math.tanh %158 : vector<4x32xf32>
    %c0_63 = arith.constant 0 : index
    %c0_64 = arith.constant 0 : index
    %160 = vector.load %arg13[%c0_63, %c0_64] : memref<32x3xf32, #tpu.memory_space<vmem>>, vector<32x3xf32>
    %cst_65 = arith.constant dense<0.000000e+00> : vector<4x3xf32>
    %161 = tpu.matmul %159, %160, %cst_65 {dimension_numbers = #tpu.dot_dimension_numbers<[1], [0], [0], [1], [0, 0, 1, 1], [], []>, precision = #tpu.contract_precision<fp32>} : vector<4x32xf32>, vector<32x3xf32>, vector<4x3xf32> -> vector<4x3xf32>
    %c0_66 = arith.constant 0 : index
    %c0_67 = arith.constant 0 : index
    %162 = vector.load %arg14[%c0_66, %c0_67] : memref<1x3xf32, #tpu.memory_space<vmem>>, vector<1x3xf32>
    %163 = vector.broadcast %162 : vector<1x3xf32> to vector<4x3xf32>
    %164 = arith.addf %161, %163 : vector<4x3xf32>
    %165 = vector.shape_cast %164 : vector<4x3xf32> to vector<4x1x3xf32>
    %c0_68 = arith.constant 0 : index
    %c0_69 = arith.constant 0 : index
    %c0_70 = arith.constant 0 : index
    %166 = vector.load %arg18[%c0_68, %c0_69, %c0_70] : memref<4x1x3xf32, #tpu.memory_space<vmem>>, vector<4x1x3xf32>
    tpu.vector_store %arg18[%c0_68, %c0_69, %c0_70], %165 {strides = array<i32>} : memref<4x1x3xf32, #tpu.memory_space<vmem>>, vector<4x1x3xf32>,
    %cst_71 = arith.constant dense<0.000000e+00> : vector<4x1xf32>
    %167 = vector.multi_reduction <add>, %94, %cst_71 [1] : vector<4x16x1xf32> to vector<4x1xf32>
    %168 = vector.shape_cast %167 : vector<4x1xf32> to vector<4x1x1xf32>
    %169 = arith.divf %114, %168 : vector<4x1x1xf32>
    %c0_72 = arith.constant 0 : index
    %c0_73 = arith.constant 0 : index
    %c0_74 = arith.constant 0 : index
    %170 = vector.load %arg19[%c0_72, %c0_73, %c0_74] : memref<4x1x1xf32, #tpu.memory_space<vmem>>, vector<4x1x1xf32>
    tpu.vector_store %arg19[%c0_72, %c0_73, %c0_74], %169 {strides = array<i32>} : memref<4x1x1xf32, #tpu.memory_space<vmem>>, vector<4x1x1xf32>,
    return
  }
  func.func @transform_0(%arg0: i32) -> (i32, i32, i32) {
    %c0_i32 = arith.constant 0 : i32
    %c0_i32_0 = arith.constant 0 : i32
    %c0_i32_1 = arith.constant 0 : i32
    return %arg0, %c0_i32, %c0_i32_0 : i32, i32, i32
  }
  func.func @transform_1(%arg0: i32) -> (i32, i32, i32) {
    %c0_i32 = arith.constant 0 : i32
    %c0_i32_0 = arith.constant 0 : i32
    %c0_i32_1 = arith.constant 0 : i32
    return %arg0, %c0_i32, %c0_i32_0 : i32, i32, i32
  }
  func.func @transform_2(%arg0: i32) -> (i32, i32, i32) {
    %c0_i32 = arith.constant 0 : i32
    %c0_i32_0 = arith.constant 0 : i32
    %c0_i32_1 = arith.constant 0 : i32
    return %arg0, %c0_i32, %c0_i32_0 : i32, i32, i32
  }
  func.func @transform_3(%arg0: i32) -> (i32, i32, i32) {
    %c0_i32 = arith.constant 0 : i32
    %c0_i32_0 = arith.constant 0 : i32
    %c0_i32_1 = arith.constant 0 : i32
    return %arg0, %c0_i32, %c0_i32_0 : i32, i32, i32
  }
  func.func @transform_4(%arg0: i32) -> (i32, i32) {
    %c0_i32 = arith.constant 0 : i32
    %c0_i32_0 = arith.constant 0 : i32
    %c0_i32_1 = arith.constant 0 : i32
    return %c0_i32, %c0_i32_0 : i32, i32
  }
  func.func @transform_5(%arg0: i32) -> (i32, i32) {
    %c0_i32 = arith.constant 0 : i32
    %c0_i32_0 = arith.constant 0 : i32
    %c0_i32_1 = arith.constant 0 : i32
    return %c0_i32, %c0_i32_0 : i32, i32
  }
  func.func @transform_6(%arg0: i32) -> (i32, i32) {
    %c0_i32 = arith.constant 0 : i32
    %c0_i32_0 = arith.constant 0 : i32
    %c0_i32_1 = arith.constant 0 : i32
    return %c0_i32, %c0_i32_0 : i32, i32
  }
  func.func @transform_7(%arg0: i32) -> (i32, i32) {
    %c0_i32 = arith.constant 0 : i32
    %c0_i32_0 = arith.constant 0 : i32
    %c0_i32_1 = arith.constant 0 : i32
    return %c0_i32, %c0_i32_0 : i32, i32
  }
  func.func @transform_8(%arg0: i32) -> (i32, i32) {
    %c0_i32 = arith.constant 0 : i32
    %c0_i32_0 = arith.constant 0 : i32
    %c0_i32_1 = arith.constant 0 : i32
    return %c0_i32, %c0_i32_0 : i32, i32
  }
  func.func @transform_9(%arg0: i32) -> (i32, i32) {
    %c0_i32 = arith.constant 0 : i32
    %c0_i32_0 = arith.constant 0 : i32
    %c0_i32_1 = arith.constant 0 : i32
    return %c0_i32, %c0_i32_0 : i32, i32
  }
  func.func @transform_10(%arg0: i32) -> (i32, i32) {
    %c0_i32 = arith.constant 0 : i32
    %c0_i32_0 = arith.constant 0 : i32
    %c0_i32_1 = arith.constant 0 : i32
    return %c0_i32, %c0_i32_0 : i32, i32
  }
  func.func @transform_11(%arg0: i32) -> (i32, i32) {
    %c0_i32 = arith.constant 0 : i32
    %c0_i32_0 = arith.constant 0 : i32
    %c0_i32_1 = arith.constant 0 : i32
    return %c0_i32, %c0_i32_0 : i32, i32
  }
  func.func @transform_12(%arg0: i32) -> (i32, i32) {
    %c0_i32 = arith.constant 0 : i32
    %c0_i32_0 = arith.constant 0 : i32
    %c0_i32_1 = arith.constant 0 : i32
    return %c0_i32, %c0_i32_0 : i32, i32
  }
  func.func @transform_13(%arg0: i32) -> (i32, i32) {
    %c0_i32 = arith.constant 0 : i32
    %c0_i32_0 = arith.constant 0 : i32
    %c0_i32_1 = arith.constant 0 : i32
    return %c0_i32, %c0_i32_0 : i32, i32
  }
  func.func @transform_14(%arg0: i32) -> (i32, i32, i32) {
    %c0_i32 = arith.constant 0 : i32
    %c0_i32_0 = arith.constant 0 : i32
    %c0_i32_1 = arith.constant 0 : i32
    return %arg0, %c0_i32, %c0_i32_0 : i32, i32, i32
  }
  func.func @transform_15(%arg0: i32) -> (i32, i32, i32) {
    %c0_i32 = arith.constant 0 : i32
    %c0_i32_0 = arith.constant 0 : i32
    %c0_i32_1 = arith.constant 0 : i32
    return %arg0, %c0_i32, %c0_i32_0 : i32, i32, i32
  }
  func.func @transform_16(%arg0: i32) -> (i32, i32, i32) {
    %c0_i32 = arith.constant 0 : i32
    %c0_i32_0 = arith.constant 0 : i32
    %c0_i32_1 = arith.constant 0 : i32
    return %arg0, %c0_i32, %c0_i32_0 : i32, i32, i32
  }
  func.func @transform_17(%arg0: i32) -> (i32, i32, i32) {
    %c0_i32 = arith.constant 0 : i32
    %c0_i32_0 = arith.constant 0 : i32
    %c0_i32_1 = arith.constant 0 : i32
    return %arg0, %c0_i32, %c0_i32_0 : i32, i32, i32
  }
  func.func @transform_18(%arg0: i32) -> (i32, i32, i32) {
    %c0_i32 = arith.constant 0 : i32
    %c0_i32_0 = arith.constant 0 : i32
    %c0_i32_1 = arith.constant 0 : i32
    return %arg0, %c0_i32, %c0_i32_0 : i32, i32, i32
  }
}

</mosaic_0001>

<bundles_post_ra>
// kernel: tpu_custom_call.1
= control target key start
LH: loop header
LB: loop body
LE: loop exit
PB: predicated region body
PF: predicated region fallthrough
CT: control target
= control target key end

     0   :  { %s6775_s0 = inlined_call_operand.vmem [shape: f32[8,16,32], index: 0, kind: input, shape index: {}]   ;;  %s6776_s1 = inlined_call_operand.hbm [shape: f32[8,16,32], index: 1, kind: input, shape index: {}]   ;;  %s6777_s2 = inlined_call_operand.vmem [shape: f32[8,16,4], index: 2, kind: input, shape index: {}]   ;;  %s6778_s3 = inlined_call_operand.vmem [shape: f32[8,1,32], index: 3, kind: input, shape index: {}]   ;;  %s6779_s4 = inlined_call_operand.vmem [shape: f32[1,32], index: 4, kind: input, shape index: {}]   ;;  %s6780_s5 = inlined_call_operand.vmem [shape: f32[1,32], index: 5, kind: input, shape index: {}]   ;;  %s6781_s6 = inlined_call_operand.vmem [shape: f32[32,32], index: 6, kind: input, shape index: {}]   ;;  %s6782_s7 = inlined_call_operand.vmem [shape: f32[1,32], index: 7, kind: input, shape index: {}]   ;;  %s6783_s8 = inlined_call_operand.vmem [shape: f32[1,32], index: 8, kind: input, shape index: {}]   ;;  %s6784_s9 = inlined_call_operand.<no memory space> [shape: f32[1,1], index: 9, kind: input, shape index: {}]   ;;  %s6785_s10 = inlined_call_operand.hbm [shape: f32[32,32], index: 10, kind: input, shape index: {}]   ;;  %s6786_s11 = inlined_call_operand.vmem [shape: f32[1,32], index: 11, kind: input, shape index: {}]   ;;  %s6787_s12 = inlined_call_operand.vmem [shape: f32[32,3], index: 12, kind: input, shape index: {}]   ;;  %s6788_s13 = inlined_call_operand.vmem [shape: f32[1,3], index: 13, kind: input, shape index: {}]   ;;  %s6789_s14 = inlined_call_operand.hbm [shape: f32[8,16,32], index: 14, kind: output, shape index: {0}]   ;;  %s6790_s15 = inlined_call_operand.hbm [shape: f32[8,16,32], index: 15, kind: output, shape index: {1}]   ;;  %s6791_s16 = inlined_call_operand.hbm [shape: f32[8,1,32], index: 16, kind: output, shape index: {2}]   ;;  %s6792_s17 = inlined_call_operand.vmem [shape: f32[8,1,3], index: 17, kind: output, shape index: {3}]   ;;  %s6793_s18 = inlined_call_operand.vmem [shape: f32[8,1,1], index: 18, kind: output, shape index: {4}]  }
   0x1   :  { %6811 = sst [smem:[#allocation19_spill]] %s6775_s0  ;;  %v24_v0 = vstv %s6784_s9 }
   0x2   :  { %6812 = sst [smem:[#allocation20_spill]] %s6776_s1  ;;  %25 = vst [vmem:[#allocation2] sm:$0x1] %v24_v0 }
   0x3   :  { %6813 = sst [smem:[#allocation21_spill]] %s6777_s2 }
   0x4   :  { %6814 = sst [smem:[#allocation22_spill]] %s6778_s3 }
   0x5   :  { %6815 = sst [smem:[#allocation23_spill]] %s6779_s4 }
   0x6   :  { %6816 = sst [smem:[#allocation24_spill]] %s6780_s5 }
   0x7   :  { %6817 = sst [smem:[#allocation25_spill]] %s6781_s6 }
   0x8   :  { %6818 = sst [smem:[#allocation26_spill]] %s6782_s7 }
   0x9   :  { %6819 = sst [smem:[#allocation27_spill]] %s6783_s8 }
   0xa   :  { %6820 = sst [smem:[#allocation28_spill]] %s6785_s10 }
   0xb   :  { %6821 = sst [smem:[#allocation29_spill]] %s6788_s13 }
   0xc   :  { %6822 = sst [smem:[#allocation30_spill]] %s6789_s14 }
   0xd   :  { %6823 = sst [smem:[#allocation31_spill]] %s6790_s15 }
   0xe   :  { %6824 = sst [smem:[#allocation32_spill]] %s6791_s16 }
   0xf   :  { %6825 = sst [smem:[#allocation33_spill]] %s6792_s17 }
  0x10   :  { %26 = vsyncpa [#allocation4], 0 }
  0x11   :  { %28 = vsyncpa [#allocation4 + $0x1], 0 }
  0x12   :  { %29 = vsyncpa [#allocation7], 0 }
  0x13   :  { %30 = vsyncpa [#allocation5], 0 }
  0x14   :  { %32 = vsyncpa [#allocation5 + $0x1], 0 }
  0x15   :  { %33 = vsyncpa [#allocation10], 0 }
  0x16   :  { %35 = vsyncpa [#allocation10 + $0x1], 0  ;;  %s5260_s29 = smov 0   ;;  %s5262_s30 = smov 0  }
  0x17   :  { %s5264_s0 = smov 0   ;;  %s5266_s19 = smov 0  }
  0x18 LB: > { %6826 = sst [smem:[#allocation16_spill]] %s5129_s29  ;;  %s5281_s9 = sadd.s32 4294967295, %s5141_s19   ;;  %s5141_s19 = sphi %s5266_s19, %s6865_s19   ;;  %s5137_s0 = sphi %s5264_s0, %s6868_s0   ;;  %s5133_s30 = sphi %s5262_s30, %s6867_s30   ;;  %s5129_s29 = sphi %s5260_s29, %s6866_s29  }
  0x19   : > { %s6795_s1 = sadd.s32 4294967294, %s5141_s19   ;;  %p87_p0 = scmp.ne.s32.totalorder %s5133_s30, %s5129_s29 }
  0x1a   : > { %p6804_p1 = scmp.eq.s32.totalorder %s5281_s9, 0  ;;  %p379_p3 = scmp.eq.s32.totalorder %s6795_s1, 1 }
  0x1b   : > { %p4172_p5 = scmp.ge.s32.totalorder %s5141_s19, 1  ;;  %p490_p7 = scmp.lt.s32.totalorder %s5141_s19, 3 }
  0x1c   : > { %p5292_p4 = por %p6804_p1, %p87_p0  ;;  %p5297_p6 = por %p379_p3, %p87_p0 }
  0x1d   : > { %p5302_p8 = pnand %p4172_p5, %p490_p7  ;;  %s5143_s2 = smov [#allocation6]  }
  0x1e   : > { %s6827_s20 = scalar_select %p5292_p4, 1, 0 }
  0x1f   : > { %s6828_s21 = scalar_select %p5297_p6, 1, 0 }
  0x20   : > { %s6830_s22 = scalar_select %p5302_p8, 1, 0 }
  0x21   : > { %6829 = sst [smem:[#allocation17_spill]] %s6828_s21  ;;  %s520_s23 = sshll.u32 %s5143_s2, 4  ;;  %s521_s23 = int_to_ptr.vmem [resolvable:$true] %s520_s23 }
  0x22   : > { %p4635_p9 = pneg %p5302_p8  ;;  %s5316_s25 = sadd.s32 1, %s5141_s19  }
  0x23   : > { %6832 = sst [smem:[#allocation18_spill]] %s5316_s25  ;;  %s74_s26 = sadd.s32 1, %s5137_s0 }
  0x24   : > { %p5311_p11 = pnand %p4635_p9, %p6804_p1  ;;  %s71_s27 = ssub.s32 %s5141_s19, %s5316_s25 }
  0x25   : > { %s4974_s28 = scalar_lea.vmem %s521_s23, 512  ;;  %p4982_p5 = scmp.lt.s32.totalorder %s521_s23, %s521_s23 }
  0x26   : > { %p4965_p12 = pneg %p5311_p11  ;;  %p4975_p13 = scmp.ne.s32.totalorder %s521_s23, %s4974_s28 }
  0x27   : > { %p4983_p7 = scmp.lt.s32.totalorder %s4974_s28, %s4974_s28 }
  0x28   : > { %p4977_p0 = pnand %p4975_p13, %p4965_p12 }
  0x29   : > { %p4984_p10 = por %p4983_p7, %p4982_p5 }
  0x2a   : > { %p4978_p3 = pneg %p4977_p0 }
  0x2c   : > { %p4985_p2 = pnand %p4984_p10, %p4978_p3 }
  0x2e   : > { %4988 = shalt.err (!%p4985_p2)
}
  0x2f   : > { %s6803_s2 = smov 128   ;;  %s6805_s1 = smov 8  }
  0x30   : > { %s6833_s10 = sld [smem:[#allocation28_spill]]  ;;  %p72_p2 = scmp.eq.s32.totalorder %s71_s27, 0 }
  0x31   : > { %p81_p9 = scmp.ne.s32.totalorder %s5137_s0, %s5133_s30  ;;  %p82_p10 = scmp.eq.s32.totalorder %s5141_s19, 0 }
  0x32   : > { %p4654_p12 = scmp.lt.s32.totalorder %s5141_s19, 2  ;;  %p6834_p0 = scmp.eq.s32.totalorder %s5281_s9, 1 }
  0x33   : > { %s5336_s21 = scalar_select %p72_p2, %s5137_s0, %s74_s26  }
  0x34   : > { %p83_p13 = por %p82_p10, %p81_p9  ;;  %p5340_p3 = por %p6834_p0, %p81_p9 }
  0x35   : > { %s553_s24 = sand.u32 1, %s5137_s0   ;;  %s4231_s17 = sshll.u32 %s5141_s19, 10 }
  0x36   : > { %4638 = dma.hbm_to_vmem [thread:$0]  (!%p5311_p11), %s6833_s10, 512, %s521_s23, [#allocation7], %s6803_s2, %s6803_s2, %s6805_s1  }
  0x37   : > { %s6835_s29 = scalar_select %p5340_p3, 1, 0 }
  0x38   : > { %s4175_s13 = sshll.u32 %s553_s24, 6  ;;  %s6836_s15 = sld [smem:[#allocation20_spill]] }
  0x39   : > { %s557_s23 = scalar_lea.vmem [#allocation3], %s4175_s13  ;;  %p5351_p11 = pnand %p4654_p12, %p83_p13 }
  0x3a   : > { %s565_s26 = sshll.u32 %s557_s23, 4  ;;  %s5357_s28 = scalar_lea.sflag [#allocation4], %s553_s24  ;;  %s5355_s26 = int_to_ptr.vmem [resolvable:$true] %s565_s26 }
  0x3b   : > { %p4991_p7 = pneg %p5351_p11 }
  0x3e   : > { %s5349_s25 = scalar_lea.hbm %s6836_s15, %s4231_s17  ;;  %s4994_s13 = scalar_lea.hbm %s6836_s15, 2048 }
  0x3f   : > { %s4989_s2 = scalar_lea.hbm %s5349_s25, 1024  ;;  %p4995_p10 = scmp.lt.s32.totalorder %s5349_s25, %s6836_s15 }
  0x40   : > { %p4990_p5 = scmp.ne.s32.totalorder %s5349_s25, %s4989_s2  ;;  %p4996_p12 = scmp.lt.s32.totalorder %s4994_s13, %s4989_s2 }
  0x42   : > { %p4992_p2 = pnand %p4991_p7, %p4990_p5  ;;  %p4997_p13 = por %p4996_p12, %p4995_p10 }
  0x44   : > { %p4993_p9 = pneg %p4992_p2 }
  0x46   : > { %p4998_p0 = pnand %p4997_p13, %p4993_p9 }
  0x48   : > { %5001 = shalt.err (!%p4998_p0)
}
  0x49   : > { %s5002_s24 = scalar_lea.vmem %s5355_s26, 1024  ;;  %s5146_s1 = smov [#allocation3]  }
  0x4a   : > { %p5003_p1 = scmp.ne.s32.totalorder %s5355_s26, %s5002_s24  ;;  %s5007_s10 = sshll.u32 %s5146_s1, 4  ;;  %s5008_s10 = int_to_ptr.vmem [resolvable:$false] %s5007_s10 }
  0x4b   : > { %s5009_s14 = scalar_lea.vmem %s5008_s10, 2048  ;;  %p5010_p2 = scmp.lt.s32.totalorder %s5355_s26, %s5008_s10 }
  0x4c   : > { %p5005_p6 = pnand %p5003_p1, %p4991_p7  ;;  %p5011_p3 = scmp.lt.s32.totalorder %s5009_s14, %s5002_s24 }
  0x4e   : > { %p5006_p5 = pneg %p5005_p6  ;;  %p5012_p4 = por %p5011_p3, %p5010_p2 }
  0x50   : > { %p5013_p8 = pnand %p5012_p4, %p5006_p5 }
  0x52   : > { %5016 = shalt.err (!%p5013_p8)
}
  0x53   : > { %s6838_s2 = smov 8   ;;  %s6839_s16 = smov 128  }
  0x54   : > { %4642 = dma.hbm_to_vmem [thread:$0]  (!%p5351_p11), %s5349_s25, 1024, %s5355_s26, %s5357_s28, %s6839_s16, %s6839_s16, %s6838_s2  }
  0x55   : > { %p6840_p1 = scmp.ne.s32.totalorder %s6830_s22, 0 }
  0x56   : > { %s5384_s1 = sand.u32 (!%p6840_p1), 1, %s5133_s30   ;;  %p6841_p4 = scmp.ne.s32.totalorder (!%p6840_p1), %s6827_s20, 0 }
  0x57   : > { %595 = sbr.rel (%p6840_p1) target bundleno = 1438 (0x59e), region = 76  ;;  %s5387_s10 = sshll.u32 (!%p6840_p1), %s5384_s1, 6 }
  0x58   : > { %s598_s27 = scalar_lea.sflag (!%p6840_p1), [#allocation4], %s5384_s1  ;;  %s5391_s13 = scalar_lea.vmem (!%p6840_p1), [#allocation3], %s5387_s10 }
  0x5c   : > { %5112 = dma.done.wait (%p6841_p4), %s598_s27, 1024  }
  0x5d   : > { %5114 = vsyncadd (%p6841_p4), %s598_s27, 4294966272  ;;  %p6842_p6 = scmp.eq.s32.totalorder %s5281_s9, 0 }
  0x5f   : > { %5116 = dma.done.wait (%p6842_p6), [#allocation7], 512   ;;  %p6843_p8 = pmov %p6842_p6 }
  0x60   : > { %s4185_s22 = sshll.u32 %s5281_s9, 2  ;;  %v6809_v1 = vmov 0   ;;  %s6844_s28 = sld [smem:[#allocation21_spill]]  ;;  %vm810_vm0 = vcmask 261120   ;;  %vm2411_vm2 = vcmask 7168   ;;  %vm3875_vm8 = vcmask 0  }
  0x61   : > { %5118 = vsyncadd (%p6843_p8), [#allocation7], 4294966784  ;;  %4705 = vset.pattern.permute.xlu1 %v6809_v1  ;;  %4704 = vset.pattern.permute.xlu0 %v6809_v1  ;;  %p693_p3 = scmp.lt.s32.totalorder %s4185_s22, 7  ;;  %s6845_s6 = sld [smem:[#allocation25_spill]]  ;;  %vm5152_vm15 = vmmov 0  }
  0x62   : > { %s6846_s24 = sld [smem:[#allocation19_spill]]  ;;  %s5149_s16 = smov 125  }
  0x63   : > { %s6870_s22 = smov (!%p693_p3, %s4185_s22), 7  ;;  %s6847_s3 = sld [smem:[#allocation22_spill]] }
  0x64   : > { %s4232_s20 = sshll.u32 %s6870_s22, 4  ;;  %s6848_s5 = sld [smem:[#allocation24_spill]] }
  0x65   : > { %s6849_s7 = sld [smem:[#allocation26_spill]]  ;;  %s6081_s25 = scalar_lea.vmem %s6793_s18, %s6870_s22 }
  0x66   : > { %s5412_s17 = scalar_lea.vmem %s6844_s28, %s4232_s20  ;;  %s6850_s8 = sld [smem:[#allocation27_spill]] }
  0x67   : > { %v5415_v2 = vld [vmem:[%s5412_s17 + $0x10] sm:$0xff]  ;;  %v5418_v3 = vld [vmem:[%s5412_s17] sm:$0xff]  ;;  %v5423_v4 = vld [vmem:[%s5412_s17 + $0x18] sm:$0xff]  ;;  %s4184_s26 = sshll.u32 %s5384_s1, 2  ;;  %s6853_s4 = sld [smem:[#allocation23_spill]] }
  0x68   : > { %770 = vperm.xlu1 %4705, %v5415_v2   ;;  %760 = vperm.xlu0 %4704, %v5418_v3   ;;  %v5426_v5 = vld [vmem:[%s5412_s17 + $0x8] sm:$0xff]  ;;  %v809_v6 = vld [vmem:[%s6845_s6 + $0x18] sm:$0xff]  ;;  %v808_v7 = vld [vmem:[%s6845_s6 + $0x10] sm:$0xff]  ;;  %s5513_s14 = scalar_lea.vmem %s6846_s24, %s4232_s20  ;;  %s5148_s20 = smov 126  }
  0x69   : > { %v5436_v8 = vand.u32 4294901760, %v809_v6  ;;  %v5438_v9 = vand.u32 4294901760, %v808_v7  ;;  %v807_v10 = vld [vmem:[%s6845_s6 + $0x8] sm:$0xff]  ;;  %v5447_v12 = vld [vmem:[%s5412_s17 + $0x20] sm:$0xff]  ;;  %v5479_v22 = vld [vmem:[%s5412_s17 + $0x38] sm:$0xff]  ;;  %s5688_s27 = scalar_lea.vmem %s6847_s3, %s6870_s22  ;;  %s6253_s28 = scalar_lea.vmem [#allocation11], %s4184_s26 }
  0x6a   : > { %v5444_v11 = vld [vmem:[%s5412_s17 + $0x28] sm:$0xff]  ;;  %v5449_v13 = vand.u32 4294901760, %v807_v10  ;;  %v806_v14 = vld [vmem:[%s6845_s6] sm:$0xff]  ;;  %v5482_v23 = vld [vmem:[%s5412_s17 + $0x30] sm:$0xff]  ;;  %s6420_s24 = scalar_lea.vmem [#allocation8], %s5387_s10  ;;  %s4235_s2 = sshll.u32 %s5281_s9, 10 }
  0x6b   : > { %v5455_v15 = vsub.f32 %v809_v6, %v5436_v8  ;;  %v5458_v16 = vsub.f32 %v808_v7, %v5438_v9  ;;  %v5460_v17 = vand.u32 4294901760, %v806_v14  ;;  %4371 = vmatprep.subr.mxu0 %v5436_v8  ;;  %v727_v34 = vld [vmem:[%s5513_s14 + $0x10] sm:$0xff]  ;;  %v725_v35 = vld [vmem:[%s5513_s14] sm:$0xff]  ;;  %v728_v40 = vld [vmem:[%s5513_s14 + $0x18] sm:$0xff]  ;;  %s6855_s23 = sld [smem:[#allocation30_spill]]  ;;  %p6856_p7 = scmp.ne.s32.totalorder %s6835_s29, 0 }
  0x6c   : > { %775 = vperm.xlu1 %4705, %v5423_v4   ;;  %765 = vperm.xlu0 %4704, %v5426_v5   ;;  %v5464_v18 = vsub.f32 %v807_v10, %v5449_v13  ;;  %v726_v41 = vld [vmem:[%s5513_s14 + $0x8] sm:$0xff]  ;;  %v729_v52 = vld [vmem:[%s5513_s14 + $0x20] sm:$0xff]  ;;  %v732_v6 = vld [vmem:[%s5513_s14 + $0x38] sm:$0xff] }
  0x6d   : > { %4372 = vmatpush3.msra.mxu0 %v5436_v8  ;;  %v5470_v19 = vand.u32 4294901760, %v5455_v15  ;;  %v5473_v20 = vand.u32 4294901760, %v5458_v16  ;;  %v5476_v21 = vsub.f32 %v806_v14, %v5460_v17  ;;  %v730_v51 = vld [vmem:[%s5513_s14 + $0x28] sm:$0xff]  ;;  %v731_v7 = vld [vmem:[%s5513_s14 + $0x30] sm:$0xff] }
  0x6e   : > { %v5485_v24 = vand.u32 4294901760, %v5464_v18  ;;  %4373 = vmatprep.subr.mxu0 %v5438_v9 }
  0x6f   : > { %v1012_v25 = vsub.f32 %v5455_v15, %v5470_v19  ;;  %v1019_v26 = vsub.f32 %v5458_v16, %v5473_v20  ;;  %v5493_v27 = vand.u32 4294901760, %v5476_v21  ;;  %4374 = vmatpush3.msra.mxu0 %v5438_v9 }
  0x70   : > { %785 = vperm.xlu1 %4705, %v5444_v11   ;;  %780 = vperm.xlu0 %4704, %v5447_v12   ;;  %v1026_v28 = vsub.f32 %v5464_v18, %v5485_v24 }
  0x71   : > { %4375 = vmatprep.subr.mxu0 %v5449_v13  ;;  %v1013_v29 = vand.u32 4294901760, %v1012_v25  ;;  %v1020_v30 = vand.u32 4294901760, %v1019_v26  ;;  %v1033_v31 = vsub.f32 %v5476_v21, %v5493_v27  ;;  %s6663_s3 = scalar_lea.hbm %s6855_s23, %s4235_s2 }
  0x72   : > { %4376 = vmatpush3.msra.mxu0 %v5449_v13  ;;  %v1027_v32 = vand.u32 4294901760, %v1026_v28 }
  0x73   : > { %4391 = vmatprep.subr.mxu1 %v1013_v29  ;;  %4377 = vmatprep.subr.mxu0 %v5460_v17  ;;  %v1034_v33 = vand.u32 4294901760, %v1033_v31 }
  0x74   : > { %795 = vperm.xlu1 %4705, %v5479_v22   ;;  %790 = vperm.xlu0 %4704, %v5482_v23  }
  0x75   : > { %4392 = vmatpush3.msra.mxu1 %v1013_v29  ;;  %4378 = vmatpush3.msra.mxu0 %v5460_v17 }
  0x76   : > { %4393 = vmatprep.subr.mxu1 %v1020_v30  ;;  %4411 = vmatprep.subr.mxu0 %v5455_v15 }
  0x77   : > { %4394 = vmatpush3.msra.mxu1 %v1020_v30 }
  0x78   : > { %4395 = vmatprep.subr.mxu1 %v1027_v32  ;;  %1885 = vrot.lane.b32.xlu1 %v5418_v3, %s5148_s20 }
  0x79   : > { %4396 = vmatpush3.msra.mxu1 %v1027_v32 }
  0x7a   : > { %4397 = vmatprep.subr.mxu1 %v1034_v33 }
  0x7b   : > { %4398 = vmatpush3.msra.mxu1 %v1034_v33 }
  0x7c   : > { %4431 = vmatprep.subr.mxu1 %v5436_v8 }
  0xe3   : > { %v5517_v36 = vpop.permute.xlu1 %770  ;;  %v5519_v37 = vpop.permute.xlu0 %760 }
  0xe4   : > { %v800_v38 = vmul.f32 %v5517_v36, %v727_v34  ;;  %v798_v39 = vmul.f32 %v5519_v37, %v725_v35 }
  0xe6   : > { %v818_v42 = vsel %vm810_vm0, %v800_v38, 0  ;;  %v812_v43 = vsel %vm810_vm0, %v798_v39, 0 }
  0xe7   : > { %v5527_v44 = vand.u32 4294901760, %v818_v42  ;;  %v5529_v45 = vand.u32 4294901760, %v812_v43  ;;  %v5531_v46 = vpop.permute.xlu1 %775  ;;  %v5533_v47 = vpop.permute.xlu0 %765 }
  0xe8   : > { %v801_v48 = vmul.f32 %v5531_v46, %v728_v40  ;;  %v799_v49 = vmul.f32 %v5533_v47, %v726_v41 }
  0xe9   : > { %v5538_v50 = vsub.f32 %v818_v42, %v5527_v44  ;;  %4399 = vmatprep.mubr.f32.mxu1 %v5529_v45  ;;  %v5544_v53 = vsub.f32 %v812_v43, %v5529_v45 }
  0xea   : > { %v821_v54 = vsel %vm810_vm0, %v801_v48, 0  ;;  %v815_v55 = vsel %vm810_vm0, %v799_v49, 0 }
  0xeb   : > { %v5548_v56 = vand.u32 4294901760, %v821_v54  ;;  %v5550_v57 = vand.u32 4294901760, %v815_v55  ;;  %v5552_v58 = vpop.permute.xlu1 %785  ;;  %v5554_v59 = vpop.permute.xlu0 %780  ;;  %v906_v60 = vand.u32 4294901760, %v5544_v53  ;;  %v926_v10 = vand.u32 4294901760, %v5538_v50 }
  0xec   : > { %v803_v61 = vmul.f32 %v5552_v58, %v730_v51  ;;  %v802_v62 = vmul.f32 %v5554_v59, %v729_v52 }
  0xed   : > { %v5560_v63 = vsub.f32 %v821_v54, %v5548_v56  ;;  %v5563_v0 = vsub.f32 %v815_v55, %v5550_v57  ;;  %4400 = vmatmul.mubr.f32.vlgmr.msra.gmra.mxu1 %v5550_v57  ;;  %v907_v26 = vsub.f32 %v5544_v53, %v906_v60  ;;  %v927_v40 = vsub.f32 %v5538_v50, %v926_v10 }
  0xee   : > { %v827_v14 = vsel %vm810_vm0, %v803_v61, 0  ;;  %v824_v25 = vsel %vm810_vm0, %v802_v62, 0  ;;  %4402 = vmatprep.mubr.f32.mxu1 %v5527_v44  ;;  %4432 = vmatpush3.msra.mxu1 %v5436_v8 }
  0xef   : > { %v5574_v28 = vand.u32 4294901760, %v827_v14  ;;  %v5576_v29 = vand.u32 4294901760, %v824_v25  ;;  %v5578_v30 = vpop.permute.xlu1 %795  ;;  %v5580_v31 = vpop.permute.xlu0 %790  ;;  %v916_v32 = vand.u32 4294901760, %v5563_v0  ;;  %4433 = vmatprep.subr.mxu1 %v5438_v9  ;;  %v936_v35 = vand.u32 4294901760, %v5560_v63 }
  0xf0   : > { %v805_v33 = vmul.f32 %v5578_v30, %v732_v6  ;;  %v804_v34 = vmul.f32 %v5580_v31, %v731_v7  ;;  %4434 = vmatpush3.msra.mxu1 %v5438_v9  ;;  %v908_v43 = vand.u32 4294901760, %v907_v26  ;;  %v928_v7 = vand.u32 4294901760, %v927_v40 }
  0xf1   : > { %v5589_v38 = vsub.f32 %v827_v14, %v5574_v28  ;;  %v5592_v39 = vsub.f32 %v824_v25, %v5576_v29  ;;  %4403 = vmatmul.mubr.f32.gmra.mxu1 %v5548_v56  ;;  %v917_v48 = vsub.f32 %v5563_v0, %v916_v32  ;;  %4435 = vmatprep.subr.mxu1 %v5449_v13 }
  0xf2   : > { %v833_v41 = vsel %vm810_vm0, %v805_v33, 0  ;;  %v830_v42 = vsel %vm810_vm0, %v804_v34, 0  ;;  %4405 = vmatprep.mubr.f32.mxu1 %v5576_v29  ;;  %4436 = vmatpush3.msra.mxu1 %v5449_v13  ;;  %v937_v54 = vsub.f32 %v5560_v63, %v936_v35 }
  0xf3   : > { %v5603_v49 = vand.u32 4294901760, %v833_v41  ;;  %v5605_v51 = vand.u32 4294901760, %v830_v42  ;;  %4379 = vmatprep.mubr.f32.mxu0 %v908_v43  ;;  %v918_v52 = vand.u32 4294901760, %v917_v48  ;;  %v946_v55 = vand.u32 4294901760, %v5592_v39  ;;  %4437 = vmatprep.subr.mxu1 %v5460_v17 }
  0xf4   : > { %v956_v61 = vand.u32 4294901760, %v5589_v38  ;;  %v938_v26 = vand.u32 4294901760, %v937_v54  ;;  %4438 = vmatpush3.msra.mxu1 %v5460_v17 }
  0xf5   : > { %v5613_v62 = vsub.f32 %v833_v41, %v5603_v49  ;;  %v965_v6 = vsub.f32 %v830_v42, %v5605_v51  ;;  %4406 = vmatmul.mubr.f32.gmra.mxu1 %v5574_v28  ;;  %4380 = vmatmul.mubr.f32.vlgmr.msra.gmra.mxu0 %v918_v52  ;;  %v947_v14 = vsub.f32 %v5592_v39, %v946_v55 }
  0xf6   : > { %4408 = vmatprep.mubr.f32.mxu1 %v5605_v51  ;;  %4412 = vmatpush3.msra.mxu0 %v5455_v15  ;;  %v957_v34 = vsub.f32 %v5589_v38, %v956_v61 }
  0xf7   : > { %4382 = vmatprep.mubr.f32.mxu0 %v928_v7  ;;  %v966_v25 = vand.u32 4294901760, %v965_v6  ;;  %4413 = vmatprep.subr.mxu0 %v5458_v16  ;;  %v948_v33 = vand.u32 4294901760, %v947_v14  ;;  %v976_v41 = vand.u32 4294901760, %v5613_v62 }
  0xf8   : > { %4414 = vmatpush3.msra.mxu0 %v5458_v16  ;;  %v958_v42 = vand.u32 4294901760, %v957_v34  ;;  %4471 = vmatprep.subr.mxu1 %v5436_v8 }
  0xf9   : > { %4409 = vmatmul.mubr.f32.gmra.mxu1 %v5603_v49  ;;  %v967_v40 = vsub.f32 %v965_v6, %v966_v25  ;;  %4383 = vmatmul.mubr.f32.gmra.mxu0 %v938_v26  ;;  %v977_v43 = vsub.f32 %v5613_v62, %v976_v41 }
  0xfa   : > { %4439 = vmatprep.mubr.f32.mxu1 %v906_v60  ;;  %4385 = vmatprep.mubr.f32.mxu0 %v948_v33 }
  0xfb   : > { %4415 = vmatprep.subr.mxu0 %v5464_v18  ;;  %v968_v15 = vand.u32 4294901760, %v967_v40  ;;  %v978_v16 = vand.u32 4294901760, %v977_v43 }
  0xfc   : > { %4416 = vmatpush3.msra.mxu0 %v5464_v18 }
  0xfd   : > { %4440 = vmatmul.mubr.f32.vlgmr.msra.gmra.mxu1 %v916_v32  ;;  %4417 = vmatprep.subr.mxu0 %v5476_v21 }
  0xfe   : > { %4386 = vmatmul.mubr.f32.gmra.mxu0 %v958_v42  ;;  %4442 = vmatprep.mubr.f32.mxu1 %v926_v10 }
  0xff   : > { %4388 = vmatprep.mubr.f32.mxu0 %v968_v15  ;;  %4418 = vmatpush3.msra.mxu0 %v5476_v21 }
 0x100   : > { %4451 = vmatprep.subr.mxu0 %v5470_v19  ;;  %4472 = vmatpush3.msra.mxu1 %v5436_v8 }
 0x101   : > { %4443 = vmatmul.mubr.f32.gmra.mxu1 %v936_v35  ;;  %4473 = vmatprep.subr.mxu1 %v5438_v9 }
 0x102   : > { %4389 = vmatmul.mubr.f32.gmra.mxu0 %v978_v16  ;;  %4445 = vmatprep.mubr.f32.mxu1 %v946_v55 }
 0x103   : > { %4419 = vmatprep.mubr.f32.mxu0 %v5544_v53  ;;  %4474 = vmatpush3.msra.mxu1 %v5438_v9 }
 0x104   : > { %4475 = vmatprep.subr.mxu1 %v5449_v13 }
 0x105   : > { %4446 = vmatmul.mubr.f32.gmra.mxu1 %v956_v61 }
 0x106   : > { %4420 = vmatmul.mubr.f32.vlgmr.msra.gmra.mxu0 %v5563_v0  ;;  %4448 = vmatprep.mubr.f32.mxu1 %v966_v25 }
 0x107   : > { %4452 = vmatpush3.msra.mxu0 %v5470_v19  ;;  %4422 = vmatprep.mubr.f32.mxu0 %v5538_v50 }
 0x108   : > { %4453 = vmatprep.subr.mxu0 %v5473_v20  ;;  %4476 = vmatpush3.msra.mxu1 %v5449_v13 }
 0x109   : > { %4449 = vmatmul.mubr.f32.gmra.mxu1 %v976_v41  ;;  %4454 = vmatpush3.msra.mxu0 %v5473_v20 }
 0x10a   : > { %4423 = vmatmul.mubr.f32.gmra.mxu0 %v5560_v63  ;;  %4479 = vmatprep.mubr.f32.mxu1 %v5529_v45 }
 0x10b   : > { %4425 = vmatprep.mubr.f32.mxu0 %v5592_v39  ;;  %4477 = vmatprep.subr.mxu1 %v5460_v17 }
 0x10c   : > { %4455 = vmatprep.subr.mxu0 %v5485_v24  ;;  %4478 = vmatpush3.msra.mxu1 %v5460_v17 }
 0x10d   : > { %4456 = vmatpush3.msra.mxu0 %v5485_v24  ;;  %4480 = vmatmul.mubr.f32.vlgmr.msra.gmra.mxu1 %v5550_v57 }
 0x10e   : > { %4426 = vmatmul.mubr.f32.gmra.mxu0 %v5589_v38  ;;  %4482 = vmatprep.mubr.f32.mxu1 %v5527_v44 }
 0x10f   : > { %4428 = vmatprep.mubr.f32.mxu0 %v965_v6  ;;  %4457 = vmatprep.subr.mxu0 %v5493_v27 }
 0x110   : > { %4458 = vmatpush3.msra.mxu0 %v5493_v27 }
 0x111   : > { %4483 = vmatmul.mubr.f32.gmra.mxu1 %v5548_v56 }
 0x112   : > { %4429 = vmatmul.mubr.f32.gmra.mxu0 %v5613_v62  ;;  %4485 = vmatprep.mubr.f32.mxu1 %v5576_v29 }
 0x113   : > { %4459 = vmatprep.mubr.f32.mxu0 %v5529_v45 }
 0x115   : > { %4486 = vmatmul.mubr.f32.gmra.mxu1 %v5574_v28 }
 0x116   : > { %4460 = vmatmul.mubr.f32.vlgmr.msra.gmra.mxu0 %v5550_v57  ;;  %4488 = vmatprep.mubr.f32.mxu1 %v5605_v51 }
 0x117   : > { %4462 = vmatprep.mubr.f32.mxu0 %v5527_v44 }
 0x119   : > { %4489 = vmatmul.mubr.f32.gmra.mxu1 %v5603_v49 }
 0x11a   : > { %4463 = vmatmul.mubr.f32.gmra.mxu0 %v5548_v56 }
 0x11b   : > { %4465 = vmatprep.mubr.f32.mxu0 %v5576_v29 }
 0x11e   : > { %4466 = vmatmul.mubr.f32.gmra.mxu0 %v5574_v28 }
 0x11f   : > { %4468 = vmatprep.mubr.f32.mxu0 %v5605_v51 }
 0x122   : > { %4469 = vmatmul.mubr.f32.gmra.mxu0 %v5603_v49 }
 0x1ad   : > { %v4401_v8 = vpop.f32.mrf.mxu1 }
 0x1af   : > { %v1071_v9 = vpop.f32.mrf.mxu1 }
 0x1b1   : > { %v4404_v13 = vpop.f32.mrf.mxu1 }
 0x1b3   : > { %v1083_v17 = vpop.f32.mrf.mxu1 }
 0x1b5   : > { %v4407_v18 = vpop.f32.mrf.mxu1  ;;  %v4381_v19 = vpop.f32.mrf.mxu0 }
 0x1b6   : > { %v1078_v55 = vadd.f32 %v4401_v8, %v4381_v19  ;;  %v5693_v8 = vld [vmem:[%s6848_s5] ss:$0 sm:$0xff] }
 0x1b7   : > { %v1095_v20 = vpop.f32.mrf.mxu1  ;;  %v910_v21 = vpop.f32.mrf.mxu0 }
 0x1b8   : > { %v1072_v6 = vadd.f32 %v1071_v9, %v910_v21  ;;  %v4194_v9 = vld [vmem:[%s5688_s27] ss:$0 sm:$0xff] }
 0x1b9   : > { %v5674_v24 = vpop.f32.mrf.mxu1  ;;  %v4384_v27 = vpop.f32.mrf.mxu0 }
 0x1ba   : > { %v1090_v25 = vadd.f32 %v4404_v13, %v4384_v27  ;;  %v1646_v27 = vmul.f32 %v4194_v9, %v5533_v47 }
 0x1bb   : > { %v1107_v44 = vpop.f32.mrf.mxu1  ;;  %v930_v45 = vpop.f32.mrf.mxu0 }
 0x1bc   : > { %v1084_v42 = vadd.f32 %v1083_v17, %v930_v45  ;;  %v4195_v17 = vld [vmem:[%s5688_s27 + $0x1] ss:$0 sm:$0xff] }
 0x1bd   : > { %v4441_v50 = vpop.f32.mrf.mxu1 }
 0x1be   : > { %v4387_v53 = vpop.f32.mrf.mxu0 }
 0x1bf   : > { %v1319_v56 = vpop.f32.mrf.mxu1  ;;  %v1102_v43 = vadd.f32 %v4407_v18, %v4387_v53  ;;  %v1690_v18 = vmul.f32 %v5693_v8, %v5533_v47  ;;  %v1648_v47 = vmul.f32 %v4195_v17, %v5531_v46 }
 0x1c0   : > { %v950_v57 = vpop.f32.mrf.mxu0 }
 0x1c1   : > { %v4444_v60 = vpop.f32.mrf.mxu1 }
 0x1c2   : > { %v5676_v63 = vpop.f32.mrf.mxu0 }
 0x1c3   : > { %v1335_v0 = vpop.f32.mrf.mxu1 }
 0x1c4   : > { %v970_v10 = vpop.f32.mrf.mxu0 }
 0x1c5   : > { %v1108_v28 = vadd.f32 %v1107_v44, %v970_v10  ;;  %v4447_v29 = vpop.f32.mrf.mxu1  ;;  %v1096_v44 = vadd.f32 %v1095_v20, %v950_v57  ;;  %v5708_v20 = vld [vmem:[%s6849_s7] ss:$0 sm:$0xff] }
 0x1c6   : > { %v4421_v32 = vpop.f32.mrf.mxu0 }
 0x1c7   : > { %v5678_v35 = vpop.f32.mrf.mxu1  ;;  %v1201_v7 = vadd.f32 %v4421_v32, %v1078_v55 }
 0x1c8   : > { %v1193_v38 = vpop.f32.mrf.mxu0 }
 0x1c9   : > { %v5680_v39 = vpop.f32.mrf.mxu1  ;;  %v1194_v26 = vadd.f32 %v1193_v38, %v1072_v6  ;;  %v1328_v15 = vadd.f32 %v4441_v50, %v1201_v7 }
 0x1ca   : > { %v4424_v48 = vpop.f32.mrf.mxu0 }
 0x1cb   : > { %v1367_v49 = vpop.f32.mrf.mxu1  ;;  %v1215_v41 = vadd.f32 %v4424_v48, %v1090_v25  ;;  %v1320_v19 = vadd.f32 %v1319_v56, %v1194_v26  ;;  %v1645_v48 = vmul.f32 %v4194_v9, %v5519_v37  ;;  %v1689_v56 = vmul.f32 %v5693_v8, %v5519_v37 }
 0x1cc   : > { %v1207_v51 = vpop.f32.mrf.mxu0 }
 0x1cd   : > { %v4481_v52 = vpop.f32.mrf.mxu1  ;;  %v1208_v10 = vadd.f32 %v1207_v51, %v1084_v42  ;;  %v1344_v38 = vadd.f32 %v4444_v60, %v1215_v41  ;;  %v1692_v60 = vmul.f32 %v5693_v8, %v5531_v46 }
 0x1ce   : > { %v4427_v54 = vpop.f32.mrf.mxu0 }
 0x1cf   : > { %v1575_v62 = vpop.f32.mrf.mxu1  ;;  %v1336_v7 = vadd.f32 %v1335_v0, %v1208_v10 }
 0x1d0   : > { %v1221_v61 = vpop.f32.mrf.mxu0 }
 0x1d1   : > { %v4484_v33 = vpop.f32.mrf.mxu1 }
 0x1d2   : > { %v5682_v14 = vpop.f32.mrf.mxu0 }
 0x1d3   : > { %v1587_v32 = vpop.f32.mrf.mxu1 }
 0x1d4   : > { %v1235_v34 = vpop.f32.mrf.mxu0 }
 0x1d5   : > { %v1236_v40 = vadd.f32 %v1235_v34, %v1108_v28  ;;  %v1229_v28 = vadd.f32 %v4427_v54, %v1102_v43 }
 0x1d6   : > { %v4461_v16 = vpop.f32.mrf.mxu0 }
 0x1d7   : > { %v1465_v13 = vadd.f32 %v4461_v16, %v1328_v15  ;;  %v5696_v21 = vadd.f32 %v1367_v49, %v1236_v40  ;;  %v1222_v49 = vadd.f32 %v1221_v61, %v1096_v44  ;;  %v1360_v61 = vadd.f32 %v4447_v29, %v1229_v28  ;;  %v4196_v16 = vld [vmem:[%s5688_s27 + $0x2] ss:$0 sm:$0xff] }
 0x1d8   : > { %v1458_v50 = vpop.f32.mrf.mxu0 }
 0x1d9   : > { %v1582_v45 = vadd.f32 %v4481_v52, %v1465_v13  ;;  %v1459_v53 = vadd.f32 %v1458_v50, %v1320_v19  ;;  %v4487_v52 = vpop.f32.mrf.mxu1  ;;  %v1352_v43 = vadd.f32 %v5678_v35, %v1222_v49 }
 0x1da   : > { %v4464_v57 = vpop.f32.mrf.mxu0 }
 0x1db   : > { %v1654_v51 = vadd.f32 %v1646_v27, %v1582_v45  ;;  %v1698_v54 = vadd.f32 %v1690_v18, %v1582_v45  ;;  %v1576_v55 = vadd.f32 %v1575_v62, %v1459_v53  ;;  %v1477_v6 = vadd.f32 %v4464_v57, %v1344_v38  ;;  %v1599_v9 = vpop.f32.mrf.mxu1  ;;  %v4197_v57 = vld [vmem:[%s5688_s27 + $0x3] ss:$0 sm:$0xff]  ;;  %s5150_s27 = smov 127  }
 0x1dc   : > { %v1470_v37 = vpop.f32.mrf.mxu0  ;;  %v1114_v62 = vadd.f32 %v5674_v24, %v5676_v63  ;;  %v1691_v24 = vmul.f32 %v5693_v8, %v5517_v36  ;;  %v1650_v18 = vmul.f32 %v4196_v16, %v5552_v58  ;;  %v1693_v38 = vmul.f32 %v5693_v8, %v5554_v59 }
 0x1dd   : > { %v1668_v25 = vadd.f32 %v5708_v20, %v1654_v51  ;;  %v1706_v26 = vadd.f32 %v5708_v20, %v1698_v54  ;;  %v1653_v34 = vadd.f32 %v1645_v48, %v1576_v55  ;;  %v1697_v41 = vadd.f32 %v1689_v56, %v1576_v55  ;;  %v4490_v48 = vpop.f32.mrf.mxu1 }
 0x1de   : > { %v1594_v40 = vadd.f32 %v4484_v33, %v1477_v6  ;;  %v1471_v15 = vadd.f32 %v1470_v37, %v1336_v7  ;;  %v4467_v42 = vpop.f32.mrf.mxu0  ;;  %v1243_v63 = vadd.f32 %v5682_v14, %v1114_v62  ;;  %v1647_v33 = vmul.f32 %v4195_v17, %v5517_v36 }
 0x1df   : > { %4729 = vtanh.f32 %v1668_v25  ;;  %v1667_v46 = vadd.f32 %v5708_v20, %v1653_v34  ;;  %v1705_v0 = vadd.f32 %v5708_v20, %v1697_v41  ;;  %v1489_v29 = vadd.f32 %v4467_v42, %v1360_v61 }
 0x1e0   : > { %4731 = vtanh.f32 %v1706_v26  ;;  %v1656_v13 = vadd.f32 %v1648_v47, %v1594_v40  ;;  %v1700_v19 = vadd.f32 %v1692_v60, %v1594_v40  ;;  %v1588_v27 = vadd.f32 %v1587_v32, %v1471_v15  ;;  %v1482_v44 = vpop.f32.mrf.mxu0 }
 0x1e1   : > { %4733 = vtanh.f32 %v1667_v46  ;;  %v1483_v35 = vadd.f32 %v1482_v44, %v1352_v43  ;;  %v1606_v28 = vadd.f32 %v4487_v52, %v1489_v29  ;;  %v1649_v32 = vmul.f32 %v4196_v16, %v5554_v59  ;;  %v1611_v52 = vpop.f32.mrf.mxu1 }
 0x1e2   : > { %4735 = vtanh.f32 %v1705_v0  ;;  %v1670_v10 = vadd.f32 %v5708_v20, %v1656_v13  ;;  %v4470_v50 = vpop.f32.mrf.mxu0  ;;  %v1699_v45 = vadd.f32 %v1691_v24, %v1588_v27  ;;  %v1708_v14 = vadd.f32 %v5708_v20, %v1700_v19 }
 0x1e3   : > { %v1600_v53 = vadd.f32 %v1599_v9, %v1483_v35  ;;  %v1655_v36 = vadd.f32 %v1647_v33, %v1588_v27  ;;  %v1376_v49 = vadd.f32 %v5680_v39, %v1243_v63  ;;  %v1658_v51 = vadd.f32 %v1650_v18, %v1606_v28 }
 0x1e4   : > { %4737 = vtanh.f32 %v1670_v10  ;;  %v1494_v17 = vpop.f32.mrf.mxu0  ;;  %v1707_v56 = vadd.f32 %v5708_v20, %v1699_v45  ;;  %v1694_v6 = vmul.f32 %v5693_v8, %v5552_v58  ;;  %v1651_v39 = vmul.f32 %v4197_v57, %v5580_v31 }
 0x1e5   : > { %v1657_v54 = vadd.f32 %v1649_v32, %v1600_v53  ;;  %v1701_v55 = vadd.f32 %v1693_v38, %v1600_v53  ;;  %v1501_v47 = vadd.f32 %v4470_v50, %v1376_v49  ;;  %v1495_v59 = vadd.f32 %v1494_v17, %v5696_v21  ;;  %v5747_v21 = vld [vmem:[%s6850_s8] ss:$0 sm:$0xff] }
 0x1e6   : > { %4739 = vtanh.f32 %v1707_v56  ;;  %v1669_v60 = vadd.f32 %v5708_v20, %v1655_v36  ;;  %v1695_v61 = vmul.f32 %v5693_v8, %v5580_v31  ;;  %v1672_v58 = vadd.f32 %v5708_v20, %v1658_v51 }
 0x1e7   : > { %4741 = vtanh.f32 %v1708_v14  ;;  %v1671_v7 = vadd.f32 %v5708_v20, %v1657_v54  ;;  %v1709_v37 = vadd.f32 %v5708_v20, %v1701_v55  ;;  %v1612_v25 = vadd.f32 %v1611_v52, %v1495_v59 }
 0x1e8   : > { %v1702_v26 = vadd.f32 %v1694_v6, %v1606_v28  ;;  %v1618_v34 = vadd.f32 %v4490_v48, %v1501_v47  ;;  %v1652_v42 = vmul.f32 %v4197_v57, %v5578_v30  ;;  %v1696_v35 = vmul.f32 %v5693_v8, %v5578_v30 }
 0x1e9   : > { %4743 = vtanh.f32 %v1671_v7  ;;  %v1659_v41 = vadd.f32 %v1651_v39, %v1612_v25  ;;  %v1703_v62 = vadd.f32 %v1695_v61, %v1612_v25 }
 0x1ea   : > { %4745 = vtanh.f32 %v1709_v37  ;;  %v1710_v9 = vadd.f32 %v5708_v20, %v1702_v26  ;;  %v1660_v13 = vadd.f32 %v1652_v42, %v1618_v34  ;;  %v1704_v33 = vadd.f32 %v1696_v35, %v1618_v34 }
 0x1eb   : > { %4747 = vtanh.f32 %v1669_v60  ;;  %v1673_v31 = vadd.f32 %v5708_v20, %v1659_v41  ;;  %v1711_v43 = vadd.f32 %v5708_v20, %v1703_v62  ;;  %v2141_v42 = vsub.f32 1.0, %v5418_v3 }
 0x1ec   : > { %v4730_v40 = vpop.eup %4729  ;;  %4749 = vtanh.f32 %v1672_v58  ;;  %v1674_v50 = vadd.f32 %v5708_v20, %v1660_v13  ;;  %v1712_v30 = vadd.f32 %v5708_v20, %v1704_v33  ;;  %v2148_v13 = vsub.f32 1.0, %v5479_v22 }
 0x1ed   : > { %v4732_v15 = vpop.eup %4731  ;;  %v1728_v46 = vmul.f32 %v4730_v40, %v5747_v21  ;;  %4751 = vtanh.f32 %v1673_v31  ;;  %v2143_v31 = vsub.f32 1.0, %v5415_v2 }
 0x1ee   : > { %v4734_v0 = vpop.eup %4733  ;;  %v1774_v29 = vmul.f32 %v4732_v15, %v5747_v21  ;;  %4753 = vtanh.f32 %v1711_v43  ;;  %v2145_v43 = vsub.f32 1.0, %v5447_v12 }
 0x1ef   : > { %v4736_v16 = vpop.eup %4735  ;;  %v1738_v19 = vsel %vm810_vm0, %v1728_v46, 0.0  ;;  %v1727_v24 = vmul.f32 %v4734_v0, %v5747_v21  ;;  %4755 = vtanh.f32 %v1710_v9  ;;  %v6810_v46 = vsub.f32 1.0, %v5482_v23 }
 0x1f0   : > { %v1784_v27 = vsel %vm810_vm0, %v1774_v29, 0.0  ;;  %1739 = vadd.xlane.f32.xlu1 %v1738_v19  ;;  %v1773_v44 = vmul.f32 %v4736_v16, %v5747_v21  ;;  %4757 = vtanh.f32 %v1674_v50  ;;  %v2142_v0 = vsub.f32 1.0, %v5426_v5  ;;  %v5837_v19 = vpop.permute.xlu1 %1885 }
 0x1f1   : > { %v4738_v63 = vpop.eup %4737  ;;  %1785 = vadd.xlane.f32.xlu0 %v1784_v27  ;;  %v1735_v18 = vsel %vm810_vm0, %v1727_v24, 0.0  ;;  %4759 = vtanh.f32 %v1712_v30  ;;  %v5151_v29 = vmov 0.0   ;;  %v2144_v16 = vsub.f32 1.0, %v5423_v4  ;;  %v5839_v24 = vld [vmem:[#allocation2] ss:$0 sm:$0xff] }
 0x1f2   : > { %v1781_v10 = vsel %vm810_vm0, %v1773_v44, 0.0  ;;  %v1730_v32 = vmul.f32 %v4738_v63, %v5747_v21  ;;  %4491 = vmatprep.subr.mxu0 %v5151_v29  ;;  %4502 = vmatprep.subr.mxu1 %v5151_v29  ;;  %v2146_v9 = vsub.f32 1.0, %v5444_v11 }
 0x1f3   : > { %v4740_v28 = vpop.eup %4739  ;;  %4510 = vmatprep.mubr.msk.f32.mxu1 %vm5152_vm15, %v5151_v29  ;;  %4499 = vmatprep.mubr.msk.f32.mxu0 %vm5152_vm15, %v5151_v29 }
 0x1f4   : > { %1782 = vadd.xlane.f32.xlu1 %v1781_v10  ;;  %v4742_v45 = vpop.eup %4741  ;;  %v1775_v53 = vmul.f32 %v4740_v28, %v5747_v21  ;;  %v1744_v48 = vsel %vm810_vm0, %v1730_v32, 0.0 }
 0x1f5   : > { %1736 = vadd.xlane.f32.xlu0 %v1735_v18  ;;  %v1776_v17 = vmul.f32 %v4742_v45, %v5747_v21 }
 0x1f6   : > { %v4744_v38 = vpop.eup %4743  ;;  %v1787_v8 = vsel %vm810_vm0, %v1775_v53, 0.0 }
 0x1f7   : > { %v4746_v14 = vpop.eup %4745  ;;  %v1731_v36 = vmul.f32 %v4744_v38, %v5747_v21  ;;  %v1790_v20 = vsel %vm810_vm0, %v1776_v17, 0.0 }
 0x1f8   : > { %1788 = vadd.xlane.f32.xlu1 %v1787_v8  ;;  %v4748_v56 = vpop.eup %4747  ;;  %v1777_v51 = vmul.f32 %v4746_v14, %v5747_v21 }
 0x1f9   : > { %1745 = vadd.xlane.f32.xlu0 %v1744_v48  ;;  %v4750_v49 = vpop.eup %4749  ;;  %v1747_v57 = vsel %vm810_vm0, %v1731_v36, 0.0  ;;  %v1729_v55 = vmul.f32 %v4748_v56, %v5747_v21 }
 0x1fa   : > { %v4752_v54 = vpop.eup %4751  ;;  %v1793_v60 = vsel %vm810_vm0, %v1777_v51, 0.0  ;;  %v1732_v7 = vmul.f32 %v4750_v49, %v5747_v21 }
 0x1fb   : > { %v4754_v6 = vpop.eup %4753  ;;  %v1733_v47 = vmul.f32 %v4752_v54, %v5747_v21  ;;  %v1741_v52 = vsel %vm810_vm0, %v1729_v55, 0.0 }
 0x1fc   : > { %1748 = vadd.xlane.f32.xlu1 %v1747_v57  ;;  %v1779_v59 = vmul.f32 %v4754_v6, %v5747_v21  ;;  %v4756_v37 = vpop.eup %4755  ;;  %v1750_v39 = vsel %vm810_vm0, %v1732_v7, 0.0 }
 0x1fd   : > { %1791 = vadd.xlane.f32.xlu0 %v1790_v20  ;;  %v1778_v61 = vmul.f32 %v4756_v37, %v5747_v21  ;;  %v4758_v25 = vpop.eup %4757 }
 0x1fe   : > { %v1734_v26 = vmul.f32 %v4758_v25, %v5747_v21  ;;  %v4760_v34 = vpop.eup %4759  ;;  %v1799_v15 = vsel %vm810_vm0, %v1779_v59, 0.0 }
 0x1ff   : > { %v1796_v58 = vsel %vm810_vm0, %v1778_v61, 0.0  ;;  %v1780_v62 = vmul.f32 %v4760_v34, %v5747_v21  ;;  %v1753_v21 = vsel %vm810_vm0, %v1733_v47, 0.0 }
 0x200   : > { %1794 = vadd.xlane.f32.xlu1 %v1793_v60  ;;  %v1756_v41 = vsel %vm810_vm0, %v1734_v26, 0.0 }
 0x201   : > { %1742 = vadd.xlane.f32.xlu0 %v1741_v52  ;;  %v1802_v40 = vsel %vm810_vm0, %v1780_v62, 0.0 }
 0x205   : > { %1751 = vadd.xlane.f32.xlu0 %v1750_v39 }
 0x209   : > { %1797 = vadd.xlane.f32.xlu0 %v1796_v58 }
 0x20d   : > { %1757 = vadd.xlane.f32.xlu0 %v1756_v41 }
 0x211   : > { %1803 = vadd.xlane.f32.xlu0 %v1802_v40  ;;  %1889 = vrot.lane.b32.xlu1 %v5415_v2, %s5148_s20 }
 0x215   : > { %1891 = vrot.lane.b32.xlu1 %v5423_v4, %s5148_s20 }
 0x227   : > { %1887 = vrot.lane.b32.xlu0 %v5426_v5, %s5148_s20 }
 0x22b   : > { %1997 = vrot.lane.b32.xlu0 %v5418_v3, %s5149_s16  ;;  %v6851_v3 = vsub.f32 1.0, %v5482_v23 }
 0x22f   : > { %2001 = vrot.lane.b32.xlu0 %v5415_v2, %s5149_s16 }
 0x233   : > { %1893 = vrot.lane.b32.xlu0 %v5447_v12, %s5148_s20 }
 0x237   : > { %2005 = vrot.lane.b32.xlu0 %v5447_v12, %s5149_s16 }
 0x239   : > { %1754 = vadd.xlane.f32.xlu1 %v1753_v21 }
 0x23b   : > { %1897 = vrot.lane.b32.xlu0 %v5482_v23, %s5148_s20 }
 0x23d   : > { %1800 = vadd.xlane.f32.xlu1 %v1799_v15 }
 0x23f   : > { %2009 = vrot.lane.b32.xlu0 %v5482_v23, %s5149_s16 }
 0x243   : > { %2157 = vrot.lane.b32.xlu0 %v2141_v42, %s5150_s27 }
 0x247   : > { %2161 = vrot.lane.b32.xlu0 %v2143_v31, %s5150_s27 }
 0x24b   : > { %2165 = vrot.lane.b32.xlu0 %v2145_v43, %s5150_s27 }
 0x24e   : > { %1999 = vrot.lane.b32.xlu1 %v5426_v5, %s5149_s16 }
 0x24f   : > { %2169 = vrot.lane.b32.xlu0 %v6810_v46, %s5150_s27 }
 0x252   : > { %2003 = vrot.lane.b32.xlu1 %v5423_v4, %s5149_s16  ;;  %v6852_v4 = vmov 0  }
 0x256   : > { %1895 = vrot.lane.b32.xlu1 %v5444_v11, %s5148_s20 }
 0x25a   : > { %2007 = vrot.lane.b32.xlu1 %v5444_v11, %s5149_s16 }
 0x25e   : > { %1899 = vrot.lane.b32.xlu1 %v5479_v22, %s5148_s20 }
 0x262   : > { %2011 = vrot.lane.b32.xlu1 %v5479_v22, %s5149_s16  ;;  %v6212_v22 = vld [vmem:[%s5513_s14 + $0x18] sm:$0xff]  ;;  %s5154_s16 = smov [#allocation9]  }
 0x266   : > { %2159 = vrot.lane.b32.xlu1 %v2142_v0, %s5150_s27 }
 0x26a   : > { %2163 = vrot.lane.b32.xlu1 %v2144_v16, %s5150_s27 }
 0x26e   : > { %2167 = vrot.lane.b32.xlu1 %v2146_v9, %s5150_s27 }
 0x272   : > { %2171 = vrot.lane.b32.xlu1 %v2148_v13, %s5150_s27  ;;  %s5021_s27 = sshll.u32 %s5154_s16, 4  ;;  %s5022_s27 = int_to_ptr.vmem [resolvable:$false] %s5021_s27 }
 0x279   : > { %v1740_v27 = vpop.xlane.xlu1 %1739 }
 0x27a   : > { %v1786_v44 = vpop.xlane.xlu0 %1785  ;;  %v5858_v54 = vadd.f32 %v5839_v24, %v1740_v27 }
 0x27b   : > { %v5873_v58 = vadd.f32 %v5839_v24, %v1786_v44 }
 0x27c   : > { %v1822_v37 = vand.u32 2147483647, %v5858_v54 }
 0x27d   : > { %v1783_v63 = vpop.xlane.xlu1 %1782  ;;  %v1934_v27 = vand.u32 2147483647, %v5873_v58 }
 0x27e   : > { %v5842_v35 = vadd.f32 %v5839_v24, %v1783_v63  ;;  %v1737_v33 = vpop.xlane.xlu0 %1736  ;;  %v1830_v62 = vsub.f32 0.0, %v1822_v37 }
 0x27f   : > { %v5845_v10 = vadd.f32 %v5839_v24, %v1737_v33 }
 0x280   : > { %v1933_v28 = vand.u32 2147483647, %v5842_v35  ;;  %v1839_v44 = vmul.f32 1.442695, %v1830_v62 }
 0x281   : > { %v1821_v50 = vand.u32 2147483647, %v5845_v10  ;;  %v1789_v18 = vpop.xlane.xlu1 %1788 }
 0x282   : > { %v1941_v32 = vsub.f32 0.0, %v1933_v28  ;;  %v5850_v45 = vadd.f32 %v5839_v24, %v1789_v18  ;;  %v1746_v53 = vpop.xlane.xlu0 %1745 }
 0x283   : > { %v1829_v38 = vsub.f32 0.0, %v1821_v50  ;;  %v5867_v59 = vadd.f32 %v5839_v24, %v1746_v53  ;;  %v1942_v53 = vsub.f32 0.0, %v1934_v27  ;;  %v1813_v27 = vmin.f32 %v5845_v10, 0.0 }
 0x284   : > { %v1949_v30 = vmul.f32 1.442695, %v1941_v32  ;;  %v1935_v8 = vand.u32 2147483647, %v5850_v45 }
 0x285   : > { %v1837_v14 = vmul.f32 1.442695, %v1829_v38  ;;  %v1749_v48 = vpop.xlane.xlu1 %1748  ;;  %v1824_v26 = vand.u32 2147483647, %v5867_v59 }
 0x286   : > { %4761 = vpow2.f32 %v1949_v30  ;;  %v1943_v36 = vsub.f32 0.0, %v1935_v8  ;;  %v5854_v17 = vadd.f32 %v5839_v24, %v1749_v48  ;;  %v1792_v56 = vpop.xlane.xlu0 %1791 }
 0x287   : > { %4763 = vpow2.f32 %v1837_v14  ;;  %v1832_v33 = vsub.f32 0.0, %v1824_v26  ;;  %v5878_v50 = vadd.f32 %v5839_v24, %v1792_v56 }
 0x288   : > { %v1953_v49 = vmul.f32 1.442695, %v1943_v36  ;;  %v1825_v57 = vand.u32 2147483647, %v5854_v17 }
 0x289   : > { %v1795_v51 = vpop.xlane.xlu1 %1794  ;;  %v1843_v30 = vmul.f32 1.442695, %v1832_v33  ;;  %v1936_v14 = vand.u32 2147483647, %v5878_v50 }
 0x28a   : > { %4765 = vpow2.f32 %v1953_v49  ;;  %v1833_v20 = vsub.f32 0.0, %v1825_v57  ;;  %v5861_v55 = vadd.f32 %v5839_v24, %v1795_v51  ;;  %v1743_v6 = vpop.xlane.xlu0 %1742  ;;  %v1951_v49 = vmul.f32 1.442695, %v1942_v53 }
 0x28b   : > { %v5864_v47 = vadd.f32 %v5839_v24, %v1743_v6 }
 0x28c   : > { %v1845_v60 = vmul.f32 1.442695, %v1833_v20  ;;  %v1937_v52 = vand.u32 2147483647, %v5861_v55  ;;  %v1944_v20 = vsub.f32 0.0, %v1936_v14 }
 0x28d   : > { %v1823_v7 = vand.u32 2147483647, %v5864_v47 }
 0x28e   : > { %4767 = vpow2.f32 %v1845_v60  ;;  %v1945_v39 = vsub.f32 0.0, %v1937_v52  ;;  %v1752_v61 = vpop.xlane.xlu0 %1751 }
 0x28f   : > { %v1831_v25 = vsub.f32 0.0, %v1823_v7  ;;  %v5881_v8 = vadd.f32 %v5839_v24, %v1752_v61  ;;  %v1955_v61 = vmul.f32 1.442695, %v1944_v20 }
 0x290   : > { %v1957_v34 = vmul.f32 1.442695, %v1945_v39 }
 0x291   : > { %v1841_v41 = vmul.f32 1.442695, %v1831_v25  ;;  %v1826_v51 = vand.u32 2147483647, %v5881_v8 }
 0x292   : > { %4769 = vpow2.f32 %v1957_v34  ;;  %v1798_v40 = vpop.xlane.xlu0 %1797 }
 0x293   : > { %v4762_v21 = vpop.eup %4761  ;;  %4771 = vpow2.f32 %v1841_v41  ;;  %v5885_v48 = vadd.f32 %v5839_v24, %v1798_v40  ;;  %v1834_v39 = vsub.f32 0.0, %v1826_v51 }
 0x294   : > { %v4764_v15 = vpop.eup %4763  ;;  %v1965_v63 = vadd.f32 1.0, %v4762_v21 }
 0x295   : > { %v1853_v28 = vadd.f32 1.0, %v4764_v15  ;;  %v1938_v6 = vand.u32 2147483647, %v5885_v48  ;;  %v1925_v15 = vmin.f32 %v5842_v35, 0.0 }
 0x296   : > { %v1758_v18 = vpop.xlane.xlu0 %1757  ;;  %4773 = vlog2.f32 %v1965_v63  ;;  %v1847_v63 = vmul.f32 1.442695, %v1834_v39 }
 0x297   : > { %v4766_v32 = vpop.eup %4765  ;;  %4775 = vlog2.f32 %v1853_v28  ;;  %v1946_v26 = vsub.f32 0.0, %v1938_v6  ;;  %v5892_v34 = vadd.f32 %v5839_v24, %v1758_v18 }
 0x298   : > { %v1967_v38 = vadd.f32 1.0, %v4766_v32  ;;  %4777 = vpow2.f32 %v1839_v44 }
 0x299   : > { %v1959_v44 = vmul.f32 1.442695, %v1946_v26  ;;  %v1828_v18 = vand.u32 2147483647, %v5892_v34 }
 0x29a   : > { %v1804_v36 = vpop.xlane.xlu0 %1803  ;;  %4779 = vlog2.f32 %v1967_v38 }
 0x29b   : > { %v4768_v56 = vpop.eup %4767  ;;  %4781 = vpow2.f32 %v1843_v30  ;;  %v5895_v41 = vadd.f32 %v5839_v24, %v1804_v36  ;;  %v1836_v35 = vsub.f32 0.0, %v1828_v18 }
 0x29c   : > { %v1857_v57 = vadd.f32 1.0, %v4768_v56 }
 0x29d   : > { %v1940_v32 = vand.u32 2147483647, %v5895_v41 }
 0x29e   : > { %v5889_v60 = vpop.permute.xlu0 %1887  ;;  %4783 = vlog2.f32 %v1857_v57 }
 0x29f   : > { %v4770_v52 = vpop.eup %4769  ;;  %4785 = vpow2.f32 %v1951_v49  ;;  %v1948_v57 = vsub.f32 0.0, %v1940_v32 }
 0x2a0   : > { %v4772_v7 = vpop.eup %4771  ;;  %v1969_v37 = vadd.f32 1.0, %v4770_v52 }
 0x2a1   : > { %v1855_v25 = vadd.f32 1.0, %v4772_v7 }
 0x2a2   : > { %v1998_v62 = vpop.permute.xlu0 %1997  ;;  %4787 = vlog2.f32 %v1969_v37 }
 0x2a3   : > { %v4774_v40 = vpop.eup %4773  ;;  %4789 = vlog2.f32 %v1855_v25 }
 0x2a4   : > { %v4776_v21 = vpop.eup %4775  ;;  %v1974_v33 = vmul.f32 0.6931472, %v4774_v40  ;;  %4791 = vpow2.f32 %v1955_v61  ;;  %v1817_v61 = vmin.f32 %v5854_v17, 0.0  ;;  %v1927_v40 = vmin.f32 %v5850_v45, 0.0 }
 0x2a5   : > { %v1862_v28 = vmul.f32 0.6931472, %v4776_v21  ;;  %v4778_v30 = vpop.eup %4777  ;;  %4793 = vpow2.f32 %v1847_v63 }
 0x2a6   : > { %v1989_v53 = vsub.f32 %v1925_v15, %v1974_v33  ;;  %v2002_v38 = vpop.permute.xlu0 %2001  ;;  %4795 = vpow2.f32 %v1959_v44  ;;  %v1854_v6 = vadd.f32 1.0, %v4778_v30  ;;  %v1929_v15 = vmin.f32 %v5861_v55, 0.0 }
 0x2a7   : > { %v1877_v14 = vsub.f32 %v1813_v27, %v1862_v28  ;;  %v4780_v36 = vpop.eup %4779  ;;  %v1963_v27 = vmul.f32 1.442695, %v1948_v57  ;;  %v1890_v57 = vpop.permute.xlu1 %1889 }
 0x2a8   : > { %v2021_v56 = vadd.f32 %v1998_v62, %v1989_v53  ;;  %v4782_v49 = vpop.eup %4781  ;;  %v1978_v7 = vmul.f32 0.6931472, %v4780_v36  ;;  %v1851_v62 = vmul.f32 1.442695, %v1836_v35  ;;  %4797 = vlog2.f32 %v1854_v6 }
 0x2a9   : > { %v1909_v10 = vadd.f32 %v5837_v19, %v1877_v14  ;;  %v1856_v39 = vadd.f32 1.0, %v4782_v49  ;;  %v1815_v53 = vmin.f32 %v5864_v47, 0.0 }
 0x2aa   : > { %v2029_v51 = vmul.f32 2.0, %v2021_v56  ;;  %v1894_v37 = vpop.permute.xlu0 %1893  ;;  %v1991_v44 = vsub.f32 %v1927_v40, %v1978_v7 }
 0x2ab   : > { %v4784_v20 = vpop.eup %4783  ;;  %v1917_v52 = vmul.f32 2.0, %v1909_v10  ;;  %4799 = vlog2.f32 %v1856_v39 }
 0x2ac   : > { %v1870_v25 = vmul.f32 0.6931472, %v4784_v20  ;;  %v4786_v26 = vpop.eup %4785  ;;  %4801 = vpow2.f32 %v1851_v62  ;;  %v2023_v10 = vadd.f32 %v2002_v38, %v1991_v44 }
 0x2ad   : > { %v2037_v21 = vmax.f32 %v1917_v52, %v2029_v51  ;;  %v1966_v32 = vadd.f32 1.0, %v4786_v26  ;;  %4803 = vpow2.f32 %v1963_v27 }
 0x2ae   : > { %v1881_v19 = vsub.f32 %v1817_v61, %v1870_v25  ;;  %v2006_v36 = vpop.permute.xlu0 %2005  ;;  %v2031_v25 = vmul.f32 2.0, %v2023_v10 }
 0x2af   : > { %v4788_v63 = vpop.eup %4787  ;;  %v2045_v33 = vsub.f32 %v1917_v52, %v2037_v21  ;;  %v2069_v28 = vsub.f32 %v2029_v51, %v2037_v21 }
 0x2b0   : > { %v4790_v18 = vpop.eup %4789  ;;  %v1982_v17 = vmul.f32 0.6931472, %v4788_v63  ;;  %v1913_v55 = vadd.f32 %v1894_v37, %v1881_v19 }
 0x2b1   : > { %v1866_v30 = vmul.f32 0.6931472, %v4790_v18  ;;  %v2053_v45 = vmul.f32 1.442695, %v2045_v33  ;;  %v2077_v14 = vmul.f32 1.442695, %v2069_v28  ;;  %v4792_v56 = vpop.eup %4791 }
 0x2b2   : > { %v1993_v49 = vsub.f32 %v1929_v15, %v1982_v17  ;;  %v4794_v20 = vpop.eup %4793  ;;  %v1968_v6 = vadd.f32 1.0, %v4792_v56  ;;  %v1921_v7 = vmul.f32 2.0, %v1913_v55  ;;  %v1814_v56 = vmin.f32 %v5858_v54, 0.0 }
 0x2b3   : > { %v1879_v35 = vsub.f32 %v1815_v53, %v1866_v30  ;;  %4805 = vpow2.f32 %v2053_v45  ;;  %v4796_v52 = vpop.eup %4795  ;;  %v1858_v26 = vadd.f32 1.0, %v4794_v20  ;;  %v1892_v53 = vpop.permute.xlu1 %1891 }
 0x2b4   : > { %4807 = vpow2.f32 %v2077_v14  ;;  %v2025_v51 = vadd.f32 %v2006_v36, %v1993_v49  ;;  %v1970_v62 = vadd.f32 1.0, %v4796_v52  ;;  %v5914_v52 = vpop.permute.xlu0 %1897 }
 0x2b5   : > { %v1911_v47 = vadd.f32 %v1890_v57, %v1879_v35  ;;  %4809 = vlog2.f32 %v1966_v32  ;;  %v4798_v19 = vpop.eup %4797 }
 0x2b6   : > { %v2033_v39 = vmul.f32 2.0, %v2025_v51  ;;  %4811 = vlog2.f32 %v1968_v6  ;;  %v1864_v45 = vmul.f32 0.6931472, %v4798_v19 }
 0x2b7   : > { %v1919_v61 = vmul.f32 2.0, %v1911_v47  ;;  %4813 = vlog2.f32 %v1858_v26 }
 0x2b8   : > { %v2041_v40 = vmax.f32 %v1921_v7, %v2033_v39  ;;  %v4800_v33 = vpop.eup %4799  ;;  %4815 = vlog2.f32 %v1970_v62  ;;  %v1878_v20 = vsub.f32 %v1814_v56, %v1864_v45 }
 0x2b9   : > { %v2039_v37 = vmax.f32 %v1919_v61, %v2031_v25  ;;  %v4802_v32 = vpop.eup %4801  ;;  %v1868_v57 = vmul.f32 0.6931472, %v4800_v33 }
 0x2ba   : > { %v2049_v21 = vsub.f32 %v1921_v7, %v2041_v40  ;;  %v2073_v15 = vsub.f32 %v2033_v39, %v2041_v40  ;;  %v4804_v17 = vpop.eup %4803  ;;  %v1860_v55 = vadd.f32 1.0, %v4802_v32  ;;  %v1816_v39 = vmin.f32 %v5867_v59, 0.0 }
 0x2bb   : > { %v2047_v38 = vsub.f32 %v1919_v61, %v2039_v37  ;;  %v2071_v27 = vsub.f32 %v2031_v25, %v2039_v37  ;;  %v1972_v51 = vadd.f32 1.0, %v4804_v17  ;;  %v1926_v61 = vmin.f32 %v5873_v58, 0.0 }
 0x2bc   : > { %v2061_v63 = vmul.f32 1.442695, %v2049_v21  ;;  %v2085_v18 = vmul.f32 1.442695, %v2073_v15  ;;  %v1880_v40 = vsub.f32 %v1816_v39, %v1868_v57  ;;  %v1910_v62 = vadd.f32 %v5889_v60, %v1878_v20 }
 0x2bd   : > { %v2057_v28 = vmul.f32 1.442695, %v2047_v38  ;;  %v2081_v44 = vmul.f32 1.442695, %v2071_v27  ;;  %v1928_v58 = vmin.f32 %v5878_v50, 0.0 }
 0x2be   : > { %4817 = vpow2.f32 %v2061_v63  ;;  %v1912_v60 = vadd.f32 %v1892_v53, %v1880_v40  ;;  %v1918_v32 = vmul.f32 2.0, %v1910_v62 }
 0x2bf   : > { %4819 = vpow2.f32 %v2057_v28  ;;  %v5926_v28 = vpop.permute.xlu0 %2009 }
 0x2c0   : > { %v5906_v30 = vpop.eup %4805  ;;  %4821 = vpow2.f32 %v2081_v44  ;;  %v1920_v20 = vmul.f32 2.0, %v1912_v60 }
 0x2c1   : > { %v4808_v14 = vpop.eup %4807  ;;  %4823 = vpow2.f32 %v2085_v18 }
 0x2c2   : > { %v4810_v36 = vpop.eup %4809  ;;  %v2093_v49 = vadd.f32 %v4808_v14, %v5906_v30  ;;  %v1755_v35 = vpop.xlane.xlu1 %1754 }
 0x2c3   : > { %v5911_v10 = vadd.f32 %v5839_v24, %v1755_v35  ;;  %v1976_v47 = vmul.f32 0.6931472, %v4810_v36  ;;  %v4812_v7 = vpop.eup %4811 }
 0x2c4   : > { %4825 = vrcp.f32 %v2093_v49  ;;  %v4814_v37 = vpop.eup %4813  ;;  %v1980_v27 = vmul.f32 0.6931472, %v4812_v7 }
 0x2c5   : > { %v1827_v6 = vand.u32 2147483647, %v5911_v10  ;;  %4827 = vlog2.f32 %v1860_v55  ;;  %v1990_v38 = vsub.f32 %v1926_v61, %v1976_v47  ;;  %v4816_v19 = vpop.eup %4815  ;;  %v1872_v49 = vmul.f32 0.6931472, %v4814_v37 }
 0x2c6   : > { %v1801_v54 = vpop.xlane.xlu1 %1800  ;;  %4829 = vlog2.f32 %v1972_v51  ;;  %v1992_v14 = vsub.f32 %v1928_v58, %v1980_v27  ;;  %v1818_v51 = vmin.f32 %v5881_v8, 0.0  ;;  %v1984_v53 = vmul.f32 0.6931472, %v4816_v19 }
 0x2c7   : > { %v1835_v25 = vsub.f32 0.0, %v1827_v6  ;;  %v5919_v26 = vadd.f32 %v5839_v24, %v1801_v54  ;;  %v2158_v54 = vpop.permute.xlu0 %2157  ;;  %v1930_v61 = vmin.f32 %v5885_v48, 0.0 }
 0x2c8   : > { %v1882_v8 = vsub.f32 %v1818_v51, %v1872_v49 }
 0x2c9   : > { %v1849_v21 = vmul.f32 1.442695, %v1835_v25  ;;  %v1939_v15 = vand.u32 2147483647, %v5919_v26  ;;  %v1994_v19 = vsub.f32 %v1930_v61, %v1984_v53 }
 0x2ca   : > { %v2000_v59 = vpop.permute.xlu1 %1999 }
 0x2cb   : > { %v5923_v63 = vpop.eup %4817  ;;  %4831 = vpow2.f32 %v1849_v21  ;;  %v1947_v33 = vsub.f32 0.0, %v1939_v15  ;;  %v2022_v24 = vadd.f32 %v2000_v59, %v1990_v38  ;;  %v5936_v38 = vld [vmem:[%s5412_s17] sm:$0xff] }
 0x2cc   : > { %v5928_v44 = vpop.eup %4819  ;;  %v5939_v27 = vmul.f32 %v5936_v38, %v2158_v54 }
 0x2cd   : > { %v4822_v18 = vpop.eup %4821  ;;  %v1961_v17 = vmul.f32 1.442695, %v1947_v33  ;;  %v2030_v45 = vmul.f32 2.0, %v2022_v24 }
 0x2ce   : > { %v4824_v36 = vpop.eup %4823  ;;  %v2095_v56 = vadd.f32 %v4822_v18, %v5928_v44  ;;  %v2004_v55 = vpop.permute.xlu1 %2003 }
 0x2cf   : > { %v2097_v50 = vadd.f32 %v4824_v36, %v5923_v63  ;;  %4833 = vpow2.f32 %v1961_v17  ;;  %v2038_v35 = vmax.f32 %v1918_v32, %v2030_v45  ;;  %v2024_v57 = vadd.f32 %v2004_v55, %v1992_v14 }
 0x2d0   : > { %4835 = vrcp.f32 %v2095_v56  ;;  %v1820_v36 = vmin.f32 %v5892_v34, 0.0  ;;  %v2162_v34 = vpop.permute.xlu0 %2161 }
 0x2d1   : > { %v4826_v6 = vpop.eup %4825  ;;  %4837 = vrcp.f32 %v2097_v50  ;;  %v2046_v47 = vsub.f32 %v1918_v32, %v2038_v35  ;;  %v2070_v7 = vsub.f32 %v2030_v45, %v2038_v35  ;;  %v2032_v39 = vmul.f32 2.0, %v2024_v57 }
 0x2d2   : > { %v1896_v25 = vpop.permute.xlu1 %1895  ;;  %v2102_v40 = vmul.f32 %v4826_v6, %v5906_v30  ;;  %v4828_v62 = vpop.eup %4827  ;;  %v1932_v57 = vmin.f32 %v5895_v41, 0.0 }
 0x2d3   : > { %v2055_v37 = vmul.f32 1.442695, %v2046_v47  ;;  %v2079_v21 = vmul.f32 1.442695, %v2070_v7  ;;  %v2040_v15 = vmax.f32 %v1920_v20, %v2032_v39  ;;  %v4830_v58 = vpop.eup %4829  ;;  %v1914_v48 = vadd.f32 %v1896_v25, %v1882_v8  ;;  %v5953_v8 = vld [vmem:[%s5412_s17 + $0x10] sm:$0xff] }
 0x2d4   : > { %v4202_v59 = vadd.f32 -0.1, %v2102_v40  ;;  %v1876_v30 = vmul.f32 0.6931472, %v4828_v62  ;;  %v1988_v55 = vmul.f32 0.6931472, %v4830_v58 }
 0x2d5   : > { %4839 = vpow2.f32 %v2055_v37  ;;  %v2048_v33 = vsub.f32 %v1920_v20, %v2040_v15  ;;  %v2072_v24 = vsub.f32 %v2032_v39, %v2040_v15  ;;  %v1922_v50 = vmul.f32 2.0, %v1914_v48  ;;  %v2166_v48 = vpop.permute.xlu0 %2165 }
 0x2d6   : > { %4841 = vpow2.f32 %v2079_v21  ;;  %v2008_v60 = vpop.permute.xlu1 %2007  ;;  %vm2125_vm1 = vcmp.ge.f32.partialorder %v4202_v59, 0.5  ;;  %v1884_v53 = vsub.f32 %v1820_v36, %v1876_v30  ;;  %v1996_v47 = vsub.f32 %v1932_v57, %v1988_v55 }
 0x2d7   : > { %v2059_v18 = vmul.f32 1.442695, %v2048_v33  ;;  %v2083_v32 = vmul.f32 1.442695, %v2072_v24  ;;  %v2026_v17 = vadd.f32 %v2008_v60, %v1994_v19  ;;  %v5942_v45 = vsel %vm2125_vm1, 1.0, %v5151_v29 }
 0x2d8   : > { %v4832_v14 = vpop.eup %4831  ;;  %v5947_v56 = vmul.f32 %v5939_v27, %v5942_v45  ;;  %v5956_v19 = vmul.f32 %v5953_v8, %v2162_v34  ;;  %vm2576_vm1 = vcmask 253952  }
 0x2d9   : > { %v1859_v49 = vadd.f32 1.0, %v4832_v14  ;;  %4843 = vpow2.f32 %v2059_v18  ;;  %v2034_v35 = vmul.f32 2.0, %v2026_v17 }
 0x2da   : > { %4845 = vpow2.f32 %v2083_v32  ;;  %2466 = vperm.xlu0 %4704, %v5947_v56   ;;  %v1900_v51 = vpop.permute.xlu1 %1899  ;;  %v3831_v32 = vsel %vm2411_vm2, %v5939_v27, 0.0 }
 0x2db   : > { %4847 = vlog2.f32 %v1859_v49  ;;  %v2042_v20 = vmax.f32 %v1922_v50, %v2034_v35  ;;  %v1916_v25 = vadd.f32 %v1900_v51, %v1884_v53  ;;  %v5974_v49 = vld [vmem:[%s5412_s17 + $0x20] sm:$0xff] }
 0x2dc   : > { %v4834_v6 = vpop.eup %4833 }
 0x2dd   : > { %v4836_v7 = vpop.eup %4835  ;;  %v1971_v39 = vadd.f32 1.0, %v4834_v6  ;;  %v2050_v54 = vsub.f32 %v1922_v50, %v2042_v20  ;;  %v2074_v61 = vsub.f32 %v2034_v35, %v2042_v20  ;;  %v1924_v33 = vmul.f32 2.0, %v1916_v25  ;;  %v5994_v25 = vld [vmem:[%s5412_s17 + $0x18] sm:$0xff] }
 0x2de   : > { %v4838_v40 = vpop.eup %4837  ;;  %v2012_v62 = vpop.permute.xlu1 %2011  ;;  %v2106_v41 = vmul.f32 %v4836_v7, %v5928_v44  ;;  %v5977_v50 = vmul.f32 %v5974_v49, %v2166_v48 }
 0x2df   : > { %4849 = vlog2.f32 %v1971_v39  ;;  %v2063_v37 = vmul.f32 1.442695, %v2050_v54  ;;  %v2087_v21 = vmul.f32 1.442695, %v2074_v61  ;;  %v2028_v15 = vadd.f32 %v2012_v62, %v1996_v47 }
 0x2e0   : > { %v4204_v59 = vadd.f32 -0.1, %v2106_v41  ;;  %v2110_v58 = vmul.f32 %v4838_v40, %v5923_v63  ;;  %v5967_v63 = vld [vmem:[%s5412_s17 + $0x8] sm:$0xff]  ;;  %v3840_v39 = vsel %vm2411_vm2, %v5956_v19, 0.0 }
 0x2e1   : > { %4851 = vpow2.f32 %v2063_v37  ;;  %v2036_v24 = vmul.f32 2.0, %v2028_v15  ;;  %v1819_v15 = vmin.f32 %v5911_v10, 0.0 }
 0x2e2   : > { %v5959_v60 = vpop.eup %4839  ;;  %4853 = vpow2.f32 %v2087_v21  ;;  %vm2127_vm3 = vcmp.ge.f32.partialorder %v4204_v59, 0.5  ;;  %v4206_v44 = vadd.f32 -0.1, %v2110_v58  ;;  %v2160_v30 = vpop.permute.xlu1 %2159 }
 0x2e3   : > { %v4842_v18 = vpop.eup %4841  ;;  %v2044_v17 = vmax.f32 %v1924_v33, %v2036_v24  ;;  %v5964_v14 = vsel %vm2127_vm3, 1.0, %v5151_v29  ;;  %v5970_v36 = vmul.f32 %v5967_v63, %v2160_v30  ;;  %v3849_v30 = vsel %vm2411_vm2, %v5977_v50, 0.0 }
 0x2e4   : > { %v2094_v55 = vadd.f32 %v4842_v18, %v5959_v60  ;;  %v5981_v35 = vmul.f32 %v5956_v19, %v5964_v14  ;;  %vm2129_vm4 = vcmp.ge.f32.partialorder %v4206_v44, 0.5  ;;  %v6011_v18 = vld [vmem:[%s5412_s17 + $0x28] sm:$0xff]  ;;  %vm2806_vm3 = vcmask 1042434  }
 0x2e5   : > { %v2052_v57 = vsub.f32 %v1924_v33, %v2044_v17  ;;  %v2076_v51 = vsub.f32 %v2036_v24, %v2044_v17  ;;  %v5984_v20 = vsel %vm2129_vm4, 1.0, %v5151_v29  ;;  %v3832_v53 = vsel %vm2411_vm2, %v5970_v36, 0.0 }
 0x2e6   : > { %v5988_v34 = vpop.eup %4843  ;;  %4855 = vrcp.f32 %v2094_v55  ;;  %2476 = vperm.xlu0 %4704, %v5981_v35   ;;  %v3833_v6 = vadd.f32 %v3832_v53, %v3831_v32  ;;  %v2164_v47 = vpop.permute.xlu1 %2163  ;;  %v6002_v37 = vmul.f32 %v5977_v50, %v5984_v20  ;;  %vm2808_vm4 = vcmask 1043459  }
 0x2e7   : > { %v4846_v7 = vpop.eup %4845  ;;  %v2067_v54 = vmul.f32 1.442695, %v2052_v57  ;;  %v2091_v61 = vmul.f32 1.442695, %v2076_v51  ;;  %v5997_v40 = vmul.f32 %v5994_v25, %v2164_v47  ;;  %v1931_v57 = vmin.f32 %v5919_v26, 0.0 }
 0x2e8   : > { %v4848_v62 = vpop.eup %4847  ;;  %v2096_v41 = vadd.f32 %v4846_v7, %v5988_v34  ;;  %v3834_v21 = vrot.slane %v3833_v6, 4 }
 0x2e9   : > { %v1874_v59 = vmul.f32 0.6931472, %v4848_v62  ;;  %4857 = vpow2.f32 %v2067_v54  ;;  %v3841_v58 = vsel %vm2411_vm2, %v5997_v40, 0.0 }
 0x2ea   : > { %4859 = vrcp.f32 %v2096_v41  ;;  %2486 = vperm.xlu0 %4704, %v6002_v37   ;;  %v3835_v33 = vadd.f32 %v3834_v21, %v3833_v6  ;;  %v3842_v24 = vadd.f32 %v3841_v58, %v3840_v39  ;;  %v2168_v48 = vpop.permute.xlu1 %2167 }
 0x2eb   : > { %v1883_v44 = vsub.f32 %v1819_v15, %v1874_v59  ;;  %4861 = vpow2.f32 %v2091_v61  ;;  %v6014_v10 = vmul.f32 %v6011_v18, %v2168_v48 }
 0x2ec   : > { %v4850_v32 = vpop.eup %4849  ;;  %v3836_v17 = vrot.slane %v3835_v33, 2  ;;  %v3843_v55 = vrot.slane %v3842_v24, 4 }
 0x2ed   : > { %v1986_v51 = vmul.f32 0.6931472, %v4850_v32  ;;  %v3850_v53 = vsel %vm2411_vm2, %v6014_v10, 0.0  ;;  %v1915_v61 = vadd.f32 %v5914_v52, %v1883_v44 }
 0x2ee   : > { %v6019_v6 = vpop.eup %4851  ;;  %v3837_v47 = vadd.f32 %v3836_v17, %v3835_v33  ;;  %v3844_v7 = vadd.f32 %v3843_v55, %v3842_v24  ;;  %v3851_v39 = vadd.f32 %v3850_v53, %v3849_v30 }
 0x2ef   : > { %v4854_v54 = vpop.eup %4853  ;;  %v1995_v62 = vsub.f32 %v1931_v57, %v1986_v51  ;;  %v1923_v48 = vmul.f32 2.0, %v1915_v61 }
 0x2f0   : > { %v2098_v41 = vadd.f32 %v4854_v54, %v6019_v6  ;;  %v3845_v21 = vrot.slane %v3844_v7, 2  ;;  %v3852_v15 = vrot.slane %v3851_v39, 4  ;;  %v3838_v26 = vrot.slane %v3837_v47, 1 }
 0x2f1   : > { %v2027_v59 = vadd.f32 %v5926_v28, %v1995_v62 }
 0x2f2   : > { %4863 = vrcp.f32 %v2098_v41  ;;  %v3846_v1 = vadd.f32 %v3845_v21, %v3844_v7  ;;  %v3853_v46 = vadd.f32 %v3852_v15, %v3851_v39  ;;  %v3839_v52 = vadd.f32 %v3838_v26, %v3837_v47  ;;  %v2170_v15 = vpop.permute.xlu0 %2169 }
 0x2f3   : > { %v4856_v58 = vpop.eup %4855  ;;  %v2035_v32 = vmul.f32 2.0, %v2027_v59  ;;  %v2412_v59 = vsel %vm2411_vm2, %v5947_v56, 0.0 }
 0x2f4   : > { %v2104_v33 = vmul.f32 %v4856_v58, %v5959_v60  ;;  %v3847_v51 = vrot.slane %v3846_v1, 1  ;;  %v3854_v53 = vrot.slane %v3853_v46, 2  ;;  %4865 = vrcp.f32 %v3839_v52 }
 0x2f5   : > { %v2043_v24 = vmax.f32 %v1923_v48, %v2035_v32 }
 0x2f6   : > { %v6025_v30 = vpop.eup %4857  ;;  %v4203_v44 = vadd.f32 -0.1, %v2104_v33  ;;  %v3848_v41 = vadd.f32 %v3847_v51, %v3846_v1  ;;  %v3855_v21 = vadd.f32 %v3854_v53, %v3853_v46  ;;  %v2172_v1 = vpop.permute.xlu1 %2171  ;;  %v6057_v51 = vld [vmem:[%s5412_s17 + $0x38] sm:$0xff] }
 0x2f7   : > { %v4860_v17 = vpop.eup %4859  ;;  %v2051_v55 = vsub.f32 %v1923_v48, %v2043_v24  ;;  %v2075_v57 = vsub.f32 %v2035_v32, %v2043_v24  ;;  %v6045_v32 = vld [vmem:[%s5412_s17 + $0x30] sm:$0xff]  ;;  %v6060_v53 = vmul.f32 %v6057_v51, %v2172_v1  ;;  %s6854_s17 = sld [smem:[#allocation31_spill]] }
 0x2f8   : > { %v4862_v28 = vpop.eup %4861  ;;  %vm2126_vm5 = vcmp.ge.f32.partialorder %v4203_v44, 0.5  ;;  %v2108_v54 = vmul.f32 %v4860_v17, %v5988_v34  ;;  %v6048_v33 = vmul.f32 %v6045_v32, %v2170_v15  ;;  %v3856_v24 = vrot.slane %v3855_v21, 1 }
 0x2f9   : > { %v2065_v61 = vmul.f32 1.442695, %v2051_v55  ;;  %v2089_v62 = vmul.f32 1.442695, %v2075_v57  ;;  %v2100_v7 = vadd.f32 %v4862_v28, %v6025_v30  ;;  %v6030_v60 = vsel %vm2126_vm5, 1.0, %v5151_v29 }
 0x2fa   : > { %v2404_v47 = vmul.f32 %v5970_v36, %v6030_v60  ;;  %v4205_v39 = vadd.f32 -0.1, %v2108_v54  ;;  %v4706_v34 = vpack.i.bf16 %v6030_v60, %v5942_v45  ;;  %v2421_v17 = vsel %vm2411_vm2, %v5981_v35, 0.0 }
 0x2fb   : > { %4867 = vpow2.f32 %v2065_v61  ;;  %v3857_v35 = vadd.f32 %v3856_v24, %v3855_v21  ;;  %v2430_v24 = vsel %vm2411_vm2, %v6002_v37, 0.0 }
 0x2fc   : > { %4869 = vpow2.f32 %v2089_v62  ;;  %2471 = vperm.xlu1 %4705, %v2404_v47   ;;  %v2413_v26 = vsel %vm2411_vm2, %v2404_v47, 0.0  ;;  %vm2128_vm6 = vcmp.ge.f32.partialorder %v4205_v39, 0.5  ;;  %v3859_v62 = vsel %vm2411_vm2, %v6060_v53, 0.0 }
 0x2fd   : > { %4871 = vrcp.f32 %v2100_v7  ;;  %v2414_v58 = vadd.f32 %v2413_v26, %v2412_v59  ;;  %v6040_v48 = vsel %vm2128_vm6, 1.0, %v5151_v29  ;;  %v3858_v7 = vsel %vm2411_vm2, %v6048_v33, 0.0  ;;  %s6655_s20 = scalar_lea.hbm %s6854_s17, %s4235_s2 }
 0x2fe   : > { %v2406_v46 = vmul.f32 %v5997_v40, %v6040_v48  ;;  %4873 = vrcp.f32 %v3848_v41  ;;  %v4711_v44 = vpack.i.bf16 %v6040_v48, %v5964_v14  ;;  %v3860_v15 = vadd.f32 %v3859_v62, %v3858_v7 }
 0x2ff   : > { %v4864_v56 = vpop.eup %4863  ;;  %v2415_v52 = vrot.slane %v2414_v58, 4  ;;  %4875 = vrcp.f32 %v3857_v35 }
 0x300   : > { %2481 = vperm.xlu1 %4705, %v2406_v46   ;;  %v2422_v55 = vsel %vm2411_vm2, %v2406_v46, 0.0  ;;  %v2112_v57 = vmul.f32 %v4864_v56, %v6019_v6 }
 0x301   : > { %v2416_v28 = vadd.f32 %v2415_v52, %v2414_v58  ;;  %v2423_v54 = vadd.f32 %v2422_v55, %v2421_v17  ;;  %v4866_v1 = vpop.eup %4865 }
 0x302   : > { %v4207_v61 = vadd.f32 -0.1, %v2112_v57  ;;  %v3861_v57 = vrot.slane %v3860_v15, 4 }
 0x303   : > { %v2417_v47 = vrot.slane %v2416_v28, 2  ;;  %v2424_v39 = vrot.slane %v2423_v54, 4 }
 0x304   : > { %vm2130_vm7 = vcmp.ge.f32.partialorder %v4207_v61, 0.5 }
 0x305   : > { %v2425_v41 = vadd.f32 %v2424_v39, %v2423_v54  ;;  %v6067_v6 = vsel %vm2130_vm7, 1.0, %v5151_v29  ;;  %v2418_v59 = vadd.f32 %v2417_v47, %v2416_v28 }
 0x306   : > { %v2408_v26 = vmul.f32 %v6014_v10, %v6067_v6  ;;  %v4716_v58 = vpack.i.bf16 %v6067_v6, %v5984_v20 }
 0x307   : > { %v2426_v46 = vrot.slane %v2425_v41, 2  ;;  %v2419_v21 = vrot.slane %v2418_v59, 1 }
 0x308   : > { %v4868_v56 = vpop.eup %4867  ;;  %2491 = vperm.xlu1 %4705, %v2408_v26   ;;  %v2431_v52 = vsel %vm2411_vm2, %v2408_v26, 0.0 }
 0x309   : > { %v4870_v17 = vpop.eup %4869  ;;  %v2432_v55 = vadd.f32 %v2431_v52, %v2430_v24  ;;  %v2427_v28 = vadd.f32 %v2426_v46, %v2425_v41  ;;  %v2420_v54 = vadd.f32 %v2419_v21, %v2418_v59  ;;  %v3862_v59 = vadd.f32 %v3861_v57, %v3860_v15 }
 0x30a   : > { %v4872_v61 = vpop.eup %4871  ;;  %v2099_v62 = vadd.f32 %v4870_v17, %v4868_v56 }
 0x30b   : > { %v2433_v7 = vrot.slane %v2432_v55, 4  ;;  %v2116_v35 = vmul.f32 %v4872_v61, %v6025_v30  ;;  %v2428_v47 = vrot.slane %v2427_v28, 1  ;;  %v4874_v37 = vpop.eup %4873  ;;  %v3868_v39 = vmul.f32 %v4866_v1, %v2420_v54 }
 0x30c   : > { %4877 = vrcp.f32 %v2099_v62  ;;  %v3863_v1 = vrot.slane %v3862_v59, 2  ;;  %vm2448_vm12 = vcmp.eq.f32.partialorder %v2420_v54, 0.0 }
 0x30d   : > { %v2434_v26 = vadd.f32 %v2433_v7, %v2432_v55  ;;  %v4209_v41 = vadd.f32 -0.1, %v2116_v35  ;;  %v2429_v46 = vadd.f32 %v2428_v47, %v2427_v28  ;;  %3876 = vst.msk [vmem:[%s6081_s25] sm:$0x1] %vm3875_vm8, %v3868_v39  ;;  %v4876_v28 = vpop.eup %4875 }
 0x30e   : > { %v3864_v61 = vadd.f32 %v3863_v1, %v3862_v59  ;;  %v4211_v59 = vsel %vm2448_vm12, 1.0, %v5151_v29 }
 0x30f   : > { %v2435_v21 = vrot.slane %v2434_v26, 2  ;;  %vm2132_vm9 = vcmp.ge.f32.partialorder %v4209_v41, 0.5  ;;  %vm2449_vm10 = vcmp.eq.f32.partialorder %v2429_v46, 0.0  ;;  %v3870_v30 = vmul.f32 %v4874_v37, %v2429_v46 }
 0x310   : > { %v6086_v24 = vsel %vm2132_vm9, 1.0, %v5151_v29  ;;  %v4212_v52 = vsel %vm2449_vm10, 1.0, %v5151_v29  ;;  %v3865_v47 = vrot.slane %v3864_v61, 1 }
 0x311   : > { %v2410_v17 = vmul.f32 %v6060_v53, %v6086_v24  ;;  %3877 = vst.msk [vmem:[%s6081_s25 + $0x1] sm:$0x1] %vm3875_vm8, %v3870_v30  ;;  %v2436_v15 = vadd.f32 %v2435_v21, %v2434_v26  ;;  %v2461_v55 = vadd.f32 %v4212_v52, %v2429_v46  ;;  %v2460_v52 = vadd.f32 %v4211_v59, %v2420_v54 }
 0x312   : > { %v3866_v41 = vadd.f32 %v3865_v47, %v3864_v61 }
 0x313   : > { %2501 = vperm.xlu1 %4705, %v2410_v17   ;;  %v2437_v57 = vrot.slane %v2436_v15, 1  ;;  %v2440_v46 = vsel %vm2411_vm2, %v2410_v17, 0.0 }
 0x314   : > { %4879 = vrcp.f32 %v3866_v41  ;;  %v2191_v41 = vsub.f32 1.0, %v5964_v14 }
 0x315   : > { %v2438_v62 = vadd.f32 %v2437_v57, %v2436_v15 }
 0x317   : > { %2555 = vperm.xlu1 %4705, %v2461_v55   ;;  %v3872_v7 = vmul.f32 %v4876_v28, %v2438_v62  ;;  %vm2450_vm13 = vcmp.eq.f32.partialorder %v2438_v62, 0.0 }
 0x318   : > { %v4213_v15 = vsel %vm2450_vm13, 1.0, %v5151_v29 }
 0x319   : > { %v4878_v35 = vpop.eup %4877  ;;  %3878 = vst.msk [vmem:[%s6081_s25 + $0x2] sm:$0x1] %vm3875_vm8, %v3872_v7  ;;  %v2462_v57 = vadd.f32 %v4213_v15, %v2438_v62  ;;  %v2189_v7 = vsub.f32 1.0, %v5942_v45  ;;  %v2792_v62 = vld [vmem:[#allocation6 + $0x18] sm:$0xff]  ;;  %v2190_v15 = vsub.f32 1.0, %v6030_v60  ;;  %v2196_v45 = vsub.f32 1.0, %v6086_v24 }
 0x31a   : > { %v2114_v37 = vmul.f32 %v4878_v35, %v4868_v56  ;;  %v5153_v60 = vmov 1  }
 0x31c   : > { %v4208_v39 = vadd.f32 -0.1, %v2114_v37 }
 0x31e   : > { %vm2131_vm11 = vcmp.ge.f32.partialorder %v4208_v39, 0.5 }
 0x31f   : > { %v6096_v30 = vsel %vm2131_vm11, 1.0, %v5151_v29 }
 0x320   : > { %v2409_v26 = vmul.f32 %v6048_v33, %v6096_v30 }
 0x321   : > { %v4880_v17 = vpop.eup %4879 }
 0x322   : > { %2496 = vperm.xlu0 %4704, %v2409_v26   ;;  %v2439_v21 = vsel %vm2411_vm2, %v2409_v26, 0.0  ;;  %v2791_v26 = vld [vmem:[#allocation6 + $0x10] sm:$0xff]  ;;  %vm2804_vm2 = vcmask 1041409  }
 0x323   : > { %v2441_v56 = vadd.f32 %v2440_v46, %v2439_v21  ;;  %v2789_v46 = vld [vmem:[#allocation6] sm:$0xff] }
 0x325   : > { %v2442_v1 = vrot.slane %v2441_v56, 4 }
 0x326   : > { %2550 = vperm.xlu0 %4704, %v2460_v52  }
 0x327   : > { %v2443_v55 = vadd.f32 %v2442_v1, %v2441_v56  ;;  %v6142_v1 = vand.u32 4294901760, %v2789_v46 }
 0x329   : > { %v2444_v28 = vrot.slane %v2443_v55, 2 }
 0x32a   : > { %2560 = vperm.xlu0 %4704, %v2462_v57  }
 0x32b   : > { %v2445_v61 = vadd.f32 %v2444_v28, %v2443_v55 }
 0x32d   : > { %v2446_v35 = vrot.slane %v2445_v61, 1 }
 0x32e   : > { %2199 = vperm.xlu0 %4704, %v2189_v7  }
 0x32f   : > { %v2447_v47 = vadd.f32 %v2446_v35, %v2445_v61  ;;  %v6153_v61 = vsub.f32 %v2789_v46, %v6142_v1 }
 0x331   : > { %vm2451_vm14 = vcmp.eq.f32.partialorder %v2447_v47, 0.0  ;;  %v3874_v37 = vmul.f32 %v4880_v17, %v2447_v47  ;;  %v2939_v17 = vand.u32 4294901760, %v6153_v61 }
 0x332   : > { %2588 = vperm.xlu0 %4704, %v5970_v36   ;;  %v4214_v54 = vsel %vm2451_vm14, 1.0, %v5151_v29  ;;  %v6115_v36 = vand.u32 4294901760, %v2792_v62 }
 0x333   : > { %v2463_v39 = vadd.f32 %v4214_v54, %v2447_v47  ;;  %3879 = vst.msk [vmem:[%s6081_s25 + $0x3] sm:$0x1] %vm3875_vm8, %v3874_v37  ;;  %v2192_v47 = vsub.f32 1.0, %v6040_v48  ;;  %v2940_v54 = vsub.f32 %v6153_v61, %v2939_v17 }
 0x334   : > { %4492 = vmatpush3.msra.mxu0 %v6115_v36 }
 0x335   : > { %2565 = vperm.xlu1 %4705, %v2463_v39   ;;  %4493 = vmatprep.subr.mxu0 %v5151_v29  ;;  %v2941_v39 = vand.u32 4294901760, %v2940_v54 }
 0x336   : > { %2598 = vperm.xlu0 %4704, %v5997_v40   ;;  %v6120_v40 = vsub.f32 %v2792_v62, %v6115_v36  ;;  %v2194_v62 = vsub.f32 1.0, %v6067_v6 }
 0x339   : > { %2583 = vperm.xlu1 %4705, %v5939_v27   ;;  %v6122_v27 = vand.u32 4294901760, %v2791_v26 }
 0x33a   : > { %2608 = vperm.xlu0 %4704, %v6014_v10   ;;  %v2193_v10 = vsub.f32 1.0, %v5984_v20  ;;  %v4721_v20 = vpack.i.bf16 %v6086_v24, %v6096_v30 }
 0x33b   : > { %v6128_v59 = vsub.f32 %v2791_v26, %v6122_v27  ;;  %4494 = vmatpush3.msra.mxu0 %v6122_v27 }
 0x33c   : > { %4495 = vmatprep.subr.mxu0 %v5151_v29 }
 0x33d   : > { %2593 = vperm.xlu1 %4705, %v5956_v19   ;;  %v2790_v19 = vld [vmem:[#allocation6 + $0x8] sm:$0xff]  ;;  %v2925_v56 = vand.u32 4294901760, %v6128_v59 }
 0x33e   : > { %2618 = vperm.xlu0 %4704, %v6060_v53   ;;  %v2918_v53 = vand.u32 4294901760, %v6120_v40 }
 0x33f   : > { %v2926_v57 = vsub.f32 %v6128_v59, %v2925_v56 }
 0x340   : > { %v2919_v21 = vsub.f32 %v6120_v40, %v2918_v53 }
 0x341   : > { %2603 = vperm.xlu1 %4705, %v5977_v50   ;;  %v6131_v50 = vand.u32 4294901760, %v2790_v19  ;;  %v2927_v7 = vand.u32 4294901760, %v2926_v57  ;;  %v6243_v57 = vld [vmem:[%s5513_s14 + $0x30] sm:$0xff] }
 0x342   : > { %2209 = vperm.xlu0 %4704, %v2191_v41   ;;  %v2920_v55 = vand.u32 4294901760, %v2919_v21 }
 0x343   : > { %v6140_v52 = vsub.f32 %v2790_v19, %v6131_v50  ;;  %4496 = vmatpush3.msra.mxu0 %v6131_v50 }
 0x344   : > { %4497 = vmatprep.subr.mxu0 %v5151_v29  ;;  %4503 = vmatpush3.msra.mxu1 %v2920_v55 }
 0x345   : > { %2613 = vperm.xlu1 %4705, %v6048_v33   ;;  %v2195_v33 = vsub.f32 1.0, %v6096_v30  ;;  %v2932_v28 = vand.u32 4294901760, %v6140_v52  ;;  %4498 = vmatpush3.msra.mxu0 %v6142_v1 }
 0x346   : > { %2219 = vperm.xlu0 %4704, %v2193_v10   ;;  %4513 = vmatprep.subr.mxu0 %v5151_v29 }
 0x347   : > { %v2933_v35 = vsub.f32 %v6140_v52, %v2932_v28  ;;  %4504 = vmatprep.subr.mxu1 %v5151_v29 }
 0x348   : > { %4505 = vmatpush3.msra.mxu1 %v2927_v7 }
 0x349   : > { %2204 = vperm.xlu1 %4705, %v2190_v15   ;;  %v2934_v37 = vand.u32 4294901760, %v2933_v35  ;;  %4506 = vmatprep.subr.mxu1 %v5151_v29 }
 0x34a   : > { %2229 = vperm.xlu0 %4704, %v2195_v33  }
 0x34b   : > { %4507 = vmatpush3.msra.mxu1 %v2934_v37  ;;  %v6247_v37 = vld [vmem:[%s5513_s14 + $0x38] sm:$0xff] }
 0x34c   : > { %4508 = vmatprep.subr.mxu1 %v5151_v29 }
 0x34d   : > { %2214 = vperm.xlu1 %4705, %v2192_v47   ;;  %4509 = vmatpush3.msra.mxu1 %v2941_v39 }
 0x34e   : > { %4707 = vperm.xlu0 %4704, %v4706_v34   ;;  %4524 = vmatprep.subr.mxu1 %v5151_v29 }
 0x351   : > { %2224 = vperm.xlu1 %4705, %v2194_v62  }
 0x352   : > { %4717 = vperm.xlu0 %4704, %v4716_v58   ;;  %v6236_v58 = vld [vmem:[%s5513_s14 + $0x20] sm:$0xff] }
 0x355   : > { %2234 = vperm.xlu1 %4705, %v2196_v45   ;;  %v2467_v5 = vpop.permute.xlu0 %2466 }
 0x356   : > { %4726 = vset.pattern.permute.xlu0 %v5153_v60 }
 0x357   : > { %2308 = vperm.xlu0 %4726, %v2141_v42   ;;  %v6216_v42 = vld [vmem:[%s5513_s14 + $0x10] sm:$0xff] }
 0x359   : > { %4712 = vperm.xlu1 %4705, %v4711_v44   ;;  %v6231_v44 = vld [vmem:[%s5513_s14 + $0x28] sm:$0xff] }
 0x35b   : > { %2320 = vperm.xlu0 %4726, %v2144_v16  }
 0x35d   : > { %4722 = vperm.xlu1 %4705, %v4721_v20  }
 0x35f   : > { %2328 = vperm.xlu0 %4726, %v2146_v9  }
 0x361   : > { %4727 = vset.pattern.permute.xlu1 %v5153_v60  ;;  %v2477_v12 = vpop.permute.xlu0 %2476 }
 0x362   : > { %2312 = vperm.xlu1 %4727, %v2142_v0  }
 0x363   : > { %2336 = vperm.xlu0 %4726, %v2148_v13  }
 0x366   : > { %2316 = vperm.xlu1 %4727, %v2143_v31   ;;  %v2506_v31 = vmul.f32 %v6216_v42, %v2477_v12 }
 0x367   : > { %2352 = vperm.xlu0 %4726, %v5967_v63  }
 0x368   : > { %v2521_v0 = vsel %vm810_vm0, %v2506_v31, 0.0 }
 0x36a   : > { %2324 = vperm.xlu1 %4727, %v2145_v43  }
 0x36b   : > { %2360 = vperm.xlu0 %4726, %v5994_v25  }
 0x36e   : > { %2332 = vperm.xlu1 %4727, %v6851_v3  }
 0x36f   : > { %2368 = vperm.xlu0 %4726, %v6011_v18   ;;  %v2487_v18 = vpop.permute.xlu0 %2486 }
 0x370   : > { %v2508_v24 = vmul.f32 %v6236_v58, %v2487_v18 }
 0x372   : > { %2348 = vperm.xlu1 %4727, %v5936_v38   ;;  %v2530_v19 = vsel %vm810_vm0, %v2508_v24, 0.0 }
 0x373   : > { %2376 = vperm.xlu0 %4726, %v6057_v51  }
 0x376   : > { %2356 = vperm.xlu1 %4727, %v5953_v8   ;;  %v6222_v8 = vld [vmem:[%s5513_s14 + $0x8] sm:$0xff] }
 0x377   : > { %v2472_v2 = vpop.permute.xlu1 %2471  ;;  %4728 = vset.pattern.permute.xlu0 %v6852_v4 }
 0x378   : > { %v2505_v14 = vmul.f32 %v6222_v8, %v2472_v2 }
 0x37a   : > { %2364 = vperm.xlu1 %4727, %v5974_v49   ;;  %v6226_v49 = vld [vmem:[%s5513_s14] sm:$0xff]  ;;  %v2513_v48 = vsel %vm810_vm0, %v2505_v14, 0.0 }
 0x37b   : > { %v2482_v11 = vpop.permute.xlu1 %2481  ;;  %v2504_v25 = vmul.f32 %v6226_v49, %v2467_v5 }
 0x37c   : > { %v2507_v23 = vmul.f32 %v6212_v22, %v2482_v11 }
 0x37d   : > { %v2512_v6 = vsel %vm810_vm0, %v2504_v25, 0.0 }
 0x37e   : > { %2372 = vperm.xlu1 %4727, %v6045_v32   ;;  %v2522_v43 = vsel %vm810_vm0, %v2507_v23, 0.0  ;;  %v2514_v30 = vadd.f32 %v2513_v48, %v2512_v6 }
 0x37f   : > { %v2523_v16 = vadd.f32 %v2522_v43, %v2521_v0 }
 0x380   : > { %v2515_v10 = vrot.slane %v2514_v30, 4 }
 0x381   : > { %v2524_v13 = vrot.slane %v2523_v16, 4 }
 0x382   : > { %v2516_v33 = vadd.f32 %v2515_v10, %v2514_v30 }
 0x383   : > { %v2492_v9 = vpop.permute.xlu1 %2491  ;;  %v2525_v63 = vadd.f32 %v2524_v13, %v2523_v16 }
 0x384   : > { %v2509_v51 = vmul.f32 %v6231_v44, %v2492_v9  ;;  %v2517_v45 = vrot.slane %v2516_v33, 2 }
 0x385   : > { %v2526_v32 = vrot.slane %v2525_v63, 2 }
 0x386   : > { %v2531_v26 = vsel %vm810_vm0, %v2509_v51, 0.0  ;;  %v2518_v5 = vadd.f32 %v2517_v45, %v2516_v33 }
 0x387   : > { %v2527_v41 = vadd.f32 %v2526_v32, %v2525_v63  ;;  %v2532_v46 = vadd.f32 %v2531_v26, %v2530_v19 }
 0x388   : > { %v2519_v31 = vrot.slane %v2518_v5, 1 }
 0x389   : > { %v2528_v21 = vrot.slane %v2527_v41, 1  ;;  %v2533_v55 = vrot.slane %v2532_v46, 4 }
 0x38a   : > { %v2520_v9 = vadd.f32 %v2519_v31, %v2518_v5 }
 0x38b   : > { %v2529_v35 = vadd.f32 %v2528_v21, %v2527_v41  ;;  %v2534_v60 = vadd.f32 %v2533_v55, %v2532_v46 }
 0x38d   : > { %v2535_v11 = vrot.slane %v2534_v60, 2 }
 0x38e   : > { %v2502_v38 = vpop.permute.xlu1 %2501 }
 0x38f   : > { %v2511_v54 = vmul.f32 %v6247_v37, %v2502_v38  ;;  %v2536_v43 = vadd.f32 %v2535_v11, %v2534_v60 }
 0x391   : > { %v2540_v3 = vsel %vm810_vm0, %v2511_v54, 0.0  ;;  %v2537_v13 = vrot.slane %v2536_v43, 1 }
 0x392   : > { %v2556_v34 = vpop.permute.xlu1 %2555 }
 0x393   : > { %4881 = vrcp.f32 %v2556_v34  ;;  %v2538_v48 = vadd.f32 %v2537_v13, %v2536_v43 }
 0x39d   : > { %v2497_v15 = vpop.permute.xlu0 %2496 }
 0x39e   : > { %v2510_v7 = vmul.f32 %v6243_v57, %v2497_v15 }
 0x3a0   : > { %v4882_v47 = vpop.eup %4881  ;;  %v2539_v20 = vsel %vm810_vm0, %v2510_v7, 0.0 }
 0x3a1   : > { %v2551_v39 = vpop.permute.xlu0 %2550  ;;  %v6250_v62 = vmul.f32 %v4882_v47, %v2529_v35  ;;  %v2541_v2 = vadd.f32 %v2540_v3, %v2539_v20 }
 0x3a2   : > { %4883 = vrcp.f32 %v2551_v39 }
 0x3a3   : > { %2578 = vst.msk [vmem:[%s6253_s28 + $0x1] sm:$0x1] %vm2576_vm1, %v6250_v62  ;;  %v2542_v12 = vrot.slane %v2541_v2, 4 }
 0x3a5   : > { %v2561_v4 = vpop.permute.xlu0 %2560  ;;  %v2543_v0 = vadd.f32 %v2542_v12, %v2541_v2 }
 0x3a6   : > { %4885 = vrcp.f32 %v2561_v4 }
 0x3a7   : > { %v2544_v18 = vrot.slane %v2543_v0, 2 }
 0x3a9   : > { %v6259_v23 = vpop.permute.xlu0 %2199  ;;  %v2545_v19 = vadd.f32 %v2544_v18, %v2543_v0 }
 0x3ab   : > { %v2546_v54 = vrot.slane %v2545_v19, 1 }
 0x3ad   : > { %v6261_v16 = vpop.permute.xlu0 %2588  ;;  %v2547_v11 = vadd.f32 %v2546_v54, %v2545_v19 }
 0x3ae   : > { %v2622_v63 = vmul.f32 %v6222_v8, %v6261_v16 }
 0x3af   : > { %v4884_v38 = vpop.eup %4883 }
 0x3b0   : > { %v2569_v14 = vmul.f32 %v4884_v38, %v2520_v9  ;;  %v2566_v25 = vpop.permute.xlu1 %2565 }
 0x3b1   : > { %4887 = vrcp.f32 %v2566_v25  ;;  %v6265_v34 = vpop.permute.xlu0 %2598 }
 0x3b2   : > { %2577 = vst.msk [vmem:[%s6253_s28] sm:$0x1] %vm2576_vm1, %v2569_v14  ;;  %v2630_v32 = vmul.f32 %v2622_v63, %v2569_v14  ;;  %v2624_v51 = vmul.f32 %v6212_v22, %v6265_v34  ;;  %v2805_v9 = vsel %vm2804_vm2, %v6250_v62, %v2569_v14 }
 0x3b3   : > { %v4886_v6 = vpop.eup %4885 }
 0x3b4   : > { %v2638_v24 = vsub.f32 0.0, %v2630_v32  ;;  %v2632_v30 = vmul.f32 %v2624_v51, %v6250_v62  ;;  %v6272_v41 = vpop.permute.xlu1 %2583  ;;  %v2573_v26 = vmul.f32 %v4886_v6, %v2538_v48 }
 0x3b5   : > { %v2621_v10 = vmul.f32 %v6226_v49, %v6272_v41  ;;  %v6276_v46 = vpop.permute.xlu0 %2608 }
 0x3b6   : > { %v2647_v21 = vmul.f32 1.442695, %v2638_v24  ;;  %v2640_v15 = vsub.f32 0.0, %v2632_v30  ;;  %2579 = vst.msk [vmem:[%s6253_s28 + $0x2] sm:$0x1] %vm2576_vm1, %v2573_v26  ;;  %v2626_v33 = vmul.f32 %v6231_v44, %v6276_v46  ;;  %v2807_v48 = vsel %vm2806_vm3, %v2573_v26, %v2805_v9 }
 0x3b7   : > { %v2629_v55 = vmul.f32 %v2621_v10, %v2569_v14 }
 0x3b8   : > { %4889 = vpow2.f32 %v2647_v21  ;;  %v2651_v7 = vmul.f32 1.442695, %v2640_v15  ;;  %v2634_v35 = vmul.f32 %v2626_v33, %v2573_v26  ;;  %v6282_v47 = vpop.permute.xlu1 %2593 }
 0x3b9   : > { %v2637_v39 = vsub.f32 0.0, %v2629_v55  ;;  %v2623_v45 = vmul.f32 %v6216_v42, %v6282_v47  ;;  %v6286_v60 = vpop.permute.xlu0 %2618 }
 0x3ba   : > { %4891 = vpow2.f32 %v2651_v7  ;;  %v2642_v20 = vsub.f32 0.0, %v2634_v35  ;;  %v2628_v63 = vmul.f32 %v6247_v37, %v6286_v60 }
 0x3bb   : > { %v2645_v3 = vmul.f32 1.442695, %v2637_v39  ;;  %v2631_v2 = vmul.f32 %v2623_v45, %v6250_v62 }
 0x3bc   : > { %v2655_v4 = vmul.f32 1.442695, %v2642_v20  ;;  %v6289_v5 = vpop.permute.xlu1 %2603 }
 0x3bd   : > { %4893 = vpow2.f32 %v2645_v3  ;;  %v2639_v12 = vsub.f32 0.0, %v2631_v2  ;;  %v2625_v31 = vmul.f32 %v6236_v58, %v6289_v5  ;;  %v6293_v43 = vpop.permute.xlu0 %2209 }
 0x3be   : > { %v4888_v0 = vpop.eup %4887  ;;  %4895 = vpow2.f32 %v2655_v4 }
 0x3bf   : > { %v2649_v13 = vmul.f32 1.442695, %v2639_v12  ;;  %v2575_v38 = vmul.f32 %v4888_v0, %v2547_v11  ;;  %v2633_v25 = vmul.f32 %v2625_v31, %v2573_v26 }
 0x3c0   : > { %v6298_v18 = vpop.permute.xlu1 %2613 }
 0x3c1   : > { %4897 = vpow2.f32 %v2649_v13  ;;  %2580 = vst.msk [vmem:[%s6253_s28 + $0x3] sm:$0x1] %vm2576_vm1, %v2575_v38  ;;  %v2636_v32 = vmul.f32 %v2628_v63, %v2575_v38  ;;  %v2641_v51 = vsub.f32 0.0, %v2633_v25  ;;  %v2627_v6 = vmul.f32 %v6243_v57, %v6298_v18  ;;  %v6304_v24 = vpop.permute.xlu0 %2219 }
 0x3c2   : > { %v2809_v62 = vsel %vm2808_vm4, %v2575_v38, %v2807_v48 }
 0x3c3   : > { %v2644_v14 = vsub.f32 0.0, %v2636_v32  ;;  %v2653_v30 = vmul.f32 1.442695, %v2641_v51  ;;  %v2635_v19 = vmul.f32 %v2627_v6, %v2575_v38  ;;  %v2810_v10 = vsel %vm810_vm0, %v2809_v62, 0 }
 0x3c4   : > { %v6307_v21 = vpop.permute.xlu1 %2204  ;;  %v6309_v15 = vand.u32 4294901760, %v2810_v10 }
 0x3c5   : > { %v4890_v26 = vpop.eup %4889  ;;  %v2659_v33 = vmul.f32 1.442695, %v2644_v14  ;;  %4899 = vpow2.f32 %v2653_v30  ;;  %v2643_v55 = vsub.f32 0.0, %v2635_v19  ;;  %v6311_v7 = vpop.permute.xlu0 %2229 }
 0x3c6   : > { %v2662_v35 = vadd.f32 1.0, %v4890_v26  ;;  %4511 = vmatmul.mubr.f32.vlgmr.msra.gmra.mxu1 %v6309_v15  ;;  %v6315_v54 = vsub.f32 %v2810_v10, %v6309_v15 }
 0x3c7   : > { %v4892_v39 = vpop.eup %4891  ;;  %4901 = vpow2.f32 %v2659_v33  ;;  %v2657_v45 = vmul.f32 1.442695, %v2643_v55  ;;  %4525 = vmatpush3.msra.mxu1 %v6115_v36  ;;  %4532 = vmatprep.mubr.msk.f32.mxu1 %vm5152_vm15, %v5151_v29 }
 0x3c8   : > { %4903 = vrcp.f32 %v2662_v35  ;;  %v2664_v20 = vadd.f32 1.0, %v4892_v39  ;;  %4526 = vmatprep.subr.mxu1 %v5151_v29  ;;  %v6321_v3 = vpop.permute.xlu1 %2214  ;;  %v2883_v2 = vand.u32 4294901760, %v6315_v54  ;;  %v6376_v39 = vld [vmem:[%s6853_s4] ss:$0 sm:$0xff] }
 0x3c9   : > { %4905 = vpow2.f32 %v2657_v45  ;;  %4527 = vmatpush3.msra.mxu1 %v6122_v27  ;;  %v6325_v4 = vpop.permute.xlu0 %4707 }
 0x3ca   : > { %v4894_v11 = vpop.eup %4893  ;;  %4907 = vrcp.f32 %v2664_v20  ;;  %4528 = vmatprep.subr.mxu1 %v5151_v29  ;;  %v2884_v12 = vsub.f32 %v6315_v54, %v2883_v2 }
 0x3cb   : > { %v4896_v31 = vpop.eup %4895  ;;  %v2661_v0 = vadd.f32 1.0, %v4894_v11  ;;  %4529 = vmatpush3.msra.mxu1 %v6131_v50  ;;  %v734_v11 = vld [vmem:[%s5391_s13 + $0x8] sm:$0xff] }
 0x3cc   : > { %v2666_v9 = vadd.f32 1.0, %v4896_v31  ;;  %4530 = vmatprep.subr.mxu1 %v5151_v29  ;;  %v2885_v13 = vand.u32 4294901760, %v2884_v12  ;;  %v6331_v38 = vpop.permute.xlu1 %2224  ;;  %v736_v12 = vld [vmem:[%s5391_s13 + $0x18] sm:$0xff] }
 0x3cd   : > { %4909 = vrcp.f32 %v2661_v0  ;;  %4531 = vmatpush3.msra.mxu1 %v6142_v1  ;;  %v6334_v63 = vpop.permute.xlu0 %4717 }
 0x3ce   : > { %v4898_v25 = vpop.eup %4897  ;;  %4911 = vrcp.f32 %v2666_v9  ;;  %4533 = vmatmul.mubr.f32.vlgmr.msra.gmra.mxu1 %v2883_v2  ;;  %4546 = vmatprep.subr.mxu1 %v5151_v29 }
 0x3cf   : > { %v2663_v48 = vadd.f32 1.0, %v4898_v25  ;;  %4500 = vmatmul.mubr.f32.vlgmr.msra.gmra.mxu0 %v2885_v13  ;;  %4547 = vmatpush3.msra.mxu1 %v6115_v36  ;;  %v2238_v25 = vmul.f32 %v6307_v21, %v734_v11 }
 0x3d0   : > { %4514 = vmatpush3.msra.mxu0 %v6120_v40  ;;  %4548 = vmatprep.subr.mxu1 %v5151_v29  ;;  %v6340_v32 = vpop.permute.xlu1 %2234 }
 0x3d1   : > { %4913 = vrcp.f32 %v2663_v48  ;;  %4515 = vmatprep.subr.mxu0 %v5151_v29  ;;  %4549 = vmatpush3.msra.mxu1 %v6122_v27  ;;  %v2240_v48 = vmul.f32 %v6321_v3, %v736_v12 }
 0x3d2   : > { %v4900_v51 = vpop.eup %4899  ;;  %4516 = vmatpush3.msra.mxu0 %v6128_v59  ;;  %4550 = vmatprep.subr.mxu1 %v5151_v29  ;;  %v6346_v6 = vpop.permute.xlu0 %2308 }
 0x3d3   : > { %v2665_v62 = vadd.f32 1.0, %v4900_v51  ;;  %4517 = vmatprep.subr.mxu0 %v5151_v29  ;;  %4551 = vmatpush3.msra.mxu1 %v6131_v50 }
 0x3d4   : > { %v4902_v36 = vpop.eup %4901  ;;  %4518 = vmatpush3.msra.mxu0 %v6140_v52  ;;  %4552 = vmatprep.subr.mxu1 %v5151_v29  ;;  %v6352_v14 = vpop.permute.xlu1 %4712  ;;  %v4720_v52 = vunpack.i.h.bf16 %v6334_v63 }
 0x3d5   : > { %v4904_v27 = vpop.eup %4903  ;;  %v2668_v30 = vadd.f32 1.0, %v4902_v36  ;;  %4915 = vrcp.f32 %v2665_v62  ;;  %4519 = vmatprep.subr.mxu0 %v5151_v29  ;;  %4521 = vmatprep.mubr.msk.f32.mxu0 %vm5152_vm15, %v5151_v29  ;;  %v4715_v45 = vunpack.i.h.bf16 %v6352_v14  ;;  %v738_v36 = vld [vmem:[%s5391_s13 + $0x28] sm:$0xff] }
 0x3d6   : > { %v4906_v19 = vpop.eup %4905  ;;  %v2687_v10 = vmul.f32 1.442695, %v4904_v27  ;;  %4520 = vmatpush3.msra.mxu0 %v6153_v61  ;;  %4553 = vmatpush3.msra.mxu1 %v6142_v1  ;;  %v6359_v50 = vpop.permute.xlu0 %2320  ;;  %v4710_v1 = vunpack.i.h.bf16 %v6325_v4 }
 0x3d7   : > { %v4908_v26 = vpop.eup %4907  ;;  %4917 = vrcp.f32 %v2668_v30  ;;  %v2667_v33 = vadd.f32 1.0, %v4906_v19  ;;  %4554 = vmatprep.mubr.msk.f32.mxu1 %vm5152_vm15, %v5151_v29  ;;  %4522 = vmatmul.mubr.f32.vlgmr.msra.gmra.mxu0 %v6315_v54  ;;  %v2294_v59 = vmul.f32 %v4715_v45, %v6376_v39  ;;  %v4709_v19 = vunpack.i.l.bf16 %v6325_v4 }
 0x3d8   : > { %4919 = vpow2.f32 %v2687_v10  ;;  %v2691_v55 = vmul.f32 1.442695, %v4908_v26  ;;  %4535 = vmatprep.subr.mxu0 %v5151_v29  ;;  %4555 = vmatmul.mubr.f32.vlgmr.msra.gmra.mxu1 %v6309_v15  ;;  %v6366_v35 = vpop.permute.xlu1 %4722  ;;  %v2292_v31 = vmul.f32 %v4710_v1, %v6376_v39 }
 0x3d9   : > { %4921 = vrcp.f32 %v2667_v33  ;;  %4536 = vmatpush3.msra.mxu0 %v2918_v53  ;;  %4543 = vmatprep.mubr.msk.f32.mxu0 %vm5152_vm15, %v5151_v29  ;;  %v2302_v61 = vadd.f32 %v2294_v59, %v2240_v48  ;;  %v4725_v3 = vunpack.i.h.bf16 %v6366_v35  ;;  %v2296_v33 = vmul.f32 %v4720_v52, %v6376_v39 }
 0x3da   : > { %v4910_v54 = vpop.eup %4909  ;;  %4537 = vmatprep.subr.mxu0 %v5151_v29  ;;  %v6380_v20 = vpop.permute.xlu0 %2328  ;;  %4568 = vmatprep.subr.mxu1 %v5151_v29  ;;  %4923 = vpow2.f32 %v2691_v55  ;;  %v740_v55 = vld [vmem:[%s5391_s13 + $0x38] sm:$0xff] }
 0x3db   : > { %v4912_v40 = vpop.eup %4911  ;;  %v2685_v53 = vmul.f32 1.442695, %v4910_v54  ;;  %4538 = vmatpush3.msra.mxu0 %v2925_v56  ;;  %4576 = vmatprep.mubr.msk.f32.mxu1 %vm5152_vm15, %v5151_v29  ;;  %v2244_v59 = vmul.f32 %v6340_v32, %v740_v55 }
 0x3dc   : > { %v2695_v2 = vmul.f32 1.442695, %v4912_v40  ;;  %4539 = vmatprep.subr.mxu0 %v5151_v29  ;;  %v2242_v40 = vmul.f32 %v6331_v38, %v738_v36  ;;  %v4714_v38 = vunpack.i.l.bf16 %v6352_v14  ;;  %v737_v14 = vld [vmem:[%s5391_s13 + $0x20] sm:$0xff] }
 0x3dd   : > { %4925 = vpow2.f32 %v2685_v53  ;;  %4540 = vmatpush3.msra.mxu0 %v2932_v28  ;;  %v2313_v0 = vpop.permute.xlu1 %2312  ;;  %v2300_v28 = vadd.f32 %v2292_v31, %v2238_v25  ;;  %v2342_v53 = vmul.f32 %v6359_v50, %v2302_v61  ;;  %v2298_v31 = vmul.f32 %v4725_v3, %v6376_v39  ;;  %v735_v25 = vld [vmem:[%s5391_s13 + $0x10] sm:$0xff] }
 0x3de   : > { %v4914_v9 = vpop.eup %4913  ;;  %4541 = vmatprep.subr.mxu0 %v5151_v29  ;;  %v6395_v56 = vpop.permute.xlu0 %2336  ;;  %4927 = vpow2.f32 %v2695_v2  ;;  %v2304_v48 = vadd.f32 %v2296_v33, %v2242_v40  ;;  %v4719_v61 = vunpack.i.l.bf16 %v6334_v63 }
 0x3df   : > { %v2689_v13 = vmul.f32 1.442695, %v4914_v9  ;;  %4542 = vmatpush3.msra.mxu0 %v2939_v17  ;;  %v2291_v9 = vmul.f32 %v4709_v19, %v6376_v39  ;;  %v2306_v3 = vadd.f32 %v2298_v31, %v2244_v59  ;;  %v2293_v19 = vmul.f32 %v4714_v38, %v6376_v39 }
 0x3e0   : > { %4544 = vmatmul.mubr.f32.vlgmr.msra.gmra.mxu0 %v6309_v15  ;;  %4557 = vmatprep.subr.mxu0 %v5151_v29  ;;  %v2340_v15 = vmul.f32 %v2313_v0, %v2300_v28  ;;  %v4724_v59 = vunpack.i.l.bf16 %v6366_v35 }
 0x3e1   : > { %4929 = vpow2.f32 %v2689_v13  ;;  %v6404_v51 = vpop.permute.xlu1 %2316  ;;  %4565 = vmatprep.mubr.msk.f32.mxu0 %vm5152_vm15, %v5151_v29  ;;  %v2346_v31 = vmul.f32 %v6395_v56, %v2306_v3 }
 0x3e2   : > { %v4916_v21 = vpop.eup %4915  ;;  %v2353_v17 = vpop.permute.xlu0 %2352 }
 0x3e3   : > { %v2693_v62 = vmul.f32 1.442695, %v4916_v21  ;;  %v2380_v27 = vmul.f32 %v2353_v17, %v734_v11  ;;  %v733_v11 = vld [vmem:[%s5391_s13] sm:$0xff] }
 0x3e4   : > { %v4918_v30 = vpop.eup %4917 }
 0x3e5   : > { %v4920_v10 = vpop.eup %4919  ;;  %v2699_v26 = vmul.f32 1.442695, %v4918_v30  ;;  %4931 = vpow2.f32 %v2693_v62  ;;  %v2388_v1 = vadd.f32 %v2380_v27, %v2340_v15  ;;  %v6413_v54 = vpop.permute.xlu1 %2324  ;;  %v2344_v62 = vmul.f32 %v6380_v20, %v2304_v48 }
 0x3e6   : > { %v4922_v45 = vpop.eup %4921  ;;  %v2361_v2 = vpop.permute.xlu0 %2360  ;;  %v6428_v13 = vmul.f32 %v4920_v10, %v6261_v16  ;;  %v2239_v27 = vmul.f32 %v6293_v43, %v735_v25  ;;  %v2241_v43 = vmul.f32 %v6304_v24, %v737_v14 }
 0x3e7   : > { %4933 = vpow2.f32 %v2699_v26  ;;  %v2697_v4 = vmul.f32 1.442695, %v4922_v45  ;;  %2396 = vst.msk [vmem:[%s6420_s24 + $0x8] sm:$0xff] %vm810_vm0, %v2388_v1  ;;  %v2382_v0 = vmul.f32 %v2361_v2, %v736_v12  ;;  %v4924_v50 = vpop.eup %4923  ;;  %v2237_v12 = vmul.f32 %v6259_v23, %v733_v11 }
 0x3e8   : > { %v2710_v63 = vsel %vm810_vm0, %v6428_v13, 0.0  ;;  %v6447_v10 = vmul.f32 %v4924_v50, %v6265_v34  ;;  %v2301_v24 = vadd.f32 %v2293_v19, %v2239_v27  ;;  %v739_v27 = vld [vmem:[%s5391_s13 + $0x30] sm:$0xff]  ;;  %s6510_s13 = scalar_lea.vmem [#allocation9], %s5387_s10  ;;  %s3885_s10 = sand.u32 1, %s5281_s9  }
 0x3e9   : > { %4935 = vpow2.f32 %v2697_v4  ;;  %v2390_v52 = vadd.f32 %v2382_v0, %v2342_v53  ;;  %v6431_v28 = vpop.permute.xlu1 %2332  ;;  %v2299_v30 = vadd.f32 %v2291_v9, %v2237_v12  ;;  %v2295_v4 = vmul.f32 %v4719_v61, %v6376_v39  ;;  %s3930_s25 = sshll.u32 %s6510_s13, 4  ;;  %s6665_s4 = scalar_lea.sflag [#allocation10], %s3885_s10  ;;  %s6658_s25 = int_to_ptr.vmem [resolvable:$true] %s3930_s25 }
 0x3ea   : > { %v4926_v21 = vpop.eup %4925  ;;  %v2369_v17 = vpop.permute.xlu0 %2368  ;;  %v2341_v35 = vmul.f32 %v6404_v51, %v2301_v24  ;;  %s5017_s5 = scalar_lea.vmem %s6658_s25, 1024  ;;  %p5024_p12 = scmp.lt.s32.totalorder %s6658_s25, %s5022_s27 }
 0x3eb   : > { %v6436_v32 = vmul.f32 %v4926_v21, %v6272_v41  ;;  %2398 = vst.msk [vmem:[%s6420_s24 + $0x18] sm:$0xff] %vm810_vm0, %v2390_v52  ;;  %v2384_v15 = vmul.f32 %v2369_v17, %v738_v36  ;;  %v4928_v23 = vpop.eup %4927  ;;  %v2339_v45 = vmul.f32 %v6346_v6, %v2299_v30  ;;  %v2719_v6 = vsel %vm810_vm0, %v6447_v10, 0.0  ;;  %p5018_p11 = scmp.ne.s32.totalorder %s6658_s25, %s5017_s5 }
 0x3ec   : > { %v2303_v17 = vadd.f32 %v2295_v4, %v2241_v43  ;;  %v2297_v30 = vmul.f32 %v4724_v59, %v6376_v39 }
 0x3ed   : > { %v2709_v20 = vsel %vm810_vm0, %v6436_v32, 0.0  ;;  %v2392_v26 = vadd.f32 %v2384_v15, %v2344_v62  ;;  %v2349_v33 = vpop.permute.xlu1 %2348  ;;  %p5019_p9 = pnand %p5018_p11, %p6856_p7 }
 0x3ee   : > { %v4930_v1 = vpop.eup %4929  ;;  %v2711_v36 = vadd.f32 %v2710_v63, %v2709_v20  ;;  %v2379_v40 = vmul.f32 %v2349_v33, %v733_v11  ;;  %v2377_v53 = vpop.permute.xlu0 %2376  ;;  %v6464_v11 = vmul.f32 %v4928_v23, %v6276_v46  ;;  %v2343_v63 = vmul.f32 %v6413_v54, %v2303_v17 }
 0x3ef   : > { %v6454_v2 = vmul.f32 %v4930_v1, %v6282_v47  ;;  %2400 = vst.msk [vmem:[%s6420_s24 + $0x28] sm:$0xff] %vm810_vm0, %v2392_v26  ;;  %v2386_v0 = vmul.f32 %v2377_v53, %v740_v55  ;;  %p5020_p10 = pneg %p5019_p9 }
 0x3f0   : > { %v2712_v9 = vrot.slane %v2711_v36, 4  ;;  %v2387_v38 = vadd.f32 %v2379_v40, %v2339_v45  ;;  %v2728_v51 = vsel %vm810_vm0, %v6464_v11, 0.0  ;;  %v2243_v45 = vmul.f32 %v6311_v7, %v739_v27 }
 0x3f1   : > { %v2718_v56 = vsel %vm810_vm0, %v6454_v2, 0.0  ;;  %v2394_v50 = vadd.f32 %v2386_v0, %v2346_v31  ;;  %v2357_v48 = vpop.permute.xlu1 %2356 }
 0x3f2   : > { %v4932_v52 = vpop.eup %4931  ;;  %v2713_v55 = vadd.f32 %v2712_v9, %v2711_v36  ;;  %v2720_v21 = vadd.f32 %v2719_v6, %v2718_v56  ;;  %2395 = vst.msk [vmem:[%s6420_s24] sm:$0xff] %vm810_vm0, %v2387_v38  ;;  %v2381_v12 = vmul.f32 %v2357_v48, %v735_v25  ;;  %v2305_v9 = vadd.f32 %v2297_v30, %v2243_v45 }
 0x3f3   : > { %v6472_v61 = vmul.f32 %v4932_v52, %v6289_v5  ;;  %2402 = vst.msk [vmem:[%s6420_s24 + $0x38] sm:$0xff] %vm810_vm0, %v2394_v50 }
 0x3f4   : > { %v4934_v62 = vpop.eup %4933  ;;  %v2714_v3 = vrot.slane %v2713_v55, 2  ;;  %v2721_v15 = vrot.slane %v2720_v21, 4  ;;  %v2389_v19 = vadd.f32 %v2381_v12, %v2341_v35  ;;  %v2345_v7 = vmul.f32 %v6431_v28, %v2305_v9 }
 0x3f5   : > { %v6481_v23 = vmul.f32 %v4934_v62, %v6286_v60  ;;  %v2727_v25 = vsel %vm810_vm0, %v6472_v61, 0.0  ;;  %v2365_v20 = vpop.permute.xlu1 %2364 }
 0x3f6   : > { %v4936_v26 = vpop.eup %4935  ;;  %v2715_v33 = vadd.f32 %v2714_v3, %v2713_v55  ;;  %v2722_v1 = vadd.f32 %v2721_v15, %v2720_v21  ;;  %v2729_v36 = vadd.f32 %v2728_v51, %v2727_v25  ;;  %2397 = vst.msk [vmem:[%s6420_s24 + $0x10] sm:$0xff] %vm810_vm0, %v2389_v19  ;;  %v2383_v39 = vmul.f32 %v2365_v20, %v737_v14 }
 0x3f7   : > { %v6489_v43 = vmul.f32 %v4936_v26, %v6298_v18  ;;  %v2737_v54 = vsel %vm810_vm0, %v6481_v23, 0.0 }
 0x3f8   : > { %v2716_v40 = vrot.slane %v2715_v33, 1  ;;  %v2723_v53 = vrot.slane %v2722_v1, 2  ;;  %v2730_v4 = vrot.slane %v2729_v36, 4  ;;  %v2391_v31 = vadd.f32 %v2383_v39, %v2343_v63 }
 0x3f9   : > { %v2736_v0 = vsel %vm810_vm0, %v6489_v43, 0.0  ;;  %v2373_v59 = vpop.permute.xlu1 %2372 }
 0x3fa   : > { %v2717_v24 = vadd.f32 %v2716_v40, %v2715_v33  ;;  %v2724_v14 = vadd.f32 %v2723_v53, %v2722_v1  ;;  %v2731_v38 = vadd.f32 %v2730_v4, %v2729_v36  ;;  %v2738_v6 = vadd.f32 %v2737_v54, %v2736_v0  ;;  %2399 = vst.msk [vmem:[%s6420_s24 + $0x20] sm:$0xff] %vm810_vm0, %v2391_v31 }
 0x3fb   : > { %v2385_v56 = vmul.f32 %v2373_v59, %v739_v27 }
 0x3fc   : > { %v2745_v50 = vadd.f32 1e-09, %v2717_v24  ;;  %v2725_v48 = vrot.slane %v2724_v14, 1  ;;  %v2732_v52 = vrot.slane %v2731_v38, 2  ;;  %v2739_v55 = vrot.slane %v2738_v6, 4 }
 0x3fd   : > { %v2393_v21 = vadd.f32 %v2385_v56, %v2345_v7 }
 0x3fe   : > { %4937 = vrcp.f32 %v2745_v50  ;;  %v2726_v35 = vadd.f32 %v2725_v48, %v2724_v14  ;;  %v2733_v12 = vadd.f32 %v2732_v52, %v2731_v38  ;;  %v2740_v17 = vadd.f32 %v2739_v55, %v2738_v6 }
 0x3ff   : > { %2401 = vst.msk [vmem:[%s6420_s24 + $0x30] sm:$0xff] %vm810_vm0, %v2393_v21 }
 0x400   : > { %v2746_v62 = vadd.f32 1e-09, %v2726_v35  ;;  %v2734_v3 = vrot.slane %v2733_v12, 1  ;;  %v2741_v15 = vrot.slane %v2740_v17, 2 }
 0x402   : > { %4939 = vrcp.f32 %v2746_v62  ;;  %v2735_v30 = vadd.f32 %v2734_v3, %v2733_v12  ;;  %v2742_v19 = vadd.f32 %v2741_v15, %v2740_v17 }
 0x404   : > { %v2747_v51 = vadd.f32 1e-09, %v2735_v30  ;;  %v2743_v28 = vrot.slane %v2742_v19, 1 }
 0x406   : > { %4941 = vrcp.f32 %v2747_v51  ;;  %v2744_v27 = vadd.f32 %v2743_v28, %v2742_v19  ;;  %v4215_v19 = vld [vmem:[%s6786_s11] ss:$0 sm:$0xff] }
 0x408   : > { %v2748_v25 = vadd.f32 1e-09, %v2744_v27 }
 0x40a   : > { %4943 = vrcp.f32 %v2748_v25 }
 0x40b   : > { %v4938_v63 = vpop.eup %4937 }
 0x40c   : > { %v2757_v20 = vmul.f32 %v4938_v63, %v6436_v32  ;;  %v2758_v26 = vmul.f32 %v4938_v63, %v6428_v13 }
 0x40e   : > { %v2765_v33 = vmul.f32 %v6226_v49, %v2757_v20  ;;  %v2766_v1 = vmul.f32 %v6222_v8, %v2758_v26 }
 0x40f   : > { %v4940_v36 = vpop.eup %4939 }
 0x410   : > { %v2773_v39 = vmul.f32 %v2765_v33, %v6272_v41  ;;  %v2774_v45 = vmul.f32 %v2766_v1, %v6261_v16  ;;  %v2759_v40 = vmul.f32 %v4940_v36, %v6454_v2  ;;  %v2760_v53 = vmul.f32 %v4940_v36, %v6447_v10 }
 0x412   : > { %2781 = vst.msk [vmem:[%s6510_s13] sm:$0xff] %vm810_vm0, %v2773_v39  ;;  %2782 = vst.msk [vmem:[%s6510_s13 + $0x8] sm:$0xff] %vm810_vm0, %v2774_v45  ;;  %v2767_v8 = vmul.f32 %v6216_v42, %v2759_v40  ;;  %v2768_v49 = vmul.f32 %v6212_v22, %v2760_v53 }
 0x413   : > { %v4942_v16 = vpop.eup %4941 }
 0x414   : > { %v2775_v41 = vmul.f32 %v2767_v8, %v6282_v47  ;;  %v2776_v13 = vmul.f32 %v2768_v49, %v6265_v34  ;;  %v2761_v32 = vmul.f32 %v4942_v16, %v6472_v61  ;;  %v2762_v10 = vmul.f32 %v4942_v16, %v6464_v11 }
 0x416   : > { %2783 = vst.msk [vmem:[%s6510_s13 + $0x10] sm:$0xff] %vm810_vm0, %v2775_v41  ;;  %2784 = vst.msk [vmem:[%s6510_s13 + $0x18] sm:$0xff] %vm810_vm0, %v2776_v13  ;;  %v2769_v42 = vmul.f32 %v6236_v58, %v2761_v32  ;;  %v2770_v22 = vmul.f32 %v6231_v44, %v2762_v10 }
 0x417   : > { %v4944_v2 = vpop.eup %4943 }
 0x418   : > { %v2777_v4 = vmul.f32 %v2769_v42, %v6289_v5  ;;  %v2778_v47 = vmul.f32 %v2770_v22, %v6276_v46  ;;  %v2763_v34 = vmul.f32 %v4944_v2, %v6489_v43  ;;  %v2764_v61 = vmul.f32 %v4944_v2, %v6481_v23  ;;  %v3301_v46 = vld [vmem:[%s6787_s12 + $0x18] sm:$0xff]  ;;  %v3300_v5 = vld [vmem:[%s6787_s12 + $0x10] sm:$0xff]  ;;  %v3298_v23 = vld [vmem:[%s6787_s12] sm:$0xff] }
 0x419   : > { %v6562_v43 = vand.u32 4294901760, %v3298_v23 }
 0x41a   : > { %2785 = vst.msk [vmem:[%s6510_s13 + $0x20] sm:$0xff] %vm810_vm0, %v2777_v4  ;;  %2786 = vst.msk [vmem:[%s6510_s13 + $0x28] sm:$0xff] %vm810_vm0, %v2778_v47  ;;  %v2771_v11 = vmul.f32 %v6243_v57, %v2763_v34  ;;  %v2772_v31 = vmul.f32 %v6247_v37, %v2764_v61  ;;  %v3299_v57 = vld [vmem:[%s6787_s12 + $0x8] sm:$0xff]  ;;  %v6553_v37 = vand.u32 4294901760, %v3301_v46 }
 0x41b   : > { %v6575_v59 = vsub.f32 %v3298_v23, %v6562_v43 }
 0x41c   : > { %v2779_v58 = vmul.f32 %v2771_v11, %v6298_v18  ;;  %v2780_v44 = vmul.f32 %v2772_v31, %v6286_v60  ;;  %v6555_v18 = vand.u32 4294901760, %v3300_v5  ;;  %v6557_v60 = vand.u32 4294901760, %v3299_v57  ;;  %4558 = vmatpush3.msra.mxu0 %v6553_v37 }
 0x41d   : > { %v6565_v54 = vsub.f32 %v3301_v46, %v6553_v37  ;;  %4559 = vmatprep.subr.mxu0 %v5151_v29  ;;  %v3439_v6 = vand.u32 4294901760, %v6575_v59 }
 0x41e   : > { %2787 = vst.msk [vmem:[%s6510_s13 + $0x30] sm:$0xff] %vm810_vm0, %v2779_v58  ;;  %2788 = vst.msk [vmem:[%s6510_s13 + $0x38] sm:$0xff] %vm810_vm0, %v2780_v44  ;;  %v6568_v0 = vsub.f32 %v3300_v5, %v6555_v18  ;;  %v6571_v9 = vsub.f32 %v3299_v57, %v6557_v60  ;;  %4560 = vmatpush3.msra.mxu0 %v6555_v18  ;;  %s5023_s13 = scalar_lea.vmem %s5022_s27, 2048 }
 0x41f   : > { %v3418_v24 = vand.u32 4294901760, %v6565_v54  ;;  %4561 = vmatprep.subr.mxu0 %v5151_v29  ;;  %v3440_v55 = vsub.f32 %v6575_v59, %v3439_v6  ;;  %p5025_p13 = scmp.lt.s32.totalorder %s5023_s13, %s5017_s5 }
 0x420   : > { %v3425_v14 = vand.u32 4294901760, %v6568_v0  ;;  %v3432_v38 = vand.u32 4294901760, %v6571_v9  ;;  %4562 = vmatpush3.msra.mxu0 %v6557_v60 }
 0x421   : > { %v3419_v7 = vsub.f32 %v6565_v54, %v3418_v24  ;;  %4563 = vmatprep.subr.mxu0 %v5151_v29  ;;  %v3441_v35 = vand.u32 4294901760, %v3440_v55  ;;  %p5026_p0 = por %p5025_p13, %p5024_p12 }
 0x422   : > { %v3426_v56 = vsub.f32 %v6568_v0, %v3425_v14  ;;  %v3433_v50 = vsub.f32 %v6571_v9, %v3432_v38  ;;  %4564 = vmatpush3.msra.mxu0 %v6562_v43 }
 0x423   : > { %v3420_v48 = vand.u32 4294901760, %v3419_v7  ;;  %4579 = vmatprep.subr.mxu0 %v5151_v29  ;;  %p5027_p5 = pnand %p5026_p0, %p5020_p10 }
 0x424   : > { %v3427_v52 = vand.u32 4294901760, %v3426_v56  ;;  %v3434_v21 = vand.u32 4294901760, %v3433_v50 }
 0x425   : > { %4569 = vmatpush3.msra.mxu1 %v3420_v48 }
 0x426   : > { %4570 = vmatprep.subr.mxu1 %v5151_v29 }
 0x427   : > { %4571 = vmatpush3.msra.mxu1 %v3427_v52 }
 0x428   : > { %4572 = vmatprep.subr.mxu1 %v5151_v29 }
 0x429   : > { %4573 = vmatpush3.msra.mxu1 %v3434_v21 }
 0x42a   : > { %4574 = vmatprep.subr.mxu1 %v5151_v29 }
 0x42b   : > { %4575 = vmatpush3.msra.mxu1 %v3441_v35 }
 0x42c   : > { %4590 = vmatprep.subr.mxu1 %v5151_v29 }
 0x486   : > { %v2978_v12 = vpop.f32.mrf.mxu1 }
 0x488   : > { %v4512_v17 = vpop.f32.mrf.mxu1 }
 0x48e   : > { %v3135_v62 = vpop.f32.mrf.mxu1 }
 0x48f   : > { %v2887_v3 = vpop.f32.mrf.mxu0 }
 0x490   : > { %v4534_v15 = vpop.f32.mrf.mxu1  ;;  %v2888_v51 = vadd.f32 %v4215_v19, %v2887_v3 }
 0x491   : > { %v4501_v30 = vpop.f32.mrf.mxu0 }
 0x492   : > { %v2979_v25 = vadd.f32 %v2978_v12, %v2888_v51 }
 0x497   : > { %v3058_v28 = vpop.f32.mrf.mxu0 }
 0x498   : > { %v3293_v27 = vpop.f32.mrf.mxu1  ;;  %v3059_v26 = vadd.f32 %v3058_v28, %v2979_v25 }
 0x499   : > { %v4523_v63 = vpop.f32.mrf.mxu0 }
 0x49a   : > { %v4556_v20 = vpop.f32.mrf.mxu1  ;;  %v3136_v33 = vadd.f32 %v3135_v62, %v3059_v26 }
 0x4a0   : > { %v3218_v1 = vpop.f32.mrf.mxu0 }
 0x4a1   : > { %v3219_v36 = vadd.f32 %v3218_v1, %v3136_v33 }
 0x4a2   : > { %v4545_v39 = vpop.f32.mrf.mxu0 }
 0x4a3   : > { %v3294_v45 = vadd.f32 %v3293_v27, %v3219_v36 }
 0x4a5   : > { %4945 = vtanh.f32 %v3294_v45 }
 0x4b2   : > { %v4946_v40 = vpop.eup %4945 }
 0x4b3   : > { %v3310_v53 = vsel %vm810_vm0, %v4946_v40, 0 }
 0x4b4   : > { %v3381_v8 = vand.u32 4294901760, %v3310_v53 }
 0x4b6   : > { %v3382_v49 = vsub.f32 %v3310_v53, %v3381_v8  ;;  %4577 = vmatmul.mubr.f32.vlgmr.msra.gmra.mxu1 %v3381_v8 }
 0x4b7   : > { %4591 = vmatpush3.msra.mxu1 %v6553_v37  ;;  %4598 = vmatprep.mubr.msk.f32.mxu1 %vm5152_vm15, %v5151_v29 }
 0x4b8   : > { %4592 = vmatprep.subr.mxu1 %v5151_v29  ;;  %v3383_v16 = vand.u32 4294901760, %v3382_v49 }
 0x4b9   : > { %4593 = vmatpush3.msra.mxu1 %v6555_v18 }
 0x4ba   : > { %4594 = vmatprep.subr.mxu1 %v5151_v29  ;;  %v3384_v41 = vsub.f32 %v3382_v49, %v3383_v16 }
 0x4bb   : > { %4595 = vmatpush3.msra.mxu1 %v6557_v60 }
 0x4bc   : > { %4596 = vmatprep.subr.mxu1 %v5151_v29  ;;  %v3385_v13 = vand.u32 4294901760, %v3384_v41 }
 0x4bd   : > { %4597 = vmatpush3.msra.mxu1 %v6562_v43 }
 0x4be   : > { %4599 = vmatmul.mubr.f32.vlgmr.msra.gmra.mxu1 %v3383_v16  ;;  %4612 = vmatprep.subr.mxu1 %v5151_v29 }
 0x4bf   : > { %4566 = vmatmul.mubr.f32.vlgmr.msra.gmra.mxu0 %v3385_v13  ;;  %4613 = vmatpush3.msra.mxu1 %v6553_v37 }
 0x4c0   : > { %4580 = vmatpush3.msra.mxu0 %v6565_v54  ;;  %4614 = vmatprep.subr.mxu1 %v5151_v29 }
 0x4c1   : > { %4581 = vmatprep.subr.mxu0 %v5151_v29  ;;  %4615 = vmatpush3.msra.mxu1 %v6555_v18 }
 0x4c2   : > { %4582 = vmatpush3.msra.mxu0 %v6568_v0  ;;  %4616 = vmatprep.subr.mxu1 %v5151_v29 }
 0x4c3   : > { %4583 = vmatprep.subr.mxu0 %v5151_v29  ;;  %4617 = vmatpush3.msra.mxu1 %v6557_v60 }
 0x4c4   : > { %4584 = vmatpush3.msra.mxu0 %v6571_v9  ;;  %4618 = vmatprep.subr.mxu1 %v5151_v29 }
 0x4c5   : > { %4585 = vmatprep.subr.mxu0 %v5151_v29  ;;  %4587 = vmatprep.mubr.msk.f32.mxu0 %vm5152_vm15, %v5151_v29 }
 0x4c6   : > { %4586 = vmatpush3.msra.mxu0 %v6575_v59  ;;  %4619 = vmatpush3.msra.mxu1 %v6562_v43 }
 0x4c7   : > { %4620 = vmatprep.mubr.msk.f32.mxu1 %vm5152_vm15, %v5151_v29  ;;  %4588 = vmatmul.mubr.f32.vlgmr.msra.gmra.mxu0 %v3382_v49 }
 0x4c8   : > { %4601 = vmatprep.subr.mxu0 %v5151_v29  ;;  %4621 = vmatmul.mubr.f32.vlgmr.msra.gmra.mxu1 %v3381_v8 }
 0x4c9   : > { %4602 = vmatpush3.msra.mxu0 %v3418_v24  ;;  %4609 = vmatprep.mubr.msk.f32.mxu0 %vm5152_vm15, %v5151_v29 }
 0x4ca   : > { %4603 = vmatprep.subr.mxu0 %v5151_v29 }
 0x4cb   : > { %4604 = vmatpush3.msra.mxu0 %v3425_v14 }
 0x4cc   : > { %4605 = vmatprep.subr.mxu0 %v5151_v29 }
 0x4cd   : > { %4606 = vmatpush3.msra.mxu0 %v3432_v38 }
 0x4ce   : > { %4607 = vmatprep.subr.mxu0 %v5151_v29 }
 0x4cf   : > { %4608 = vmatpush3.msra.mxu0 %v3439_v6 }
 0x4d0   : > { %4610 = vmatmul.mubr.f32.vlgmr.msra.gmra.mxu0 %v3381_v8 }
 0x4d1   : > { %5030 = shalt.err (!%p5027_p5)
}
 0x4d2   : > { %s5031_s10 = scalar_lea.hbm %s6655_s20, 1024  ;;  %s5035_s14 = scalar_lea.hbm %s6854_s17, 2048 }
 0x4d3   : > { %p5032_p2 = scmp.ne.s32.totalorder %s6655_s20, %s5031_s10  ;;  %p5036_p6 = scmp.lt.s32.totalorder %s6655_s20, %s6854_s17 }
 0x4d4   : > { %p5037_p8 = scmp.lt.s32.totalorder %s5035_s14, %s5031_s10 }
 0x4d5   : > { %p5033_p1 = pnand %p5032_p2, %p6856_p7 }
 0x4d6   : > { %p5038_p3 = por %p5037_p8, %p5036_p6 }
 0x4d7   : > { %p5034_p4 = pneg %p5033_p1 }
 0x4d9   : > { %p5039_p11 = pnand %p5038_p3, %p5034_p4 }
 0x4db   : > { %5042 = shalt.err (!%p5039_p11)
}
 0x4dc   : > { %s5155_s5 = smov 128   ;;  %s5156_s27 = smov 8  }
 0x4dd   : > { %4630 = dma.vmem_to_hbm [thread:$0]  (%p6856_p7), %s6658_s25, 1024, %s6655_s20, %s6665_s4, %s5155_s5, %s5155_s5, %s5156_s27  }
 0x4de   : > { %s3913_s6 = sshll.u32 %s6420_s24, 4  ;;  %s4238_s13 = sshll.u32 %s5281_s9, 6  ;;  %s6693_s6 = int_to_ptr.vmem [resolvable:$true] %s3913_s6 }
 0x4df   : > { %s6857_s26 = sld [smem:[#allocation32_spill]]  ;;  %s3881_s16 = scalar_lea.sflag [#allocation5], %s5384_s1 }
 0x4e0   : > { %s5043_s7 = scalar_lea.vmem %s6693_s6, 1024  ;;  %s5157_s8 = smov [#allocation8]  }
 0x4e1   : > { %p5044_p9 = scmp.ne.s32.totalorder %s6693_s6, %s5043_s7  ;;  %s5047_s20 = sshll.u32 %s5157_s8, 4  ;;  %s5048_s20 = int_to_ptr.vmem [resolvable:$false] %s5047_s20 }
 0x4e2   : > { %s5049_s9 = scalar_lea.vmem %s5048_s20, 2048  ;;  %p5050_p13 = scmp.lt.s32.totalorder %s6693_s6, %s5048_s20 }
 0x4e3   : > { %p5045_p10 = pnand %p5044_p9, %p6856_p7  ;;  %p5051_p0 = scmp.lt.s32.totalorder %s5049_s9, %s5043_s7 }
 0x4e5   : > { %s6698_s14 = scalar_lea.hbm %s6857_s26, %s4238_s13  ;;  %p5046_p12 = pneg %p5045_p10 }
 0x4e6   : > { %p5052_p5 = por %p5051_p0, %p5050_p13 }
 0x4e8   : > { %p5053_p2 = pnand %p5052_p5, %p5046_p12 }
 0x4ea   : > { %5056 = shalt.err (!%p5053_p2)
}
 0x4eb   : > { %s5057_s24 = scalar_lea.hbm %s6663_s3, 1024  ;;  %s5061_s8 = scalar_lea.hbm %s6855_s23, 2048 }
 0x4ec   : > { %p5058_p1 = scmp.ne.s32.totalorder %s6663_s3, %s5057_s24  ;;  %p5062_p8 = scmp.lt.s32.totalorder %s6663_s3, %s6855_s23 }
 0x4ed   : > { %p5063_p3 = scmp.lt.s32.totalorder %s5061_s8, %s5057_s24 }
 0x4ee   : > { %p5059_p4 = pnand %p5058_p1, %p6856_p7 }
 0x4ef   : > { %p5064_p11 = por %p5063_p3, %p5062_p8 }
 0x4f0   : > { %p5060_p6 = pneg %p5059_p4 }
 0x4f2   : > { %p5065_p9 = pnand %p5064_p11, %p5060_p6 }
 0x4f4   : > { %5068 = shalt.err (!%p5065_p9)
}
 0x4f5   : > { %4629 = dma.vmem_to_hbm [thread:$0]  (%p6856_p7), %s6693_s6, 1024, %s6663_s3, %s3881_s16, %s5155_s5, %s5155_s5, %s5156_s27  }
 0x4f6   : > { %s3946_s7 = sshll.u32 %s6253_s28, 4  ;;  %s5158_s20 = smov [#allocation11]   ;;  %s6725_s7 = int_to_ptr.vmem [resolvable:$true] %s3946_s7 }
 0x4f7   : > { %s5069_s2 = scalar_lea.vmem %s6725_s7, 64  ;;  %s5073_s9 = sshll.u32 %s5158_s20, 4  ;;  %s5074_s9 = int_to_ptr.vmem [resolvable:$false] %s5073_s9 }
 0x4f8   : > { %p5070_p10 = scmp.ne.s32.totalorder %s6725_s7, %s5069_s2  ;;  %s5075_s24 = scalar_lea.vmem %s5074_s9, 128 }
 0x4f9   : > { %p5076_p0 = scmp.lt.s32.totalorder %s6725_s7, %s5074_s9  ;;  %p5077_p5 = scmp.lt.s32.totalorder %s5075_s24, %s5069_s2 }
 0x4fa   : > { %p5071_p12 = pnand %p5070_p10, %p6856_p7 }
 0x4fb   : > { %p5078_p2 = por %p5077_p5, %p5076_p0 }
 0x4fc   : > { %p5072_p13 = pneg %p5071_p12 }
 0x4fe   : > { %p5079_p1 = pnand %p5078_p2, %p5072_p13 }
 0x500   : > { %5082 = shalt.err (!%p5079_p1)
}
 0x501   : > { %s5083_s3 = scalar_lea.hbm %s6698_s14, 64  ;;  %s5087_s27 = scalar_lea.hbm %s6857_s26, 128 }
 0x502   : > { %p5084_p4 = scmp.ne.s32.totalorder %s6698_s14, %s5083_s3  ;;  %p5088_p3 = scmp.lt.s32.totalorder %s6698_s14, %s6857_s26 }
 0x503   : > { %p5089_p11 = scmp.lt.s32.totalorder %s5087_s27, %s5083_s3 }
 0x504   : > { %p5085_p6 = pnand %p5084_p4, %p6856_p7 }
 0x505   : > { %p5090_p9 = por %p5089_p11, %p5088_p3 }
 0x506   : > { %p5086_p8 = pneg %p5085_p6 }
 0x508   : > { %p5091_p10 = pnand %p5090_p9, %p5086_p8 }
 0x50a   : > { %5094 = shalt.err (!%p5091_p10)
}
 0x50b   : > { %s5159_s1 = smov 16   ;;  %s5160_s25 = smov 1   ;;  %v5161_v58 = vmov 1966171168   ;;  %v3801_v46 = vlaneseq  ;;  %vm3826_vm0 = vcmask 16384  }
 0x50c   : > { %4631 = dma.vmem_to_hbm [thread:$0]  (%p6856_p7), %s6725_s7, 64, %s6698_s14, %s6665_s4, %s5159_s1, %s5159_s1, %s5160_s25   ;;  %v3799_v44 = vunpack.c.l.s4 %v5161_v58 }
 0x50d   : > { %s6858_s10 = sld [smem:[#allocation29_spill]]  ;;  %v3802_v18 = vshrl.u32 %v3801_v46, 7 }
 0x50e   : > { %v3800_v37 = vunpack.c.0.s8 %v3799_v44  ;;  %s6859_s14 = sld [smem:[#allocation33_spill]] }
 0x510   : > { %v3803_v54 = vsub.s32 %v3800_v37, %v3802_v18 }
 0x513   : > { %v4216_v4 = vld [vmem:[%s6858_s10] ss:$0 sm:$0xff] }
 0x514   : > { %s718_s7 = scalar_lea.vmem %s6859_s14, %s6870_s22 }
 0x576   : > { %v3478_v29 = vpop.f32.mrf.mxu1 }
 0x578   : > { %v4578_v32 = vpop.f32.mrf.mxu1 }
 0x57e   : > { %v3635_v10 = vpop.f32.mrf.mxu1 }
 0x57f   : > { %v3387_v42 = vpop.f32.mrf.mxu0 }
 0x580   : > { %v4600_v22 = vpop.f32.mrf.mxu1  ;;  %v3388_v47 = vadd.f32 %v4216_v4, %v3387_v42 }
 0x581   : > { %v4567_v2 = vpop.f32.mrf.mxu0 }
 0x582   : > { %v3479_v11 = vadd.f32 %v3478_v29, %v3388_v47 }
 0x587   : > { %v3558_v34 = vpop.f32.mrf.mxu0 }
 0x588   : > { %v3793_v61 = vpop.f32.mrf.mxu1  ;;  %v3559_v57 = vadd.f32 %v3558_v34, %v3479_v11 }
 0x589   : > { %v4589_v31 = vpop.f32.mrf.mxu0 }
 0x58a   : > { %v4622_v5 = vpop.f32.mrf.mxu1  ;;  %v3636_v60 = vadd.f32 %v3635_v10, %v3559_v57 }
 0x590   : > { %v3718_v23 = vpop.f32.mrf.mxu0 }
 0x591   : > { %v3719_v43 = vadd.f32 %v3718_v23, %v3636_v60 }
 0x592   : > { %v4611_v0 = vpop.f32.mrf.mxu0 }
 0x593   : > { %v3794_v9 = vadd.f32 %v3793_v61, %v3719_v43 }
 0x595   : > { %v3804_v59 = vrot.slane %v3794_v9, %v3803_v54 }
 0x597   : > { %v3805_v24 = vcombine.high %v3804_v59, %v3804_v59  ;;  %v3812_v14 = vrot.slane %v3804_v59, %v3803_v54 }
 0x599   : > { %v3819_v38 = vrot.slane %v3805_v24, %v3803_v54  ;;  %v3820_v6 = vcombine.high %v3812_v14, %v3812_v14  ;;  %3827 = vst.msk [vmem:[%s718_s7] sm:$0x1] %vm3826_vm0, %v3812_v14 }
 0x59b   : > { %v3821_v7 = vcombine.high %v3819_v38, %v3819_v38  ;;  %3828 = vst.msk [vmem:[%s718_s7 + $0x1] sm:$0x1] %vm3826_vm0, %v3819_v38  ;;  %3829 = vst.msk [vmem:[%s718_s7 + $0x2] sm:$0x1] %vm3826_vm0, %v3820_v6 }
 0x59d   : > { %3830 = vst.msk [vmem:[%s718_s7 + $0x3] sm:$0x1] %vm3826_vm0, %v3821_v7 }
 0x59e PF: > { %s6860_s2 = sld [smem:[#allocation16_spill]]  ;;  %p6863_p12 = scmp.ge.s32.totalorder %s5141_s19, 2 }
 0x59f   : > { %s6861_s20 = sld [smem:[#allocation17_spill]] }
 0x5a4   : > { %s3969_s9 = sand.u32 1, %s6860_s2  }
 0x5a5   : > { %p6862_p7 = scmp.ne.s32.totalorder %s6861_s20, 0  ;;  %s3970_s22 = scalar_lea.sflag [#allocation5], %s3969_s9 }
 0x5a7   : > { %p4644_p13 = pnand %p6863_p12, %p6862_p7 }
 0x5a9   : > { %p4645_p0 = pneg %p4644_p13 }
 0x5ab   : > { %5120 = dma.done.wait (%p4645_p0), %s3970_s22, 1024  }
 0x5ac   : > { %5122 = vsyncadd (%p4645_p0), %s3970_s22, 4294966272  ;;  %s6864_s24 = sadd.s32 4294967294, %s5141_s19  }
 0x5ad   : > { %s3978_s3 = sand.u32 1, %s6864_s24  }
 0x5ae   : > { %s3979_s28 = scalar_lea.sflag [#allocation10], %s3978_s3 }
 0x5af   : > { %5124 = dma.done.wait (%p4645_p0), %s3979_s28, 1088  }
 0x5b0   : > { %5126 = vsyncadd (%p4645_p0), %s3979_s28, 4294966208  ;;  %s6865_s19 = sld [smem:[#allocation18_spill]]  ;;  %s6866_s29 = smov %s5133_s30 }
 0x5b1   : > { %s6867_s30 = smov %s5137_s0  ;;  %s6868_s0 = smov %s5336_s21 }
 0x5b6   : > { %p38_p5 = scmp.ge.s32.totalorder %s6865_s19, 4  }
 0x5b8   :  { %40 = sbr.rel (!%p38_p5) target bundleno = 24 (0x18), region = 190 }
 0x5bd   :  { %4007 = vsyncpa [#allocation4], 1 }
 0x5be   :  { %4009 = vsyncpa [#allocation4 + $0x1], 1 }
 0x5bf   :  { %4010 = vsyncpa [#allocation7], 1 }
 0x5c0   :  { %4011 = vsyncpa [#allocation5], 1 }
 0x5c1   :  { %4013 = vsyncpa [#allocation5 + $0x1], 1 }
 0x5c2   :  { %4014 = vsyncpa [#allocation10], 1 }
 0x5c3   :  { %4016 = vsyncpa [#allocation10 + $0x1], 1 }

</bundles_post_ra>
